<compile_context>
chip_gen: v5e
topology: v5e:2x2
jax: 0.10.0
libtpu: 0.0.40
codegen_flags: <defaults>
</compile_context>

<pallas_src>
import functools

import jax
import jax.numpy as jnp
from jax import lax
from jax.experimental import pallas as pl
from jax.experimental.pallas import tpu as pltpu

GCT_EPS = 1e-5
GN_EPS = 1e-5

# Per-block activation budget guard (keeps per-batch-element blocks well inside
# v7x's 64 MiB physical VMEM once double-buffering of the activation streams is
# accounted for).
# TODO(synk): add an HW-tiled two-pass (reduce, then normalize) variant of the
# fused conv/GCT/GN kernels for real UNet resolutions exceeding this budget.
_MAX_BLOCK_BYTES = 8 * 1024 * 1024

# TODO(synk): for v6e/v7x, optionally cast the MXU operands (weights + shifted
# activation slices) to bf16 with f32 accumulation for ~2x MXU rate; kept f32
# here to match the PyTorch reference numerics exactly.


# ----------------------------- in-kernel helpers -----------------------------

def _gct_gate(x, alpha, gamma, beta, eps):
    """GCT (l2 mode) channel gate. x: (C, L); zero padding columns are harmless
    because they contribute nothing to the sum of squares."""
    ssq = jnp.sum(x * x, axis=1, keepdims=True)                    # (C, 1) lane reduce
    emb = jnp.sqrt(ssq + eps) * alpha                              # (C, 1)
    norm = gamma * lax.rsqrt(jnp.mean(emb * emb, keepdims=True) + eps)
    return 1.0 + jnp.tanh(emb * norm + beta)                       # (C, 1)


def _gn_relu(y, gn_w, gn_b, maskf, ng, inv_count, eps):
    """GroupNorm (centered, biased variance) + ReLU on a (C, Lw) window whose
    non-image columns are already zero. maskf is the (1, Lw) image-column mask."""
    C = y.shape[0]
    cg = C // ng
    pieces = []
    for g in range(ng):                                            # ng is static
        yg = y[g * cg:(g + 1) * cg, :]                             # (cg, Lw)
        mean = jnp.sum(yg, keepdims=True) * inv_count              # (1, 1)
        yc = (yg - mean) * maskf                                   # centered, re-masked
        var = jnp.sum(yc * yc, keepdims=True) * inv_count          # (1, 1)
        yn = (yc * lax.rsqrt(var + eps) * gn_w[g * cg:(g + 1) * cg, :]
              + gn_b[g * cg:(g + 1) * cg, :])
        pieces.append(jnp.maximum(yn, 0.0) * maskf)
    return jnp.concatenate(pieces, axis=0)                         # (C, Lw)


def _conv3x3_taps(w9_ref, x, Lw, Wp, acc):
    """Accumulate a 3x3 conv as 9 shifted (Cout, Cin) @ (Cin, Lw) MXU GEMMs over
    the padded-flat activation x: (Cin, L). No im2col materialization."""
    for k in range(9):
        off = (k // 3) * Wp + (k % 3)                              # static lane offset
        acc = acc + jnp.dot(w9_ref[k], x[:, off:off + Lw],
                            preferred_element_type=jnp.float32)
    return acc


# ----------------------------- kernels ---------------------------------------

def _deconv2x2_kernel(x_ref, w_ref, b_ref, o_ref):
    # (4*Cout, Cin) @ (Cin, H*W) + bias -- one batch element per grid step.
    o_ref[0] = (jnp.dot(w_ref[...], x_ref[0], preferred_element_type=jnp.float32)
                + b_ref[...])


def _fused_block1_kernel(up_ref, sk_ref, wu_ref, ws_ref, prm_ref, msk_ref, o_ref,
                         *, H, W, Wp, L, ng, gct_eps, gn_eps):
    C = o_ref.shape[1]
    Lw = H * Wp                                                    # conv output window
    up = up_ref[0]                                                 # (C, L)
    sk = sk_ref[0]                                                 # (C, L)
    msk = msk_ref[...]                                             # (1, Lw)
    prm = prm_ref[...]                                             # (C, 9) packed params
    bias = prm[:, 0:1]
    sk_a, sk_g, sk_b = prm[:, 1:2], prm[:, 2:3], prm[:, 3:4]       # decoder GCT (skip)
    g_a, g_g, g_b = prm[:, 4:5], prm[:, 5:6], prm[:, 6:7]          # conv_block GCT1
    gn_w, gn_b = prm[:, 7:8], prm[:, 8:9]                          # GroupNorm1 affine

    # decoder GCT applied to the skip (fused -- no extra HBM round trip)
    skg = sk * _gct_gate(sk, sk_a, sk_g, sk_b, gct_eps)

    # 3x3 conv over the channel concat [up, GCT(skip)]: two weight halves, so
    # the concat never materializes in HBM.
    acc = jnp.zeros((C, Lw), jnp.float32)
    acc = _conv3x3_taps(wu_ref, up, Lw, Wp, acc)
    acc = _conv3x3_taps(ws_ref, skg, Lw, Wp, acc)

    y = (acc + bias) * msk                                         # zero non-image cols
    y = y * _gct_gate(y, g_a, g_g, g_b, gct_eps)                   # GCT1
    out_win = _gn_relu(y, gn_w, gn_b, msk, ng,
                       1.0 / float(H * W * (C // ng)), gn_eps)     # GN1 + ReLU

    # write back in padded-flat layout (zero border preserved for conv2)
    zl = jnp.zeros((C, Wp + 1), jnp.float32)
    zr = jnp.zeros((C, L - (Wp + 1) - Lw), jnp.float32)
    o_ref[0] = jnp.concatenate([zl, out_win, zr], axis=1)


def _fused_block2_kernel(x_ref, w_ref, prm_ref, msk_ref, o_ref,
                         *, H, W, Wp, L, ng, gct_eps, gn_eps):
    C = o_ref.shape[1]
    Lw = H * Wp
    x = x_ref[0]                                                   # (C, L)
    msk = msk_ref[...]                                             # (1, Lw)
    prm = prm_ref[...]                                             # (C, 6)
    bias = prm[:, 0:1]
    g_a, g_g, g_b = prm[:, 1:2], prm[:, 2:3], prm[:, 3:4]
    gn_w, gn_b = prm[:, 4:5], prm[:, 5:6]

    acc = _conv3x3_taps(w_ref, x, Lw, Wp, jnp.zeros((C, Lw), jnp.float32))

    y = (acc + bias) * msk
    y = y * _gct_gate(y, g_a, g_g, g_b, gct_eps)                   # GCT2
    out_win = _gn_relu(y, gn_w, gn_b, msk, ng,
                       1.0 / float(H * W * (C // ng)), gn_eps)     # GN2 + ReLU

    zl = jnp.zeros((C, Wp + 1), jnp.float32)
    zr = jnp.zeros((C, L - (Wp + 1) - Lw), jnp.float32)
    o_ref[0] = jnp.concatenate([zl, out_win, zr], axis=1)


# ----------------------------- pallas wrappers --------------------------------

def conv_transpose_2x2(x_nchw, w_iohw, b):
    """ConvTranspose2d(k=2, s=2, p=0), NCHW. GEMM in Pallas, 2x2 interleave in glue."""
    N, Cin, H, W = x_nchw.shape
    Cout = w_iohw.shape[1]
    xf = x_nchw.reshape(N, Cin, H * W)
    wm = jnp.transpose(w_iohw, (2, 3, 1, 0)).reshape(4 * Cout, Cin)   # rows: (kh,kw,co)
    bm = jnp.tile(b, 4).reshape(4 * Cout, 1)
    y = pl.pallas_call(
        _deconv2x2_kernel,
        out_shape=jax.ShapeDtypeStruct((N, 4 * Cout, H * W), jnp.float32),
        grid=(N,),
        in_specs=[
            pl.BlockSpec((1, Cin, H * W), lambda n: (n, 0, 0)),
            pl.BlockSpec((4 * Cout, Cin), lambda n: (0, 0)),
            pl.BlockSpec((4 * Cout, 1), lambda n: (0, 0)),
        ],
        out_specs=pl.BlockSpec((1, 4 * Cout, H * W), lambda n: (n, 0, 0)),
        compiler_params=pltpu.CompilerParams(dimension_semantics=("parallel",)),
    )(xf, wm, bm)
    # TODO(synk): fold the 2x2 pixel interleave into the kernel's out BlockSpec at
    # large resolutions; negligible at these sizes.
    y = y.reshape(N, 2, 2, Cout, H, W)
    y = jnp.transpose(y, (0, 3, 4, 1, 5, 2)).reshape(N, Cout, 2 * H, 2 * W)
    return y


def _padded_flat(x_nchw, L):
    """NCHW -> (N, C, L): 1-px zero spatial border, flattened, lane-padded to L."""
    N, C, H, W = x_nchw.shape
    xp = jnp.pad(x_nchw, ((0, 0), (0, 0), (1, 1), (1, 1)))
    xf = xp.reshape(N, C, (H + 2) * (W + 2))
    return jnp.pad(xf, ((0, 0), (0, 0), (0, L - (H + 2) * (W + 2))))


def _strip_padded_flat(x_flat, H, W):
    N, C, _ = x_flat.shape
    Hp, Wp = H + 2, W + 2
    return x_flat[:, :, :Hp * Wp].reshape(N, C, Hp, Wp)[:, :, 1:-1, 1:-1]


def _w9(w_oihw):
    Co, Ci = w_oihw.shape[0], w_oihw.shape[1]
    return jnp.transpose(w_oihw, (2, 3, 0, 1)).reshape(9, Co, Ci)   # [kh*3+kw, co, ci]


def decoder_block_forward(inputs_nchw, skip_nchw, params, ng):
    """Matches PyTorch decoder_block.forward (NCHW in, NCHW out)."""
    # x = self.up(inputs)
    up = conv_transpose_2x2(inputs_nchw, params["up_w"], params["up_b"])
    N, C, H, W = up.shape
    assert skip_nchw.shape == (N, C, H, W)
    assert C % ng == 0

    Hp, Wp = H + 2, W + 2
    # lane length: >= Hp*Wp + 2 (shifted-tap overhang), rounded up to 128 (dense stores)
    L = pl.cdiv(Hp * Wp + 2, 128) * 128
    assert C * L * 4 <= _MAX_BLOCK_BYTES, "spatially tile the fused kernels"

    up_f = _padded_flat(up, L)
    sk_f = _padded_flat(skip_nchw, L)

    wu = _w9(params["c1_w"][:, :C])          # conv1 taps hitting `up`
    ws = _w9(params["c1_w"][:, C:])          # conv1 taps hitting GCT(skip)
    w2 = _w9(params["c2_w"])

    prm1 = jnp.stack([params["c1_b"],
                      params["gct_alpha"], params["gct_gamma"], params["gct_beta"],
                      params["g1_alpha"], params["g1_gamma"], params["g1_beta"],
                      params["bn1_w"], params["bn1_b"]], axis=1)           # (C, 9)
    prm2 = jnp.stack([params["c2_b"],
                      params["g2_alpha"], params["g2_gamma"], params["g2_beta"],
                      params["bn2_w"], params["bn2_b"]], axis=1)           # (C, 6)

    Lw = H * Wp
    win_mask = ((jnp.arange(Lw) % Wp) < W).astype(jnp.float32).reshape(1, Lw)

    act_spec = pl.BlockSpec((1, C, L), lambda n: (n, 0, 0))
    w_spec = pl.BlockSpec((9, C, C), lambda n: (0, 0, 0))
    msk_spec = pl.BlockSpec((1, Lw), lambda n: (0, 0))
    cparams = pltpu.CompilerParams(dimension_semantics=("parallel",))

    # conv1 + GCT(skip) + channel concat + GCT1 + GroupNorm1 + ReLU, fully fused
    y1 = pl.pallas_call(
        functools.partial(_fused_block1_kernel, H=H, W=W, Wp=Wp, L=L, ng=ng,
                          gct_eps=GCT_EPS, gn_eps=GN_EPS),
        out_shape=jax.ShapeDtypeStruct((N, C, L), jnp.float32),
        grid=(N,),
        in_specs=[act_spec, act_spec, w_spec, w_spec,
                  pl.BlockSpec((C, 9), lambda n: (0, 0)), msk_spec],
        out_specs=act_spec,
        compiler_params=cparams,
    )(up_f, sk_f, wu, ws, prm1, win_mask)

    # conv2 + GCT2 + GroupNorm2 + ReLU, fully fused
    y2 = pl.pallas_call(
        functools.partial(_fused_block2_kernel, H=H, W=W, Wp=Wp, L=L, ng=ng,
                          gct_eps=GCT_EPS, gn_eps=GN_EPS),
        out_shape=jax.ShapeDtypeStruct((N, C, L), jnp.float32),
        grid=(N,),
        in_specs=[act_spec, w_spec,
                  pl.BlockSpec((C, 6), lambda n: (0, 0)), msk_spec],
        out_specs=act_spec,
        compiler_params=cparams,
    )(y1, w2, prm2, win_mask)

    return _strip_padded_flat(y2, H, W)


# ----------------------------- pure-JAX reference -----------------------------

def _gct_ref(x, a, g, b, eps=GCT_EPS):
    emb = jnp.sqrt(jnp.sum(x * x, axis=(2, 3), keepdims=True) + eps) * a[None, :, None, None]
    norm = g[None, :, None, None] * lax.rsqrt(jnp.mean(emb * emb, axis=1, keepdims=True) + eps)
    return x * (1.0 + jnp.tanh(emb * norm + b[None, :, None, None]))


def _gn_ref(x, w, b, ng, eps=GN_EPS):
    N, C, H, W = x.shape
    xg = x.reshape(N, ng, (C // ng) * H * W)
    m = jnp.mean(xg, axis=-1, keepdims=True)
    v = jnp.mean((xg - m) ** 2, axis=-1, keepdims=True)
    xn = ((xg - m) * lax.rsqrt(v + eps)).reshape(N, C, H, W)
    return xn * w[None, :, None, None] + b[None, :, None, None]


def _conv3x3_ref(x, w, b):
    N, Ci, H, W = x.shape
    xp = jnp.pad(x, ((0, 0), (0, 0), (1, 1), (1, 1)))
    out = jnp.zeros((N, w.shape[0], H, W), jnp.float32)
    for kh in range(3):
        for kw in range(3):
            out = out + jnp.einsum('oc,nchw->nohw', w[:, :, kh, kw],
                                   xp[:, :, kh:kh + H, kw:kw + W])
    return out + b[None, :, None, None]


def _deconv2x2_ref(x, w, b):
    N, Ci, H, W = x.shape
    Co = w.shape[1]
    y = jnp.einsum('nihw,iokl->nohkwl', x, w).reshape(N, Co, 2 * H, 2 * W)
    return y + b[None, :, None, None]


def decoder_block_ref(inputs, skip, p, ng):
    x = _deconv2x2_ref(inputs, p["up_w"], p["up_b"])
    s = _gct_ref(skip, p["gct_alpha"], p["gct_gamma"], p["gct_beta"])
    x = jnp.concatenate([x, s], axis=1)
    x = _conv3x3_ref(x, p["c1_w"], p["c1_b"])
    x = _gct_ref(x, p["g1_alpha"], p["g1_gamma"], p["g1_beta"])
    x = jnp.maximum(_gn_ref(x, p["bn1_w"], p["bn1_b"], ng), 0.0)
    x = _conv3x3_ref(x, p["c2_w"], p["c2_b"])
    x = _gct_ref(x, p["g2_alpha"], p["g2_gamma"], p["g2_beta"])
    x = jnp.maximum(_gn_ref(x, p["bn2_w"], p["bn2_b"], ng), 0.0)
    return x


# ----------------------------- params / main ----------------------------------

def init_params(key, in_c, out_c):
    ks = jax.random.split(key, 20)
    n = lambda k, shape, s=0.1: s * jax.random.normal(k, shape, jnp.float32)
    return {
        # ConvTranspose2d(in_c, out_c, 2, 2): weight (in_c, out_c, 2, 2)
        "up_w": n(ks[0], (in_c, out_c, 2, 2)),
        "up_b": n(ks[1], (out_c,), 0.01),
        # decoder GCT on skip
        "gct_alpha": 1.0 + n(ks[2], (out_c,)),
        "gct_gamma": n(ks[3], (out_c,)),
        "gct_beta": n(ks[4], (out_c,)),
        # conv_block.conv1: Conv2d(2*out_c, out_c, 3, pad=1)
        "c1_w": n(ks[5], (out_c, 2 * out_c, 3, 3)),
        "c1_b": n(ks[6], (out_c,), 0.01),
        "g1_alpha": 1.0 + n(ks[7], (out_c,)),
        "g1_gamma": n(ks[8], (out_c,)),
        "g1_beta": n(ks[9], (out_c,)),
        "bn1_w": 1.0 + n(ks[10], (out_c,)),
        "bn1_b": n(ks[11], (out_c,), 0.01),
        # conv_block.conv2: Conv2d(out_c, out_c, 3, pad=1)
        "c2_w": n(ks[12], (out_c, out_c, 3, 3)),
        "c2_b": n(ks[13], (out_c,), 0.01),
        "g2_alpha": 1.0 + n(ks[14], (out_c,)),
        "g2_gamma": n(ks[15], (out_c,)),
        "g2_beta": n(ks[16], (out_c,)),
        "bn2_w": 1.0 + n(ks[17], (out_c,)),
        "bn2_b": n(ks[18], (out_c,), 0.01),
    }


if __name__ == "__main__":
    in_c, out_c, ng = 16, 8, 2
    N, H, W = 2, 8, 8                        # inputs spatial 8 -> output spatial 16

    key = jax.random.PRNGKey(0)
    k_in, k_skip, k_p = jax.random.split(key, 3)
    inputs = jax.random.normal(k_in, (N, in_c, H, W), jnp.float32)
    skip = jax.random.normal(k_skip, (N, out_c, 2 * H, 2 * W), jnp.float32)
    params = init_params(k_p, in_c, out_c)

    fwd = jax.jit(decoder_block_forward, static_argnames=("ng",))
    out = jax.block_until_ready(fwd(inputs, skip, params, ng=ng))

    assert out.shape == (N, out_c, 2 * H, 2 * W), out.shape
    assert bool(jnp.all(jnp.isfinite(out)))

    ref = decoder_block_ref(inputs, skip, params, ng)
    max_err = float(jnp.max(jnp.abs(out - ref)))
    assert max_err < 5e-3, f"mismatch vs pure-JAX reference: {max_err}"

    print("KERNEL_OK")
</pallas_src>

<mosaic_0001>
module attributes {stable_mosaic.version = 11 : i64} {
  func.func @_deconv2x2_kernel(%arg0: i32, %arg1: memref<1x16x64xf32, #tpu.memory_space<vmem>>, %arg2: memref<32x16xf32, #tpu.memory_space<vmem>>, %arg3: memref<32x1xf32, #tpu.memory_space<vmem>>, %arg4: memref<1x32x64xf32, #tpu.memory_space<vmem>>) attributes {dimension_semantics = [#tpu.dimension_semantics<parallel>], iteration_bounds = array<i64: 2>, scalar_prefetch = 0 : i64, scratch_operands = 0 : i64, tpu.core_type = #tpu.core_type<tc>, window_params = [{transform_indices = @transform_0, window_bounds = array<i64: 1, 16, 64>}, {pipeline_mode = #tpu.pipeline_mode<synchronous>, transform_indices = @transform_1, window_bounds = array<i64: 32, 16>}, {pipeline_mode = #tpu.pipeline_mode<synchronous>, transform_indices = @transform_2, window_bounds = array<i64: 32, 1>}, {transform_indices = @transform_3, window_bounds = array<i64: 1, 32, 64>}]} {
    %c0 = arith.constant 0 : index
    %c0_0 = arith.constant 0 : index
    %0 = vector.load %arg2[%c0, %c0_0] : memref<32x16xf32, #tpu.memory_space<vmem>>, vector<32x16xf32>
    %c0_1 = arith.constant 0 : index
    %c0_2 = arith.constant 0 : index
    %c0_3 = arith.constant 0 : index
    %1 = vector.load %arg1[%c0_1, %c0_2, %c0_3] : memref<1x16x64xf32, #tpu.memory_space<vmem>>, vector<1x16x64xf32>
    %2 = vector.shape_cast %1 : vector<1x16x64xf32> to vector<16x64xf32>
    %cst = arith.constant dense<0.000000e+00> : vector<32x64xf32>
    %3 = tpu.matmul %0, %2, %cst {dimension_numbers = #tpu.dot_dimension_numbers<[1], [0], [0], [1], [0, 0, 1, 1], [], []>} : vector<32x16xf32>, vector<16x64xf32>, vector<32x64xf32> -> vector<32x64xf32>
    %c0_4 = arith.constant 0 : index
    %c0_5 = arith.constant 0 : index
    %4 = vector.load %arg3[%c0_4, %c0_5] : memref<32x1xf32, #tpu.memory_space<vmem>>, vector<32x1xf32>
    %5 = vector.broadcast %4 : vector<32x1xf32> to vector<32x64xf32>
    %6 = arith.addf %3, %5 : vector<32x64xf32>
    %c0_6 = arith.constant 0 : index
    %c0_7 = arith.constant 0 : index
    %c0_8 = arith.constant 0 : index
    %7 = vector.load %arg4[%c0_6, %c0_7, %c0_8] : memref<1x32x64xf32, #tpu.memory_space<vmem>>, vector<1x32x64xf32>
    %8 = vector.shape_cast %7 : vector<1x32x64xf32> to vector<32x64xf32>
    %9 = vector.shape_cast %6 : vector<32x64xf32> to vector<1x32x64xf32>
    tpu.vector_store %arg4[%c0_6, %c0_7, %c0_8], %9 {strides = array<i32>} : memref<1x32x64xf32, #tpu.memory_space<vmem>>, vector<1x32x64xf32>,
    return
  }
  func.func @transform_0(%arg0: i32) -> (i32, i32, i32) {
    %c0_i32 = arith.constant 0 : i32
    %c0_i32_0 = arith.constant 0 : i32
    %c0_i32_1 = arith.constant 0 : i32
    return %arg0, %c0_i32, %c0_i32_0 : i32, i32, i32
  }
  func.func @transform_1(%arg0: i32) -> (i32, i32) {
    %c0_i32 = arith.constant 0 : i32
    %c0_i32_0 = arith.constant 0 : i32
    %c0_i32_1 = arith.constant 0 : i32
    return %c0_i32, %c0_i32_0 : i32, i32
  }
  func.func @transform_2(%arg0: i32) -> (i32, i32) {
    %c0_i32 = arith.constant 0 : i32
    %c0_i32_0 = arith.constant 0 : i32
    %c0_i32_1 = arith.constant 0 : i32
    return %c0_i32, %c0_i32_0 : i32, i32
  }
  func.func @transform_3(%arg0: i32) -> (i32, i32, i32) {
    %c0_i32 = arith.constant 0 : i32
    %c0_i32_0 = arith.constant 0 : i32
    %c0_i32_1 = arith.constant 0 : i32
    return %arg0, %c0_i32, %c0_i32_0 : i32, i32, i32
  }
}

module attributes {stable_mosaic.version = 11 : i64} {
  func.func @_fused_block1_kernel(%arg0: i32, %arg1: memref<1x8x384xf32, #tpu.memory_space<vmem>>, %arg2: memref<1x8x384xf32, #tpu.memory_space<vmem>>, %arg3: memref<9x8x8xf32, #tpu.memory_space<vmem>>, %arg4: memref<9x8x8xf32, #tpu.memory_space<vmem>>, %arg5: memref<8x9xf32, #tpu.memory_space<vmem>>, %arg6: memref<1x288xf32, #tpu.memory_space<vmem>>, %arg7: memref<1x8x384xf32, #tpu.memory_space<vmem>>) attributes {dimension_semantics = [#tpu.dimension_semantics<parallel>], iteration_bounds = array<i64: 2>, scalar_prefetch = 0 : i64, scratch_operands = 0 : i64, tpu.core_type = #tpu.core_type<tc>, window_params = [{transform_indices = @transform_0, window_bounds = array<i64: 1, 8, 384>}, {transform_indices = @transform_1, window_bounds = array<i64: 1, 8, 384>}, {pipeline_mode = #tpu.pipeline_mode<synchronous>, transform_indices = @transform_2, window_bounds = array<i64: 9, 8, 8>}, {pipeline_mode = #tpu.pipeline_mode<synchronous>, transform_indices = @transform_3, window_bounds = array<i64: 9, 8, 8>}, {pipeline_mode = #tpu.pipeline_mode<synchronous>, transform_indices = @transform_4, window_bounds = array<i64: 8, 9>}, {pipeline_mode = #tpu.pipeline_mode<synchronous>, transform_indices = @transform_5, window_bounds = array<i64: 1, 288>}, {transform_indices = @transform_6, window_bounds = array<i64: 1, 8, 384>}]} {
    %c0 = arith.constant 0 : index
    %c0_0 = arith.constant 0 : index
    %c0_1 = arith.constant 0 : index
    %0 = vector.load %arg1[%c0, %c0_0, %c0_1] : memref<1x8x384xf32, #tpu.memory_space<vmem>>, vector<1x8x384xf32>
    %1 = vector.shape_cast %0 : vector<1x8x384xf32> to vector<8x384xf32>
    %c0_2 = arith.constant 0 : index
    %c0_3 = arith.constant 0 : index
    %c0_4 = arith.constant 0 : index
    %2 = vector.load %arg2[%c0_2, %c0_3, %c0_4] : memref<1x8x384xf32, #tpu.memory_space<vmem>>, vector<1x8x384xf32>
    %3 = vector.shape_cast %2 : vector<1x8x384xf32> to vector<8x384xf32>
    %c0_5 = arith.constant 0 : index
    %c0_6 = arith.constant 0 : index
    %4 = vector.load %arg6[%c0_5, %c0_6] : memref<1x288xf32, #tpu.memory_space<vmem>>, vector<1x288xf32>
    %c0_7 = arith.constant 0 : index
    %c0_8 = arith.constant 0 : index
    %5 = vector.load %arg5[%c0_7, %c0_8] : memref<8x9xf32, #tpu.memory_space<vmem>>, vector<8x9xf32>
    %6 = vector.extract_strided_slice %5 {offsets = [0, 0], sizes = [8, 1], strides = [1, 1]} : vector<8x9xf32> to vector<8x1xf32>
    %7 = vector.extract_strided_slice %5 {offsets = [0, 1], sizes = [8, 1], strides = [1, 1]} : vector<8x9xf32> to vector<8x1xf32>
    %8 = vector.extract_strided_slice %5 {offsets = [0, 2], sizes = [8, 1], strides = [1, 1]} : vector<8x9xf32> to vector<8x1xf32>
    %9 = vector.extract_strided_slice %5 {offsets = [0, 3], sizes = [8, 1], strides = [1, 1]} : vector<8x9xf32> to vector<8x1xf32>
    %10 = vector.extract_strided_slice %5 {offsets = [0, 4], sizes = [8, 1], strides = [1, 1]} : vector<8x9xf32> to vector<8x1xf32>
    %11 = vector.extract_strided_slice %5 {offsets = [0, 5], sizes = [8, 1], strides = [1, 1]} : vector<8x9xf32> to vector<8x1xf32>
    %12 = vector.extract_strided_slice %5 {offsets = [0, 6], sizes = [8, 1], strides = [1, 1]} : vector<8x9xf32> to vector<8x1xf32>
    %13 = vector.extract_strided_slice %5 {offsets = [0, 7], sizes = [8, 1], strides = [1, 1]} : vector<8x9xf32> to vector<8x1xf32>
    %14 = vector.extract_strided_slice %5 {offsets = [0, 8], sizes = [8, 1], strides = [1, 1]} : vector<8x9xf32> to vector<8x1xf32>
    %15 = arith.mulf %3, %3 : vector<8x384xf32>
    %cst = arith.constant dense<0.000000e+00> : vector<8xf32>
    %16 = vector.multi_reduction <add>, %15, %cst [1] : vector<8x384xf32> to vector<8xf32>
    %17 = vector.shape_cast %16 : vector<8xf32> to vector<8x1xf32>
    %cst_9 = arith.constant 9.99999974E-6 : f32
    %18 = vector.broadcast %cst_9 : f32 to vector<8x1xf32>
    %19 = arith.addf %17, %18 : vector<8x1xf32>
    %20 = math.sqrt %19 : vector<8x1xf32>
    %21 = arith.mulf %20, %7 : vector<8x1xf32>
    %22 = arith.mulf %21, %21 : vector<8x1xf32>
    %23 = vector.shape_cast %22 : vector<8x1xf32> to vector<1x8x1xf32>
    %cst_10 = arith.constant dense<0.000000e+00> : vector<1xf32>
    %24 = vector.multi_reduction <add>, %23, %cst_10 [1, 2] : vector<1x8x1xf32> to vector<1xf32>
    %25 = vector.shape_cast %24 : vector<1xf32> to vector<1x1x1xf32>
    %26 = vector.extract %25[0, 0, 0] : f32 from vector<1x1x1xf32>
    %27 = vector.broadcast %26 : f32 to vector<1x1xf32>
    %cst_11 = arith.constant 8.000000e+00 : f32
    %28 = vector.broadcast %cst_11 : f32 to vector<1x1xf32>
    %29 = arith.divf %27, %28 : vector<1x1xf32>
    %cst_12 = arith.constant 9.99999974E-6 : f32
    %30 = vector.broadcast %cst_12 : f32 to vector<1x1xf32>
    %31 = arith.addf %29, %30 : vector<1x1xf32>
    %32 = math.rsqrt %31 : vector<1x1xf32>
    %33 = vector.broadcast %32 : vector<1x1xf32> to vector<8x1xf32>
    %34 = arith.mulf %8, %33 : vector<8x1xf32>
    %35 = arith.mulf %21, %34 : vector<8x1xf32>
    %36 = arith.addf %35, %9 : vector<8x1xf32>
    %37 = math.tanh %36 : vector<8x1xf32>
    %cst_13 = arith.constant 1.000000e+00 : f32
    %38 = vector.broadcast %cst_13 : f32 to vector<8x1xf32>
    %39 = arith.addf %38, %37 : vector<8x1xf32>
    %40 = vector.broadcast %39 : vector<8x1xf32> to vector<8x384xf32>
    %41 = arith.mulf %3, %40 : vector<8x384xf32>
    %cst_14 = arith.constant 0.000000e+00 : f32
    %42 = vector.broadcast %cst_14 : f32 to vector<8x288xf32>
    %c0_15 = arith.constant 0 : index
    %c0_16 = arith.constant 0 : index
    %c0_17 = arith.constant 0 : index
    %43 = vector.load %arg3[%c0_15, %c0_16, %c0_17] : memref<9x8x8xf32, #tpu.memory_space<vmem>>, vector<1x8x8xf32>
    %44 = vector.shape_cast %43 : vector<1x8x8xf32> to vector<8x8xf32>
    %45 = vector.extract_strided_slice %1 {offsets = [0, 0], sizes = [8, 288], strides = [1, 1]} : vector<8x384xf32> to vector<8x288xf32>
    %cst_18 = arith.constant dense<0.000000e+00> : vector<8x288xf32>
    %46 = tpu.matmul %44, %45, %cst_18 {dimension_numbers = #tpu.dot_dimension_numbers<[1], [0], [0], [1], [0, 0, 1, 1], [], []>} : vector<8x8xf32>, vector<8x288xf32>, vector<8x288xf32> -> vector<8x288xf32>
    %47 = arith.addf %42, %46 : vector<8x288xf32>
    %c1 = arith.constant 1 : index
    %c0_19 = arith.constant 0 : index
    %c0_20 = arith.constant 0 : index
    %48 = vector.load %arg3[%c1, %c0_19, %c0_20] : memref<9x8x8xf32, #tpu.memory_space<vmem>>, vector<1x8x8xf32>
    %49 = vector.shape_cast %48 : vector<1x8x8xf32> to vector<8x8xf32>
    %50 = vector.extract_strided_slice %1 {offsets = [0, 1], sizes = [8, 288], strides = [1, 1]} : vector<8x384xf32> to vector<8x288xf32>
    %cst_21 = arith.constant dense<0.000000e+00> : vector<8x288xf32>
    %51 = tpu.matmul %49, %50, %cst_21 {dimension_numbers = #tpu.dot_dimension_numbers<[1], [0], [0], [1], [0, 0, 1, 1], [], []>} : vector<8x8xf32>, vector<8x288xf32>, vector<8x288xf32> -> vector<8x288xf32>
    %52 = arith.addf %47, %51 : vector<8x288xf32>
    %c2 = arith.constant 2 : index
    %c0_22 = arith.constant 0 : index
    %c0_23 = arith.constant 0 : index
    %53 = vector.load %arg3[%c2, %c0_22, %c0_23] : memref<9x8x8xf32, #tpu.memory_space<vmem>>, vector<1x8x8xf32>
    %54 = vector.shape_cast %53 : vector<1x8x8xf32> to vector<8x8xf32>
    %55 = vector.extract_strided_slice %1 {offsets = [0, 2], sizes = [8, 288], strides = [1, 1]} : vector<8x384xf32> to vector<8x288xf32>
    %cst_24 = arith.constant dense<0.000000e+00> : vector<8x288xf32>
    %56 = tpu.matmul %54, %55, %cst_24 {dimension_numbers = #tpu.dot_dimension_numbers<[1], [0], [0], [1], [0, 0, 1, 1], [], []>} : vector<8x8xf32>, vector<8x288xf32>, vector<8x288xf32> -> vector<8x288xf32>
    %57 = arith.addf %52, %56 : vector<8x288xf32>
    %c3 = arith.constant 3 : index
    %c0_25 = arith.constant 0 : index
    %c0_26 = arith.constant 0 : index
    %58 = vector.load %arg3[%c3, %c0_25, %c0_26] : memref<9x8x8xf32, #tpu.memory_space<vmem>>, vector<1x8x8xf32>
    %59 = vector.shape_cast %58 : vector<1x8x8xf32> to vector<8x8xf32>
    %60 = vector.extract_strided_slice %1 {offsets = [0, 18], sizes = [8, 288], strides = [1, 1]} : vector<8x384xf32> to vector<8x288xf32>
    %cst_27 = arith.constant dense<0.000000e+00> : vector<8x288xf32>
    %61 = tpu.matmul %59, %60, %cst_27 {dimension_numbers = #tpu.dot_dimension_numbers<[1], [0], [0], [1], [0, 0, 1, 1], [], []>} : vector<8x8xf32>, vector<8x288xf32>, vector<8x288xf32> -> vector<8x288xf32>
    %62 = arith.addf %57, %61 : vector<8x288xf32>
    %c4 = arith.constant 4 : index
    %c0_28 = arith.constant 0 : index
    %c0_29 = arith.constant 0 : index
    %63 = vector.load %arg3[%c4, %c0_28, %c0_29] : memref<9x8x8xf32, #tpu.memory_space<vmem>>, vector<1x8x8xf32>
    %64 = vector.shape_cast %63 : vector<1x8x8xf32> to vector<8x8xf32>
    %65 = vector.extract_strided_slice %1 {offsets = [0, 19], sizes = [8, 288], strides = [1, 1]} : vector<8x384xf32> to vector<8x288xf32>
    %cst_30 = arith.constant dense<0.000000e+00> : vector<8x288xf32>
    %66 = tpu.matmul %64, %65, %cst_30 {dimension_numbers = #tpu.dot_dimension_numbers<[1], [0], [0], [1], [0, 0, 1, 1], [], []>} : vector<8x8xf32>, vector<8x288xf32>, vector<8x288xf32> -> vector<8x288xf32>
    %67 = arith.addf %62, %66 : vector<8x288xf32>
    %c5 = arith.constant 5 : index
    %c0_31 = arith.constant 0 : index
    %c0_32 = arith.constant 0 : index
    %68 = vector.load %arg3[%c5, %c0_31, %c0_32] : memref<9x8x8xf32, #tpu.memory_space<vmem>>, vector<1x8x8xf32>
    %69 = vector.shape_cast %68 : vector<1x8x8xf32> to vector<8x8xf32>
    %70 = vector.extract_strided_slice %1 {offsets = [0, 20], sizes = [8, 288], strides = [1, 1]} : vector<8x384xf32> to vector<8x288xf32>
    %cst_33 = arith.constant dense<0.000000e+00> : vector<8x288xf32>
    %71 = tpu.matmul %69, %70, %cst_33 {dimension_numbers = #tpu.dot_dimension_numbers<[1], [0], [0], [1], [0, 0, 1, 1], [], []>} : vector<8x8xf32>, vector<8x288xf32>, vector<8x288xf32> -> vector<8x288xf32>
    %72 = arith.addf %67, %71 : vector<8x288xf32>
    %c6 = arith.constant 6 : index
    %c0_34 = arith.constant 0 : index
    %c0_35 = arith.constant 0 : index
    %73 = vector.load %arg3[%c6, %c0_34, %c0_35] : memref<9x8x8xf32, #tpu.memory_space<vmem>>, vector<1x8x8xf32>
    %74 = vector.shape_cast %73 : vector<1x8x8xf32> to vector<8x8xf32>
    %75 = vector.extract_strided_slice %1 {offsets = [0, 36], sizes = [8, 288], strides = [1, 1]} : vector<8x384xf32> to vector<8x288xf32>
    %cst_36 = arith.constant dense<0.000000e+00> : vector<8x288xf32>
    %76 = tpu.matmul %74, %75, %cst_36 {dimension_numbers = #tpu.dot_dimension_numbers<[1], [0], [0], [1], [0, 0, 1, 1], [], []>} : vector<8x8xf32>, vector<8x288xf32>, vector<8x288xf32> -> vector<8x288xf32>
    %77 = arith.addf %72, %76 : vector<8x288xf32>
    %c7 = arith.constant 7 : index
    %c0_37 = arith.constant 0 : index
    %c0_38 = arith.constant 0 : index
    %78 = vector.load %arg3[%c7, %c0_37, %c0_38] : memref<9x8x8xf32, #tpu.memory_space<vmem>>, vector<1x8x8xf32>
    %79 = vector.shape_cast %78 : vector<1x8x8xf32> to vector<8x8xf32>
    %80 = vector.extract_strided_slice %1 {offsets = [0, 37], sizes = [8, 288], strides = [1, 1]} : vector<8x384xf32> to vector<8x288xf32>
    %cst_39 = arith.constant dense<0.000000e+00> : vector<8x288xf32>
    %81 = tpu.matmul %79, %80, %cst_39 {dimension_numbers = #tpu.dot_dimension_numbers<[1], [0], [0], [1], [0, 0, 1, 1], [], []>} : vector<8x8xf32>, vector<8x288xf32>, vector<8x288xf32> -> vector<8x288xf32>
    %82 = arith.addf %77, %81 : vector<8x288xf32>
    %c8 = arith.constant 8 : index
    %c0_40 = arith.constant 0 : index
    %c0_41 = arith.constant 0 : index
    %83 = vector.load %arg3[%c8, %c0_40, %c0_41] : memref<9x8x8xf32, #tpu.memory_space<vmem>>, vector<1x8x8xf32>
    %84 = vector.shape_cast %83 : vector<1x8x8xf32> to vector<8x8xf32>
    %85 = vector.extract_strided_slice %1 {offsets = [0, 38], sizes = [8, 288], strides = [1, 1]} : vector<8x384xf32> to vector<8x288xf32>
    %cst_42 = arith.constant dense<0.000000e+00> : vector<8x288xf32>
    %86 = tpu.matmul %84, %85, %cst_42 {dimension_numbers = #tpu.dot_dimension_numbers<[1], [0], [0], [1], [0, 0, 1, 1], [], []>} : vector<8x8xf32>, vector<8x288xf32>, vector<8x288xf32> -> vector<8x288xf32>
    %87 = arith.addf %82, %86 : vector<8x288xf32>
    %c0_43 = arith.constant 0 : index
    %c0_44 = arith.constant 0 : index
    %c0_45 = arith.constant 0 : index
    %88 = vector.load %arg4[%c0_43, %c0_44, %c0_45] : memref<9x8x8xf32, #tpu.memory_space<vmem>>, vector<1x8x8xf32>
    %89 = vector.shape_cast %88 : vector<1x8x8xf32> to vector<8x8xf32>
    %90 = vector.extract_strided_slice %41 {offsets = [0, 0], sizes = [8, 288], strides = [1, 1]} : vector<8x384xf32> to vector<8x288xf32>
    %cst_46 = arith.constant dense<0.000000e+00> : vector<8x288xf32>
    %91 = tpu.matmul %89, %90, %cst_46 {dimension_numbers = #tpu.dot_dimension_numbers<[1], [0], [0], [1], [0, 0, 1, 1], [], []>} : vector<8x8xf32>, vector<8x288xf32>, vector<8x288xf32> -> vector<8x288xf32>
    %92 = arith.addf %87, %91 : vector<8x288xf32>
    %c1_47 = arith.constant 1 : index
    %c0_48 = arith.constant 0 : index
    %c0_49 = arith.constant 0 : index
    %93 = vector.load %arg4[%c1_47, %c0_48, %c0_49] : memref<9x8x8xf32, #tpu.memory_space<vmem>>, vector<1x8x8xf32>
    %94 = vector.shape_cast %93 : vector<1x8x8xf32> to vector<8x8xf32>
    %95 = vector.extract_strided_slice %41 {offsets = [0, 1], sizes = [8, 288], strides = [1, 1]} : vector<8x384xf32> to vector<8x288xf32>
    %cst_50 = arith.constant dense<0.000000e+00> : vector<8x288xf32>
    %96 = tpu.matmul %94, %95, %cst_50 {dimension_numbers = #tpu.dot_dimension_numbers<[1], [0], [0], [1], [0, 0, 1, 1], [], []>} : vector<8x8xf32>, vector<8x288xf32>, vector<8x288xf32> -> vector<8x288xf32>
    %97 = arith.addf %92, %96 : vector<8x288xf32>
    %c2_51 = arith.constant 2 : index
    %c0_52 = arith.constant 0 : index
    %c0_53 = arith.constant 0 : index
    %98 = vector.load %arg4[%c2_51, %c0_52, %c0_53] : memref<9x8x8xf32, #tpu.memory_space<vmem>>, vector<1x8x8xf32>
    %99 = vector.shape_cast %98 : vector<1x8x8xf32> to vector<8x8xf32>
    %100 = vector.extract_strided_slice %41 {offsets = [0, 2], sizes = [8, 288], strides = [1, 1]} : vector<8x384xf32> to vector<8x288xf32>
    %cst_54 = arith.constant dense<0.000000e+00> : vector<8x288xf32>
    %101 = tpu.matmul %99, %100, %cst_54 {dimension_numbers = #tpu.dot_dimension_numbers<[1], [0], [0], [1], [0, 0, 1, 1], [], []>} : vector<8x8xf32>, vector<8x288xf32>, vector<8x288xf32> -> vector<8x288xf32>
    %102 = arith.addf %97, %101 : vector<8x288xf32>
    %c3_55 = arith.constant 3 : index
    %c0_56 = arith.constant 0 : index
    %c0_57 = arith.constant 0 : index
    %103 = vector.load %arg4[%c3_55, %c0_56, %c0_57] : memref<9x8x8xf32, #tpu.memory_space<vmem>>, vector<1x8x8xf32>
    %104 = vector.shape_cast %103 : vector<1x8x8xf32> to vector<8x8xf32>
    %105 = vector.extract_strided_slice %41 {offsets = [0, 18], sizes = [8, 288], strides = [1, 1]} : vector<8x384xf32> to vector<8x288xf32>
    %cst_58 = arith.constant dense<0.000000e+00> : vector<8x288xf32>
    %106 = tpu.matmul %104, %105, %cst_58 {dimension_numbers = #tpu.dot_dimension_numbers<[1], [0], [0], [1], [0, 0, 1, 1], [], []>} : vector<8x8xf32>, vector<8x288xf32>, vector<8x288xf32> -> vector<8x288xf32>
    %107 = arith.addf %102, %106 : vector<8x288xf32>
    %c4_59 = arith.constant 4 : index
    %c0_60 = arith.constant 0 : index
    %c0_61 = arith.constant 0 : index
    %108 = vector.load %arg4[%c4_59, %c0_60, %c0_61] : memref<9x8x8xf32, #tpu.memory_space<vmem>>, vector<1x8x8xf32>
    %109 = vector.shape_cast %108 : vector<1x8x8xf32> to vector<8x8xf32>
    %110 = vector.extract_strided_slice %41 {offsets = [0, 19], sizes = [8, 288], strides = [1, 1]} : vector<8x384xf32> to vector<8x288xf32>
    %cst_62 = arith.constant dense<0.000000e+00> : vector<8x288xf32>
    %111 = tpu.matmul %109, %110, %cst_62 {dimension_numbers = #tpu.dot_dimension_numbers<[1], [0], [0], [1], [0, 0, 1, 1], [], []>} : vector<8x8xf32>, vector<8x288xf32>, vector<8x288xf32> -> vector<8x288xf32>
    %112 = arith.addf %107, %111 : vector<8x288xf32>
    %c5_63 = arith.constant 5 : index
    %c0_64 = arith.constant 0 : index
    %c0_65 = arith.constant 0 : index
    %113 = vector.load %arg4[%c5_63, %c0_64, %c0_65] : memref<9x8x8xf32, #tpu.memory_space<vmem>>, vector<1x8x8xf32>
    %114 = vector.shape_cast %113 : vector<1x8x8xf32> to vector<8x8xf32>
    %115 = vector.extract_strided_slice %41 {offsets = [0, 20], sizes = [8, 288], strides = [1, 1]} : vector<8x384xf32> to vector<8x288xf32>
    %cst_66 = arith.constant dense<0.000000e+00> : vector<8x288xf32>
    %116 = tpu.matmul %114, %115, %cst_66 {dimension_numbers = #tpu.dot_dimension_numbers<[1], [0], [0], [1], [0, 0, 1, 1], [], []>} : vector<8x8xf32>, vector<8x288xf32>, vector<8x288xf32> -> vector<8x288xf32>
    %117 = arith.addf %112, %116 : vector<8x288xf32>
    %c6_67 = arith.constant 6 : index
    %c0_68 = arith.constant 0 : index
    %c0_69 = arith.constant 0 : index
    %118 = vector.load %arg4[%c6_67, %c0_68, %c0_69] : memref<9x8x8xf32, #tpu.memory_space<vmem>>, vector<1x8x8xf32>
    %119 = vector.shape_cast %118 : vector<1x8x8xf32> to vector<8x8xf32>
    %120 = vector.extract_strided_slice %41 {offsets = [0, 36], sizes = [8, 288], strides = [1, 1]} : vector<8x384xf32> to vector<8x288xf32>
    %cst_70 = arith.constant dense<0.000000e+00> : vector<8x288xf32>
    %121 = tpu.matmul %119, %120, %cst_70 {dimension_numbers = #tpu.dot_dimension_numbers<[1], [0], [0], [1], [0, 0, 1, 1], [], []>} : vector<8x8xf32>, vector<8x288xf32>, vector<8x288xf32> -> vector<8x288xf32>
    %122 = arith.addf %117, %121 : vector<8x288xf32>
    %c7_71 = arith.constant 7 : index
    %c0_72 = arith.constant 0 : index
    %c0_73 = arith.constant 0 : index
    %123 = vector.load %arg4[%c7_71, %c0_72, %c0_73] : memref<9x8x8xf32, #tpu.memory_space<vmem>>, vector<1x8x8xf32>
    %124 = vector.shape_cast %123 : vector<1x8x8xf32> to vector<8x8xf32>
    %125 = vector.extract_strided_slice %41 {offsets = [0, 37], sizes = [8, 288], strides = [1, 1]} : vector<8x384xf32> to vector<8x288xf32>
    %cst_74 = arith.constant dense<0.000000e+00> : vector<8x288xf32>
    %126 = tpu.matmul %124, %125, %cst_74 {dimension_numbers = #tpu.dot_dimension_numbers<[1], [0], [0], [1], [0, 0, 1, 1], [], []>} : vector<8x8xf32>, vector<8x288xf32>, vector<8x288xf32> -> vector<8x288xf32>
    %127 = arith.addf %122, %126 : vector<8x288xf32>
    %c8_75 = arith.constant 8 : index
    %c0_76 = arith.constant 0 : index
    %c0_77 = arith.constant 0 : index
    %128 = vector.load %arg4[%c8_75, %c0_76, %c0_77] : memref<9x8x8xf32, #tpu.memory_space<vmem>>, vector<1x8x8xf32>
    %129 = vector.shape_cast %128 : vector<1x8x8xf32> to vector<8x8xf32>
    %130 = vector.extract_strided_slice %41 {offsets = [0, 38], sizes = [8, 288], strides = [1, 1]} : vector<8x384xf32> to vector<8x288xf32>
    %cst_78 = arith.constant dense<0.000000e+00> : vector<8x288xf32>
    %131 = tpu.matmul %129, %130, %cst_78 {dimension_numbers = #tpu.dot_dimension_numbers<[1], [0], [0], [1], [0, 0, 1, 1], [], []>} : vector<8x8xf32>, vector<8x288xf32>, vector<8x288xf32> -> vector<8x288xf32>
    %132 = arith.addf %127, %131 : vector<8x288xf32>
    %133 = vector.broadcast %6 : vector<8x1xf32> to vector<8x288xf32>
    %134 = arith.addf %132, %133 : vector<8x288xf32>
    %135 = vector.broadcast %4 : vector<1x288xf32> to vector<8x288xf32>
    %136 = arith.mulf %134, %135 : vector<8x288xf32>
    %137 = arith.mulf %136, %136 : vector<8x288xf32>
    %cst_79 = arith.constant dense<0.000000e+00> : vector<8xf32>
    %138 = vector.multi_reduction <add>, %137, %cst_79 [1] : vector<8x288xf32> to vector<8xf32>
    %139 = vector.shape_cast %138 : vector<8xf32> to vector<8x1xf32>
    %cst_80 = arith.constant 9.99999974E-6 : f32
    %140 = vector.broadcast %cst_80 : f32 to vector<8x1xf32>
    %141 = arith.addf %139, %140 : vector<8x1xf32>
    %142 = math.sqrt %141 : vector<8x1xf32>
    %143 = arith.mulf %142, %10 : vector<8x1xf32>
    %144 = arith.mulf %143, %143 : vector<8x1xf32>
    %145 = vector.shape_cast %144 : vector<8x1xf32> to vector<1x8x1xf32>
    %cst_81 = arith.constant dense<0.000000e+00> : vector<1xf32>
    %146 = vector.multi_reduction <add>, %145, %cst_81 [1, 2] : vector<1x8x1xf32> to vector<1xf32>
    %147 = vector.shape_cast %146 : vector<1xf32> to vector<1x1x1xf32>
    %148 = vector.extract %147[0, 0, 0] : f32 from vector<1x1x1xf32>
    %149 = vector.broadcast %148 : f32 to vector<1x1xf32>
    %cst_82 = arith.constant 8.000000e+00 : f32
    %150 = vector.broadcast %cst_82 : f32 to vector<1x1xf32>
    %151 = arith.divf %149, %150 : vector<1x1xf32>
    %cst_83 = arith.constant 9.99999974E-6 : f32
    %152 = vector.broadcast %cst_83 : f32 to vector<1x1xf32>
    %153 = arith.addf %151, %152 : vector<1x1xf32>
    %154 = math.rsqrt %153 : vector<1x1xf32>
    %155 = vector.broadcast %154 : vector<1x1xf32> to vector<8x1xf32>
    %156 = arith.mulf %11, %155 : vector<8x1xf32>
    %157 = arith.mulf %143, %156 : vector<8x1xf32>
    %158 = arith.addf %157, %12 : vector<8x1xf32>
    %159 = math.tanh %158 : vector<8x1xf32>
    %cst_84 = arith.constant 1.000000e+00 : f32
    %160 = vector.broadcast %cst_84 : f32 to vector<8x1xf32>
    %161 = arith.addf %160, %159 : vector<8x1xf32>
    %162 = vector.broadcast %161 : vector<8x1xf32> to vector<8x288xf32>
    %163 = arith.mulf %136, %162 : vector<8x288xf32>
    %164 = vector.extract_strided_slice %163 {offsets = [0, 0], sizes = [4, 288], strides = [1, 1]} : vector<8x288xf32> to vector<4x288xf32>
    %165 = vector.shape_cast %164 : vector<4x288xf32> to vector<1x4x288xf32>
    %cst_85 = arith.constant dense<0.000000e+00> : vector<1xf32>
    %166 = vector.multi_reduction <add>, %165, %cst_85 [1, 2] : vector<1x4x288xf32> to vector<1xf32>
    %167 = vector.shape_cast %166 : vector<1xf32> to vector<1x1x1xf32>
    %168 = vector.extract %167[0, 0, 0] : f32 from vector<1x1x1xf32>
    %169 = vector.broadcast %168 : f32 to vector<1x1xf32>
    %cst_86 = arith.constant 9.765625E-4 : f32
    %170 = vector.broadcast %cst_86 : f32 to vector<1x1xf32>
    %171 = arith.mulf %169, %170 : vector<1x1xf32>
    %172 = vector.broadcast %171 : vector<1x1xf32> to vector<4x288xf32>
    %173 = arith.subf %164, %172 : vector<4x288xf32>
    %174 = vector.broadcast %4 : vector<1x288xf32> to vector<4x288xf32>
    %175 = arith.mulf %173, %174 : vector<4x288xf32>
    %176 = arith.mulf %175, %175 : vector<4x288xf32>
    %177 = vector.shape_cast %176 : vector<4x288xf32> to vector<1x4x288xf32>
    %cst_87 = arith.constant dense<0.000000e+00> : vector<1xf32>
    %178 = vector.multi_reduction <add>, %177, %cst_87 [1, 2] : vector<1x4x288xf32> to vector<1xf32>
    %179 = vector.shape_cast %178 : vector<1xf32> to vector<1x1x1xf32>
    %180 = vector.extract %179[0, 0, 0] : f32 from vector<1x1x1xf32>
    %181 = vector.broadcast %180 : f32 to vector<1x1xf32>
    %cst_88 = arith.constant 9.765625E-4 : f32
    %182 = vector.broadcast %cst_88 : f32 to vector<1x1xf32>
    %183 = arith.mulf %181, %182 : vector<1x1xf32>
    %cst_89 = arith.constant 9.99999974E-6 : f32
    %184 = vector.broadcast %cst_89 : f32 to vector<1x1xf32>
    %185 = arith.addf %183, %184 : vector<1x1xf32>
    %186 = math.rsqrt %185 : vector<1x1xf32>
    %187 = vector.broadcast %186 : vector<1x1xf32> to vector<4x288xf32>
    %188 = arith.mulf %175, %187 : vector<4x288xf32>
    %189 = vector.extract_strided_slice %13 {offsets = [0, 0], sizes = [4, 1], strides = [1, 1]} : vector<8x1xf32> to vector<4x1xf32>
    %190 = vector.broadcast %189 : vector<4x1xf32> to vector<4x288xf32>
    %191 = arith.mulf %188, %190 : vector<4x288xf32>
    %192 = vector.extract_strided_slice %14 {offsets = [0, 0], sizes = [4, 1], strides = [1, 1]} : vector<8x1xf32> to vector<4x1xf32>
    %193 = vector.broadcast %192 : vector<4x1xf32> to vector<4x288xf32>
    %194 = arith.addf %191, %193 : vector<4x288xf32>
    %cst_90 = arith.constant 0.000000e+00 : f32
    %195 = vector.broadcast %cst_90 : f32 to vector<4x288xf32>
    %196 = arith.maximumf %194, %195 : vector<4x288xf32>
    %197 = vector.broadcast %4 : vector<1x288xf32> to vector<4x288xf32>
    %198 = arith.mulf %196, %197 : vector<4x288xf32>
    %199 = vector.extract_strided_slice %163 {offsets = [4, 0], sizes = [4, 288], strides = [1, 1]} : vector<8x288xf32> to vector<4x288xf32>
    %200 = vector.shape_cast %199 : vector<4x288xf32> to vector<1x4x288xf32>
    %cst_91 = arith.constant dense<0.000000e+00> : vector<1xf32>
    %201 = vector.multi_reduction <add>, %200, %cst_91 [1, 2] : vector<1x4x288xf32> to vector<1xf32>
    %202 = vector.shape_cast %201 : vector<1xf32> to vector<1x1x1xf32>
    %203 = vector.extract %202[0, 0, 0] : f32 from vector<1x1x1xf32>
    %204 = vector.broadcast %203 : f32 to vector<1x1xf32>
    %cst_92 = arith.constant 9.765625E-4 : f32
    %205 = vector.broadcast %cst_92 : f32 to vector<1x1xf32>
    %206 = arith.mulf %204, %205 : vector<1x1xf32>
    %207 = vector.broadcast %206 : vector<1x1xf32> to vector<4x288xf32>
    %208 = arith.subf %199, %207 : vector<4x288xf32>
    %209 = vector.broadcast %4 : vector<1x288xf32> to vector<4x288xf32>
    %210 = arith.mulf %208, %209 : vector<4x288xf32>
    %211 = arith.mulf %210, %210 : vector<4x288xf32>
    %212 = vector.shape_cast %211 : vector<4x288xf32> to vector<1x4x288xf32>
    %cst_93 = arith.constant dense<0.000000e+00> : vector<1xf32>
    %213 = vector.multi_reduction <add>, %212, %cst_93 [1, 2] : vector<1x4x288xf32> to vector<1xf32>
    %214 = vector.shape_cast %213 : vector<1xf32> to vector<1x1x1xf32>
    %215 = vector.extract %214[0, 0, 0] : f32 from vector<1x1x1xf32>
    %216 = vector.broadcast %215 : f32 to vector<1x1xf32>
    %cst_94 = arith.constant 9.765625E-4 : f32
    %217 = vector.broadcast %cst_94 : f32 to vector<1x1xf32>
    %218 = arith.mulf %216, %217 : vector<1x1xf32>
    %cst_95 = arith.constant 9.99999974E-6 : f32
    %219 = vector.broadcast %cst_95 : f32 to vector<1x1xf32>
    %220 = arith.addf %218, %219 : vector<1x1xf32>
    %221 = math.rsqrt %220 : vector<1x1xf32>
    %222 = vector.broadcast %221 : vector<1x1xf32> to vector<4x288xf32>
    %223 = arith.mulf %210, %222 : vector<4x288xf32>
    %224 = vector.extract_strided_slice %13 {offsets = [4, 0], sizes = [4, 1], strides = [1, 1]} : vector<8x1xf32> to vector<4x1xf32>
    %225 = vector.broadcast %224 : vector<4x1xf32> to vector<4x288xf32>
    %226 = arith.mulf %223, %225 : vector<4x288xf32>
    %227 = vector.extract_strided_slice %14 {offsets = [4, 0], sizes = [4, 1], strides = [1, 1]} : vector<8x1xf32> to vector<4x1xf32>
    %228 = vector.broadcast %227 : vector<4x1xf32> to vector<4x288xf32>
    %229 = arith.addf %226, %228 : vector<4x288xf32>
    %cst_96 = arith.constant 0.000000e+00 : f32
    %230 = vector.broadcast %cst_96 : f32 to vector<4x288xf32>
    %231 = arith.maximumf %229, %230 : vector<4x288xf32>
    %232 = vector.broadcast %4 : vector<1x288xf32> to vector<4x288xf32>
    %233 = arith.mulf %231, %232 : vector<4x288xf32>
    %234 = tpu.concatenate %198, %233 in 0 : vector<4x288xf32>, vector<4x288xf32> -> vector<8x288xf32>
    %cst_97 = arith.constant 0.000000e+00 : f32
    %235 = vector.broadcast %cst_97 : f32 to vector<8x19xf32>
    %cst_98 = arith.constant 0.000000e+00 : f32
    %236 = vector.broadcast %cst_98 : f32 to vector<8x77xf32>
    %237 = tpu.concatenate %235, %234, %236 in 1 : vector<8x19xf32>, vector<8x288xf32>, vector<8x77xf32> -> vector<8x384xf32>
    %c0_99 = arith.constant 0 : index
    %c0_100 = arith.constant 0 : index
    %c0_101 = arith.constant 0 : index
    %238 = vector.load %arg7[%c0_99, %c0_100, %c0_101] : memref<1x8x384xf32, #tpu.memory_space<vmem>>, vector<1x8x384xf32>
    %239 = vector.shape_cast %238 : vector<1x8x384xf32> to vector<8x384xf32>
    %240 = vector.shape_cast %237 : vector<8x384xf32> to vector<1x8x384xf32>
    tpu.vector_store %arg7[%c0_99, %c0_100, %c0_101], %240 {strides = array<i32>} : memref<1x8x384xf32, #tpu.memory_space<vmem>>, vector<1x8x384xf32>,
    return
  }
  func.func @transform_0(%arg0: i32) -> (i32, i32, i32) {
    %c0_i32 = arith.constant 0 : i32
    %c0_i32_0 = arith.constant 0 : i32
    %c0_i32_1 = arith.constant 0 : i32
    return %arg0, %c0_i32, %c0_i32_0 : i32, i32, i32
  }
  func.func @transform_1(%arg0: i32) -> (i32, i32, i32) {
    %c0_i32 = arith.constant 0 : i32
    %c0_i32_0 = arith.constant 0 : i32
    %c0_i32_1 = arith.constant 0 : i32
    return %arg0, %c0_i32, %c0_i32_0 : i32, i32, i32
  }
  func.func @transform_2(%arg0: i32) -> (i32, i32, i32) {
    %c0_i32 = arith.constant 0 : i32
    %c0_i32_0 = arith.constant 0 : i32
    %c0_i32_1 = arith.constant 0 : i32
    %c0_i32_2 = arith.constant 0 : i32
    return %c0_i32, %c0_i32_0, %c0_i32_1 : i32, i32, i32
  }
  func.func @transform_3(%arg0: i32) -> (i32, i32, i32) {
    %c0_i32 = arith.constant 0 : i32
    %c0_i32_0 = arith.constant 0 : i32
    %c0_i32_1 = arith.constant 0 : i32
    %c0_i32_2 = arith.constant 0 : i32
    return %c0_i32, %c0_i32_0, %c0_i32_1 : i32, i32, i32
  }
  func.func @transform_4(%arg0: i32) -> (i32, i32) {
    %c0_i32 = arith.constant 0 : i32
    %c0_i32_0 = arith.constant 0 : i32
    %c0_i32_1 = arith.constant 0 : i32
    return %c0_i32, %c0_i32_0 : i32, i32
  }
  func.func @transform_5(%arg0: i32) -> (i32, i32) {
    %c0_i32 = arith.constant 0 : i32
    %c0_i32_0 = arith.constant 0 : i32
    %c0_i32_1 = arith.constant 0 : i32
    return %c0_i32, %c0_i32_0 : i32, i32
  }
  func.func @transform_6(%arg0: i32) -> (i32, i32, i32) {
    %c0_i32 = arith.constant 0 : i32
    %c0_i32_0 = arith.constant 0 : i32
    %c0_i32_1 = arith.constant 0 : i32
    return %arg0, %c0_i32, %c0_i32_0 : i32, i32, i32
  }
}

module attributes {stable_mosaic.version = 11 : i64} {
  func.func @_fused_block2_kernel(%arg0: i32, %arg1: memref<1x8x384xf32, #tpu.memory_space<vmem>>, %arg2: memref<9x8x8xf32, #tpu.memory_space<vmem>>, %arg3: memref<8x6xf32, #tpu.memory_space<vmem>>, %arg4: memref<1x288xf32, #tpu.memory_space<vmem>>, %arg5: memref<1x8x384xf32, #tpu.memory_space<vmem>>) attributes {dimension_semantics = [#tpu.dimension_semantics<parallel>], iteration_bounds = array<i64: 2>, scalar_prefetch = 0 : i64, scratch_operands = 0 : i64, tpu.core_type = #tpu.core_type<tc>, window_params = [{transform_indices = @transform_0, window_bounds = array<i64: 1, 8, 384>}, {pipeline_mode = #tpu.pipeline_mode<synchronous>, transform_indices = @transform_1, window_bounds = array<i64: 9, 8, 8>}, {pipeline_mode = #tpu.pipeline_mode<synchronous>, transform_indices = @transform_2, window_bounds = array<i64: 8, 6>}, {pipeline_mode = #tpu.pipeline_mode<synchronous>, transform_indices = @transform_3, window_bounds = array<i64: 1, 288>}, {transform_indices = @transform_4, window_bounds = array<i64: 1, 8, 384>}]} {
    %c0 = arith.constant 0 : index
    %c0_0 = arith.constant 0 : index
    %c0_1 = arith.constant 0 : index
    %0 = vector.load %arg1[%c0, %c0_0, %c0_1] : memref<1x8x384xf32, #tpu.memory_space<vmem>>, vector<1x8x384xf32>
    %1 = vector.shape_cast %0 : vector<1x8x384xf32> to vector<8x384xf32>
    %c0_2 = arith.constant 0 : index
    %c0_3 = arith.constant 0 : index
    %2 = vector.load %arg4[%c0_2, %c0_3] : memref<1x288xf32, #tpu.memory_space<vmem>>, vector<1x288xf32>
    %c0_4 = arith.constant 0 : index
    %c0_5 = arith.constant 0 : index
    %3 = vector.load %arg3[%c0_4, %c0_5] : memref<8x6xf32, #tpu.memory_space<vmem>>, vector<8x6xf32>
    %4 = vector.extract_strided_slice %3 {offsets = [0, 0], sizes = [8, 1], strides = [1, 1]} : vector<8x6xf32> to vector<8x1xf32>
    %5 = vector.extract_strided_slice %3 {offsets = [0, 1], sizes = [8, 1], strides = [1, 1]} : vector<8x6xf32> to vector<8x1xf32>
    %6 = vector.extract_strided_slice %3 {offsets = [0, 2], sizes = [8, 1], strides = [1, 1]} : vector<8x6xf32> to vector<8x1xf32>
    %7 = vector.extract_strided_slice %3 {offsets = [0, 3], sizes = [8, 1], strides = [1, 1]} : vector<8x6xf32> to vector<8x1xf32>
    %8 = vector.extract_strided_slice %3 {offsets = [0, 4], sizes = [8, 1], strides = [1, 1]} : vector<8x6xf32> to vector<8x1xf32>
    %9 = vector.extract_strided_slice %3 {offsets = [0, 5], sizes = [8, 1], strides = [1, 1]} : vector<8x6xf32> to vector<8x1xf32>
    %cst = arith.constant 0.000000e+00 : f32
    %10 = vector.broadcast %cst : f32 to vector<8x288xf32>
    %c0_6 = arith.constant 0 : index
    %c0_7 = arith.constant 0 : index
    %c0_8 = arith.constant 0 : index
    %11 = vector.load %arg2[%c0_6, %c0_7, %c0_8] : memref<9x8x8xf32, #tpu.memory_space<vmem>>, vector<1x8x8xf32>
    %12 = vector.shape_cast %11 : vector<1x8x8xf32> to vector<8x8xf32>
    %13 = vector.extract_strided_slice %1 {offsets = [0, 0], sizes = [8, 288], strides = [1, 1]} : vector<8x384xf32> to vector<8x288xf32>
    %cst_9 = arith.constant dense<0.000000e+00> : vector<8x288xf32>
    %14 = tpu.matmul %12, %13, %cst_9 {dimension_numbers = #tpu.dot_dimension_numbers<[1], [0], [0], [1], [0, 0, 1, 1], [], []>} : vector<8x8xf32>, vector<8x288xf32>, vector<8x288xf32> -> vector<8x288xf32>
    %15 = arith.addf %10, %14 : vector<8x288xf32>
    %c1 = arith.constant 1 : index
    %c0_10 = arith.constant 0 : index
    %c0_11 = arith.constant 0 : index
    %16 = vector.load %arg2[%c1, %c0_10, %c0_11] : memref<9x8x8xf32, #tpu.memory_space<vmem>>, vector<1x8x8xf32>
    %17 = vector.shape_cast %16 : vector<1x8x8xf32> to vector<8x8xf32>
    %18 = vector.extract_strided_slice %1 {offsets = [0, 1], sizes = [8, 288], strides = [1, 1]} : vector<8x384xf32> to vector<8x288xf32>
    %cst_12 = arith.constant dense<0.000000e+00> : vector<8x288xf32>
    %19 = tpu.matmul %17, %18, %cst_12 {dimension_numbers = #tpu.dot_dimension_numbers<[1], [0], [0], [1], [0, 0, 1, 1], [], []>} : vector<8x8xf32>, vector<8x288xf32>, vector<8x288xf32> -> vector<8x288xf32>
    %20 = arith.addf %15, %19 : vector<8x288xf32>
    %c2 = arith.constant 2 : index
    %c0_13 = arith.constant 0 : index
    %c0_14 = arith.constant 0 : index
    %21 = vector.load %arg2[%c2, %c0_13, %c0_14] : memref<9x8x8xf32, #tpu.memory_space<vmem>>, vector<1x8x8xf32>
    %22 = vector.shape_cast %21 : vector<1x8x8xf32> to vector<8x8xf32>
    %23 = vector.extract_strided_slice %1 {offsets = [0, 2], sizes = [8, 288], strides = [1, 1]} : vector<8x384xf32> to vector<8x288xf32>
    %cst_15 = arith.constant dense<0.000000e+00> : vector<8x288xf32>
    %24 = tpu.matmul %22, %23, %cst_15 {dimension_numbers = #tpu.dot_dimension_numbers<[1], [0], [0], [1], [0, 0, 1, 1], [], []>} : vector<8x8xf32>, vector<8x288xf32>, vector<8x288xf32> -> vector<8x288xf32>
    %25 = arith.addf %20, %24 : vector<8x288xf32>
    %c3 = arith.constant 3 : index
    %c0_16 = arith.constant 0 : index
    %c0_17 = arith.constant 0 : index
    %26 = vector.load %arg2[%c3, %c0_16, %c0_17] : memref<9x8x8xf32, #tpu.memory_space<vmem>>, vector<1x8x8xf32>
    %27 = vector.shape_cast %26 : vector<1x8x8xf32> to vector<8x8xf32>
    %28 = vector.extract_strided_slice %1 {offsets = [0, 18], sizes = [8, 288], strides = [1, 1]} : vector<8x384xf32> to vector<8x288xf32>
    %cst_18 = arith.constant dense<0.000000e+00> : vector<8x288xf32>
    %29 = tpu.matmul %27, %28, %cst_18 {dimension_numbers = #tpu.dot_dimension_numbers<[1], [0], [0], [1], [0, 0, 1, 1], [], []>} : vector<8x8xf32>, vector<8x288xf32>, vector<8x288xf32> -> vector<8x288xf32>
    %30 = arith.addf %25, %29 : vector<8x288xf32>
    %c4 = arith.constant 4 : index
    %c0_19 = arith.constant 0 : index
    %c0_20 = arith.constant 0 : index
    %31 = vector.load %arg2[%c4, %c0_19, %c0_20] : memref<9x8x8xf32, #tpu.memory_space<vmem>>, vector<1x8x8xf32>
    %32 = vector.shape_cast %31 : vector<1x8x8xf32> to vector<8x8xf32>
    %33 = vector.extract_strided_slice %1 {offsets = [0, 19], sizes = [8, 288], strides = [1, 1]} : vector<8x384xf32> to vector<8x288xf32>
    %cst_21 = arith.constant dense<0.000000e+00> : vector<8x288xf32>
    %34 = tpu.matmul %32, %33, %cst_21 {dimension_numbers = #tpu.dot_dimension_numbers<[1], [0], [0], [1], [0, 0, 1, 1], [], []>} : vector<8x8xf32>, vector<8x288xf32>, vector<8x288xf32> -> vector<8x288xf32>
    %35 = arith.addf %30, %34 : vector<8x288xf32>
    %c5 = arith.constant 5 : index
    %c0_22 = arith.constant 0 : index
    %c0_23 = arith.constant 0 : index
    %36 = vector.load %arg2[%c5, %c0_22, %c0_23] : memref<9x8x8xf32, #tpu.memory_space<vmem>>, vector<1x8x8xf32>
    %37 = vector.shape_cast %36 : vector<1x8x8xf32> to vector<8x8xf32>
    %38 = vector.extract_strided_slice %1 {offsets = [0, 20], sizes = [8, 288], strides = [1, 1]} : vector<8x384xf32> to vector<8x288xf32>
    %cst_24 = arith.constant dense<0.000000e+00> : vector<8x288xf32>
    %39 = tpu.matmul %37, %38, %cst_24 {dimension_numbers = #tpu.dot_dimension_numbers<[1], [0], [0], [1], [0, 0, 1, 1], [], []>} : vector<8x8xf32>, vector<8x288xf32>, vector<8x288xf32> -> vector<8x288xf32>
    %40 = arith.addf %35, %39 : vector<8x288xf32>
    %c6 = arith.constant 6 : index
    %c0_25 = arith.constant 0 : index
    %c0_26 = arith.constant 0 : index
    %41 = vector.load %arg2[%c6, %c0_25, %c0_26] : memref<9x8x8xf32, #tpu.memory_space<vmem>>, vector<1x8x8xf32>
    %42 = vector.shape_cast %41 : vector<1x8x8xf32> to vector<8x8xf32>
    %43 = vector.extract_strided_slice %1 {offsets = [0, 36], sizes = [8, 288], strides = [1, 1]} : vector<8x384xf32> to vector<8x288xf32>
    %cst_27 = arith.constant dense<0.000000e+00> : vector<8x288xf32>
    %44 = tpu.matmul %42, %43, %cst_27 {dimension_numbers = #tpu.dot_dimension_numbers<[1], [0], [0], [1], [0, 0, 1, 1], [], []>} : vector<8x8xf32>, vector<8x288xf32>, vector<8x288xf32> -> vector<8x288xf32>
    %45 = arith.addf %40, %44 : vector<8x288xf32>
    %c7 = arith.constant 7 : index
    %c0_28 = arith.constant 0 : index
    %c0_29 = arith.constant 0 : index
    %46 = vector.load %arg2[%c7, %c0_28, %c0_29] : memref<9x8x8xf32, #tpu.memory_space<vmem>>, vector<1x8x8xf32>
    %47 = vector.shape_cast %46 : vector<1x8x8xf32> to vector<8x8xf32>
    %48 = vector.extract_strided_slice %1 {offsets = [0, 37], sizes = [8, 288], strides = [1, 1]} : vector<8x384xf32> to vector<8x288xf32>
    %cst_30 = arith.constant dense<0.000000e+00> : vector<8x288xf32>
    %49 = tpu.matmul %47, %48, %cst_30 {dimension_numbers = #tpu.dot_dimension_numbers<[1], [0], [0], [1], [0, 0, 1, 1], [], []>} : vector<8x8xf32>, vector<8x288xf32>, vector<8x288xf32> -> vector<8x288xf32>
    %50 = arith.addf %45, %49 : vector<8x288xf32>
    %c8 = arith.constant 8 : index
    %c0_31 = arith.constant 0 : index
    %c0_32 = arith.constant 0 : index
    %51 = vector.load %arg2[%c8, %c0_31, %c0_32] : memref<9x8x8xf32, #tpu.memory_space<vmem>>, vector<1x8x8xf32>
    %52 = vector.shape_cast %51 : vector<1x8x8xf32> to vector<8x8xf32>
    %53 = vector.extract_strided_slice %1 {offsets = [0, 38], sizes = [8, 288], strides = [1, 1]} : vector<8x384xf32> to vector<8x288xf32>
    %cst_33 = arith.constant dense<0.000000e+00> : vector<8x288xf32>
    %54 = tpu.matmul %52, %53, %cst_33 {dimension_numbers = #tpu.dot_dimension_numbers<[1], [0], [0], [1], [0, 0, 1, 1], [], []>} : vector<8x8xf32>, vector<8x288xf32>, vector<8x288xf32> -> vector<8x288xf32>
    %55 = arith.addf %50, %54 : vector<8x288xf32>
    %56 = vector.broadcast %4 : vector<8x1xf32> to vector<8x288xf32>
    %57 = arith.addf %55, %56 : vector<8x288xf32>
    %58 = vector.broadcast %2 : vector<1x288xf32> to vector<8x288xf32>
    %59 = arith.mulf %57, %58 : vector<8x288xf32>
    %60 = arith.mulf %59, %59 : vector<8x288xf32>
    %cst_34 = arith.constant dense<0.000000e+00> : vector<8xf32>
    %61 = vector.multi_reduction <add>, %60, %cst_34 [1] : vector<8x288xf32> to vector<8xf32>
    %62 = vector.shape_cast %61 : vector<8xf32> to vector<8x1xf32>
    %cst_35 = arith.constant 9.99999974E-6 : f32
    %63 = vector.broadcast %cst_35 : f32 to vector<8x1xf32>
    %64 = arith.addf %62, %63 : vector<8x1xf32>
    %65 = math.sqrt %64 : vector<8x1xf32>
    %66 = arith.mulf %65, %5 : vector<8x1xf32>
    %67 = arith.mulf %66, %66 : vector<8x1xf32>
    %68 = vector.shape_cast %67 : vector<8x1xf32> to vector<1x8x1xf32>
    %cst_36 = arith.constant dense<0.000000e+00> : vector<1xf32>
    %69 = vector.multi_reduction <add>, %68, %cst_36 [1, 2] : vector<1x8x1xf32> to vector<1xf32>
    %70 = vector.shape_cast %69 : vector<1xf32> to vector<1x1x1xf32>
    %71 = vector.extract %70[0, 0, 0] : f32 from vector<1x1x1xf32>
    %72 = vector.broadcast %71 : f32 to vector<1x1xf32>
    %cst_37 = arith.constant 8.000000e+00 : f32
    %73 = vector.broadcast %cst_37 : f32 to vector<1x1xf32>
    %74 = arith.divf %72, %73 : vector<1x1xf32>
    %cst_38 = arith.constant 9.99999974E-6 : f32
    %75 = vector.broadcast %cst_38 : f32 to vector<1x1xf32>
    %76 = arith.addf %74, %75 : vector<1x1xf32>
    %77 = math.rsqrt %76 : vector<1x1xf32>
    %78 = vector.broadcast %77 : vector<1x1xf32> to vector<8x1xf32>
    %79 = arith.mulf %6, %78 : vector<8x1xf32>
    %80 = arith.mulf %66, %79 : vector<8x1xf32>
    %81 = arith.addf %80, %7 : vector<8x1xf32>
    %82 = math.tanh %81 : vector<8x1xf32>
    %cst_39 = arith.constant 1.000000e+00 : f32
    %83 = vector.broadcast %cst_39 : f32 to vector<8x1xf32>
    %84 = arith.addf %83, %82 : vector<8x1xf32>
    %85 = vector.broadcast %84 : vector<8x1xf32> to vector<8x288xf32>
    %86 = arith.mulf %59, %85 : vector<8x288xf32>
    %87 = vector.extract_strided_slice %86 {offsets = [0, 0], sizes = [4, 288], strides = [1, 1]} : vector<8x288xf32> to vector<4x288xf32>
    %88 = vector.shape_cast %87 : vector<4x288xf32> to vector<1x4x288xf32>
    %cst_40 = arith.constant dense<0.000000e+00> : vector<1xf32>
    %89 = vector.multi_reduction <add>, %88, %cst_40 [1, 2] : vector<1x4x288xf32> to vector<1xf32>
    %90 = vector.shape_cast %89 : vector<1xf32> to vector<1x1x1xf32>
    %91 = vector.extract %90[0, 0, 0] : f32 from vector<1x1x1xf32>
    %92 = vector.broadcast %91 : f32 to vector<1x1xf32>
    %cst_41 = arith.constant 9.765625E-4 : f32
    %93 = vector.broadcast %cst_41 : f32 to vector<1x1xf32>
    %94 = arith.mulf %92, %93 : vector<1x1xf32>
    %95 = vector.broadcast %94 : vector<1x1xf32> to vector<4x288xf32>
    %96 = arith.subf %87, %95 : vector<4x288xf32>
    %97 = vector.broadcast %2 : vector<1x288xf32> to vector<4x288xf32>
    %98 = arith.mulf %96, %97 : vector<4x288xf32>
    %99 = arith.mulf %98, %98 : vector<4x288xf32>
    %100 = vector.shape_cast %99 : vector<4x288xf32> to vector<1x4x288xf32>
    %cst_42 = arith.constant dense<0.000000e+00> : vector<1xf32>
    %101 = vector.multi_reduction <add>, %100, %cst_42 [1, 2] : vector<1x4x288xf32> to vector<1xf32>
    %102 = vector.shape_cast %101 : vector<1xf32> to vector<1x1x1xf32>
    %103 = vector.extract %102[0, 0, 0] : f32 from vector<1x1x1xf32>
    %104 = vector.broadcast %103 : f32 to vector<1x1xf32>
    %cst_43 = arith.constant 9.765625E-4 : f32
    %105 = vector.broadcast %cst_43 : f32 to vector<1x1xf32>
    %106 = arith.mulf %104, %105 : vector<1x1xf32>
    %cst_44 = arith.constant 9.99999974E-6 : f32
    %107 = vector.broadcast %cst_44 : f32 to vector<1x1xf32>
    %108 = arith.addf %106, %107 : vector<1x1xf32>
    %109 = math.rsqrt %108 : vector<1x1xf32>
    %110 = vector.broadcast %109 : vector<1x1xf32> to vector<4x288xf32>
    %111 = arith.mulf %98, %110 : vector<4x288xf32>
    %112 = vector.extract_strided_slice %8 {offsets = [0, 0], sizes = [4, 1], strides = [1, 1]} : vector<8x1xf32> to vector<4x1xf32>
    %113 = vector.broadcast %112 : vector<4x1xf32> to vector<4x288xf32>
    %114 = arith.mulf %111, %113 : vector<4x288xf32>
    %115 = vector.extract_strided_slice %9 {offsets = [0, 0], sizes = [4, 1], strides = [1, 1]} : vector<8x1xf32> to vector<4x1xf32>
    %116 = vector.broadcast %115 : vector<4x1xf32> to vector<4x288xf32>
    %117 = arith.addf %114, %116 : vector<4x288xf32>
    %cst_45 = arith.constant 0.000000e+00 : f32
    %118 = vector.broadcast %cst_45 : f32 to vector<4x288xf32>
    %119 = arith.maximumf %117, %118 : vector<4x288xf32>
    %120 = vector.broadcast %2 : vector<1x288xf32> to vector<4x288xf32>
    %121 = arith.mulf %119, %120 : vector<4x288xf32>
    %122 = vector.extract_strided_slice %86 {offsets = [4, 0], sizes = [4, 288], strides = [1, 1]} : vector<8x288xf32> to vector<4x288xf32>
    %123 = vector.shape_cast %122 : vector<4x288xf32> to vector<1x4x288xf32>
    %cst_46 = arith.constant dense<0.000000e+00> : vector<1xf32>
    %124 = vector.multi_reduction <add>, %123, %cst_46 [1, 2] : vector<1x4x288xf32> to vector<1xf32>
    %125 = vector.shape_cast %124 : vector<1xf32> to vector<1x1x1xf32>
    %126 = vector.extract %125[0, 0, 0] : f32 from vector<1x1x1xf32>
    %127 = vector.broadcast %126 : f32 to vector<1x1xf32>
    %cst_47 = arith.constant 9.765625E-4 : f32
    %128 = vector.broadcast %cst_47 : f32 to vector<1x1xf32>
    %129 = arith.mulf %127, %128 : vector<1x1xf32>
    %130 = vector.broadcast %129 : vector<1x1xf32> to vector<4x288xf32>
    %131 = arith.subf %122, %130 : vector<4x288xf32>
    %132 = vector.broadcast %2 : vector<1x288xf32> to vector<4x288xf32>
    %133 = arith.mulf %131, %132 : vector<4x288xf32>
    %134 = arith.mulf %133, %133 : vector<4x288xf32>
    %135 = vector.shape_cast %134 : vector<4x288xf32> to vector<1x4x288xf32>
    %cst_48 = arith.constant dense<0.000000e+00> : vector<1xf32>
    %136 = vector.multi_reduction <add>, %135, %cst_48 [1, 2] : vector<1x4x288xf32> to vector<1xf32>
    %137 = vector.shape_cast %136 : vector<1xf32> to vector<1x1x1xf32>
    %138 = vector.extract %137[0, 0, 0] : f32 from vector<1x1x1xf32>
    %139 = vector.broadcast %138 : f32 to vector<1x1xf32>
    %cst_49 = arith.constant 9.765625E-4 : f32
    %140 = vector.broadcast %cst_49 : f32 to vector<1x1xf32>
    %141 = arith.mulf %139, %140 : vector<1x1xf32>
    %cst_50 = arith.constant 9.99999974E-6 : f32
    %142 = vector.broadcast %cst_50 : f32 to vector<1x1xf32>
    %143 = arith.addf %141, %142 : vector<1x1xf32>
    %144 = math.rsqrt %143 : vector<1x1xf32>
    %145 = vector.broadcast %144 : vector<1x1xf32> to vector<4x288xf32>
    %146 = arith.mulf %133, %145 : vector<4x288xf32>
    %147 = vector.extract_strided_slice %8 {offsets = [4, 0], sizes = [4, 1], strides = [1, 1]} : vector<8x1xf32> to vector<4x1xf32>
    %148 = vector.broadcast %147 : vector<4x1xf32> to vector<4x288xf32>
    %149 = arith.mulf %146, %148 : vector<4x288xf32>
    %150 = vector.extract_strided_slice %9 {offsets = [4, 0], sizes = [4, 1], strides = [1, 1]} : vector<8x1xf32> to vector<4x1xf32>
    %151 = vector.broadcast %150 : vector<4x1xf32> to vector<4x288xf32>
    %152 = arith.addf %149, %151 : vector<4x288xf32>
    %cst_51 = arith.constant 0.000000e+00 : f32
    %153 = vector.broadcast %cst_51 : f32 to vector<4x288xf32>
    %154 = arith.maximumf %152, %153 : vector<4x288xf32>
    %155 = vector.broadcast %2 : vector<1x288xf32> to vector<4x288xf32>
    %156 = arith.mulf %154, %155 : vector<4x288xf32>
    %157 = tpu.concatenate %121, %156 in 0 : vector<4x288xf32>, vector<4x288xf32> -> vector<8x288xf32>
    %cst_52 = arith.constant 0.000000e+00 : f32
    %158 = vector.broadcast %cst_52 : f32 to vector<8x19xf32>
    %cst_53 = arith.constant 0.000000e+00 : f32
    %159 = vector.broadcast %cst_53 : f32 to vector<8x77xf32>
    %160 = tpu.concatenate %158, %157, %159 in 1 : vector<8x19xf32>, vector<8x288xf32>, vector<8x77xf32> -> vector<8x384xf32>
    %c0_54 = arith.constant 0 : index
    %c0_55 = arith.constant 0 : index
    %c0_56 = arith.constant 0 : index
    %161 = vector.load %arg5[%c0_54, %c0_55, %c0_56] : memref<1x8x384xf32, #tpu.memory_space<vmem>>, vector<1x8x384xf32>
    %162 = vector.shape_cast %161 : vector<1x8x384xf32> to vector<8x384xf32>
    %163 = vector.shape_cast %160 : vector<8x384xf32> to vector<1x8x384xf32>
    tpu.vector_store %arg5[%c0_54, %c0_55, %c0_56], %163 {strides = array<i32>} : memref<1x8x384xf32, #tpu.memory_space<vmem>>, vector<1x8x384xf32>,
    return
  }
  func.func @transform_0(%arg0: i32) -> (i32, i32, i32) {
    %c0_i32 = arith.constant 0 : i32
    %c0_i32_0 = arith.constant 0 : i32
    %c0_i32_1 = arith.constant 0 : i32
    return %arg0, %c0_i32, %c0_i32_0 : i32, i32, i32
  }
  func.func @transform_1(%arg0: i32) -> (i32, i32, i32) {
    %c0_i32 = arith.constant 0 : i32
    %c0_i32_0 = arith.constant 0 : i32
    %c0_i32_1 = arith.constant 0 : i32
    %c0_i32_2 = arith.constant 0 : i32
    return %c0_i32, %c0_i32_0, %c0_i32_1 : i32, i32, i32
  }
  func.func @transform_2(%arg0: i32) -> (i32, i32) {
    %c0_i32 = arith.constant 0 : i32
    %c0_i32_0 = arith.constant 0 : i32
    %c0_i32_1 = arith.constant 0 : i32
    return %c0_i32, %c0_i32_0 : i32, i32
  }
  func.func @transform_3(%arg0: i32) -> (i32, i32) {
    %c0_i32 = arith.constant 0 : i32
    %c0_i32_0 = arith.constant 0 : i32
    %c0_i32_1 = arith.constant 0 : i32
    return %c0_i32, %c0_i32_0 : i32, i32
  }
  func.func @transform_4(%arg0: i32) -> (i32, i32, i32) {
    %c0_i32 = arith.constant 0 : i32
    %c0_i32_0 = arith.constant 0 : i32
    %c0_i32_1 = arith.constant 0 : i32
    return %arg0, %c0_i32, %c0_i32_0 : i32, i32, i32
  }
}

</mosaic_0001>

<bundles_post_ra>
// kernel: tile.0
= control target key start
LH: loop header
LB: loop body
LE: loop exit
PB: predicated region body
PF: predicated region fallthrough
CT: control target
= control target key end

     0   :  { %s66_s8 = smov 125   ;;  %s67_s9 = smov 123   ;;  %vm7_vm0 = vcmask 7168   ;;  %s117_s0 = inlined_call_operand.vmem [shape: f32[4,8], index: 0, kind: input, shape index: {}]   ;;  %s118_s1 = inlined_call_operand.vmem [shape: f32[32,1], index: 1, kind: output, shape index: {}]  }
   0x1   :  { %v4_v0 = vld [vmem:[%s117_s0] sm:$0xf]  ;;  %s65_s0 = smov 127   ;;  %s68_s10 = smov 126  }
   0x2   :  { %5 = vst [vmem:[#allocation0] sm:$0xf] %v4_v0  ;;  %s69_s11 = smov 124   ;;  %s70_s12 = smov 122  }
   0x3   :  { %s71_s13 = smov 121  }
   0x9   :  { %v9_v1 = vld [vmem:[#allocation0] sm:$0xf]  }
   0xa   :  { %v21_v2 = vld [vmem:[#allocation0] sm:$0xf]   ;;  %10 = vrot.lane.b32.xlu0 %v9_v1, %s65_s0 }
   0xb   :  { %22 = vrot.lane.b32.xlu1 %v21_v2, %s66_s8  ;;  %v33_v3 = vld [vmem:[#allocation0] sm:$0xf]  }
   0xc   :  { %34 = vrot.lane.b32.xlu2 %v33_v3, %s67_s9  ;;  %v15_v4 = vld [vmem:[#allocation0] sm:$0xf]  }
   0xd   :  { %v27_v5 = vld [vmem:[#allocation0] sm:$0xf]  }
   0xe   :  { %v39_v6 = vld [vmem:[#allocation0] sm:$0xf]  }
   0xf   :  { %v45_v7 = vld [vmem:[#allocation0] sm:$0xf]  }
  0x10   :  { %v6_v8 = vld [vmem:[#allocation0] sm:$0xf]  }
  0x11   :  { %8 = vst.msk [vmem:[%s118_s1] ss:$8 sm:$0xf] %vm7_vm0, %v6_v8  }
  0x12   :  { %16 = vrot.lane.b32.xlu0 %v15_v4, %s68_s10 }
  0x13   :  { %28 = vrot.lane.b32.xlu1 %v27_v5, %s69_s11 }
  0x14   :  { %40 = vrot.lane.b32.xlu2 %v39_v6, %s70_s12 }
  0x1a   :  { %46 = vrot.lane.b32.xlu0 %v45_v7, %s71_s13 }
  0x66   :  { %v35_v9 = vpop.permute.xlu2 %34  }
  0x67   :  { %55 = vst.msk [vmem:[%s118_s1 + $0x5] ss:$8 sm:$0xf] %vm7_vm0, %v35_v9  }
  0x6e   :  { %v41_v10 = vpop.permute.xlu2 %40  }
  0x6f   :  { %56 = vst.msk [vmem:[%s118_s1 + $0x6] ss:$8 sm:$0xf] %vm7_vm0, %v41_v10  }
  0x7c   :  { %v11_v11 = vpop.permute.xlu0 %10  }
  0x7d   :  { %v23_v12 = vpop.permute.xlu1 %22   ;;  %51 = vst.msk [vmem:[%s118_s1 + $0x1] ss:$8 sm:$0xf] %vm7_vm0, %v11_v11  }
  0x7e   :  { %53 = vst.msk [vmem:[%s118_s1 + $0x3] ss:$8 sm:$0xf] %vm7_vm0, %v23_v12  }
  0x84   :  { %v17_v13 = vpop.permute.xlu0 %16  }
  0x85   :  { %v29_v14 = vpop.permute.xlu1 %28   ;;  %52 = vst.msk [vmem:[%s118_s1 + $0x2] ss:$8 sm:$0xf] %vm7_vm0, %v17_v13  }
  0x86   :  { %54 = vst.msk [vmem:[%s118_s1 + $0x4] ss:$8 sm:$0xf] %vm7_vm0, %v29_v14  }
  0x8c   :  { %v47_v15 = vpop.permute.xlu0 %46  }
  0x8d   :  { %57 = vst.msk [vmem:[%s118_s1 + $0x7] ss:$8 sm:$0xf] %vm7_vm0, %v47_v15  }

// kernel: tile.8
= control target key start
LH: loop header
LB: loop body
LE: loop exit
PB: predicated region body
PF: predicated region fallthrough
CT: control target
= control target key end

     0   :  { %s22_s0 = inlined_call_operand.vmem [shape: f32[8], index: 0, kind: input, shape index: {}]   ;;  %s23_s1 = inlined_call_operand.vmem [shape: f32[4,8], index: 1, kind: output, shape index: {}]  }
   0x1   :  { %v4_v0 = vld [vmem:[%s22_s0] ss:$0 sm:$0xff] }
   0x2   :  { %5 = vst [vmem:[%s23_s1] sm:$0xf] %v4_v0 }

// kernel: decoder_block_forward.3
= control target key start
LH: loop header
LB: loop body
LE: loop exit
PB: predicated region body
PF: predicated region fallthrough
CT: control target
= control target key end

     0   :  { %s366_s12 = smov 0   ;;  %s411_s0 = inlined_call_operand.vmem [shape: f32[2,16,64], index: 0, kind: input, shape index: {}]   ;;  %s412_s1 = inlined_call_operand.vmem [shape: f32[32,16], index: 1, kind: input, shape index: {}]   ;;  %s413_s2 = inlined_call_operand.vmem [shape: f32[32,1], index: 2, kind: input, shape index: {}]   ;;  %s414_s3 = inlined_call_operand.vmem [shape: f32[2,32,64], index: 3, kind: output, shape index: {}]  }
   0x1 LB: > { %s303_s13 = sadd.s32 4294967295, %s343_s12   ;;  %p307_p0 = scmp.ge.s32.totalorder %s343_s12, 1  ;;  %s343_s12 = sphi %s366_s12, %s13_s12  }
   0x2   : > { %p137_p1 = scmp.lt.s32.totalorder %s343_s12, 3 }
   0x4   : > { %p138_p2 = pnand %p307_p0, %p137_p1 }
   0x5   : > { %p161_p3 = scmp.lt.s32.totalorder (!%p138_p2), %s303_s13, 1 }
   0x6   : > { %141 = sbr.rel (%p138_p2) target bundleno = 156 (0x9c), region = 32 }
   0xb   : > { %v345_v0 = vmov 0   ;;  %v179_v1 = vld [vmem:[%s413_s2 + $0x10] sm:$0xff]  ;;  %v177_v2 = vld [vmem:[%s413_s2] sm:$0xff]  ;;  %s416_s13 = smov (!%p161_p3, %s303_s13), 1  ;;  %vm201_vm0 = vcmask 130048   ;;  %v172_v6 = vld [vmem:[%s412_s1 + $0x8] sm:$0xff] }
   0xc   : > { %336 = vset.pattern.permute.xlu1 %v345_v0  ;;  %335 = vset.pattern.permute.xlu0 %v345_v0  ;;  %s318_s18 = sshll.u32 %s416_s13, 4  ;;  %v171_v5 = vld [vmem:[%s412_s1] sm:$0xff]  ;;  %v173_v7 = vld [vmem:[%s412_s1 + $0x10] sm:$0xff]  ;;  %v174_v8 = vld [vmem:[%s412_s1 + $0x18] sm:$0xff]  ;;  %s319_s7 = sshll.u32 %s416_s13, 5  ;;  %vm243_vm1 = vcmask 523264  }
   0xd   : > { %193 = vperm.xlu1 %336, %v179_v1   ;;  %183 = vperm.xlu0 %335, %v177_v2   ;;  %s165_s21 = scalar_lea.vmem %s411_s0, %s318_s18  ;;  %v180_v9 = vld [vmem:[%s413_s2 + $0x18] sm:$0xff]  ;;  %v178_v10 = vld [vmem:[%s413_s2 + $0x8] sm:$0xff]  ;;  %s170_s10 = scalar_lea.vmem %s414_s3, %s319_s7 }
   0xe   : > { %v176_v3 = vld [vmem:[%s165_s21 + $0x8] sm:$0xff]  ;;  %v175_v4 = vld [vmem:[%s165_s21] sm:$0xff] }
   0xf   : > { %228 = vmatpush.msra.mxu0 %v176_v3  ;;  %320 = vmatpush.msra.mxu1 %v176_v3 }
  0x10   : > { %321 = vmatpush.msra.mxu2 %v176_v3  ;;  %322 = vmatpush.msra.mxu3 %v176_v3 }
  0x11   : > { %229 = vmatpush.msra.mxu0 %v175_v4  ;;  %323 = vmatpush.msra.mxu1 %v175_v4 }
  0x12   : > { %324 = vmatpush.msra.mxu2 %v175_v4  ;;  %325 = vmatpush.msra.mxu3 %v175_v4 }
  0x13   : > { %312 = vmatmul.msk.f32.vlgmr.msra.gmra.mxu0 %vm201_vm0, %v171_v5  ;;  %313 = vmatmul.msk.f32.vlgmr.msra.gmra.mxu1 %vm201_vm0, %v172_v6 }
  0x14   : > { %314 = vmatmul.msk.f32.vlgmr.msra.gmra.mxu2 %vm201_vm0, %v173_v7  ;;  %315 = vmatmul.msk.f32.vlgmr.msra.gmra.mxu3 %vm201_vm0, %v174_v8 }
  0x15   : > { %198 = vperm.xlu1 %336, %v180_v9   ;;  %188 = vperm.xlu0 %335, %v178_v10  }
  0x7f   : > { %v184_v11 = vpop.permute.xlu0 %183  ;;  %v194_v12 = vpop.permute.xlu1 %193 }
  0x87   : > { %v189_v13 = vpop.permute.xlu0 %188  ;;  %v199_v18 = vpop.permute.xlu1 %198 }
  0x90   : > { %v231_v14 = vpop.f32.mrf.mxu0  ;;  %v234_v15 = vpop.f32.mrf.mxu1 }
  0x91   : > { %v232_v16 = vadd.f32 %v231_v14, %v184_v11  ;;  %v235_v17 = vadd.f32 %v234_v15, %v189_v13 }
  0x93   : > { %244 = vst.msk [vmem:[%s170_s10] sm:$0xff] %vm243_vm1, %v232_v16 }
  0x94   : > { %245 = vst.msk [vmem:[%s170_s10 + $0x8] sm:$0xff] %vm243_vm1, %v235_v17 }
  0x97   : > { %v237_v19 = vpop.f32.mrf.mxu2  ;;  %v240_v20 = vpop.f32.mrf.mxu3 }
  0x98   : > { %v238_v21 = vadd.f32 %v237_v19, %v194_v12  ;;  %v241_v22 = vadd.f32 %v240_v20, %v199_v18 }
  0x9a   : > { %246 = vst.msk [vmem:[%s170_s10 + $0x10] sm:$0xff] %vm243_vm1, %v238_v21 }
  0x9b   : > { %247 = vst.msk [vmem:[%s170_s10 + $0x18] sm:$0xff] %vm243_vm1, %v241_v22 }
  0x9c PF: > { %s13_s12 = sadd.s32 1, %s343_s12  }
  0x9d   : > { %p10_p4 = scmp.ge.s32.totalorder %s13_s12, 4  }
  0x9f   :  { %12 = sbr.rel (!%p10_p4) target bundleno = 1 (0x1), region = 62 }

// kernel: decoder_block_forward.5
= control target key start
LH: loop header
LB: loop body
LE: loop exit
PB: predicated region body
PF: predicated region fallthrough
CT: control target
= control target key end

     0   :  { %s1427_s15 = smov 0   ;;  %s1635_s0 = inlined_call_operand.vmem [shape: f32[2,8,384], index: 0, kind: input, shape index: {}]   ;;  %s1636_s1 = inlined_call_operand.vmem [shape: f32[9,8,8], index: 1, kind: input, shape index: {}]   ;;  %s1637_s2 = inlined_call_operand.vmem [shape: f32[8,6], index: 2, kind: input, shape index: {}]   ;;  %s1638_s3 = inlined_call_operand.vmem [shape: f32[1,288], index: 3, kind: input, shape index: {}]   ;;  %s1639_s4 = inlined_call_operand.vmem [shape: f32[2,8,384], index: 4, kind: output, shape index: {}]  }
   0x1 LB: > { %s1246_s16 = sadd.s32 4294967295, %s1386_s15   ;;  %p1250_p0 = scmp.ge.s32.totalorder %s1386_s15, 1  ;;  %s1386_s15 = sphi %s1427_s15, %s14_s15  }
   0x2   : > { %p162_p1 = scmp.lt.s32.totalorder %s1386_s15, 3 }
   0x4   : > { %p163_p2 = pnand %p1250_p0, %p162_p1 }
   0x5   : > { %p188_p3 = scmp.lt.s32.totalorder (!%p163_p2), %s1246_s16, 1  ;;  %s1388_s21 = smov (!%p163_p2), 126  }
   0x6   : > { %166 = sbr.rel (%p163_p2) target bundleno = 1765 (0x6e5), region = 36  ;;  %s1389_s22 = smov (!%p163_p2), 127  }
   0x7   : > { %s1390_s23 = smov (!%p163_p2), 110   ;;  %s1391_s24 = smov (!%p163_p2), 109  }
   0x8   : > { %s1392_s25 = smov (!%p163_p2), 108   ;;  %s1393_s26 = smov (!%p163_p2), 92  }
   0x9   : > { %s1394_s27 = smov (!%p163_p2), 91   ;;  %s1395_s28 = smov (!%p163_p2), 90  }
   0xa   : > { %s1401_s7 = smov (!%p163_p2), 19  }
   0xb   : > { %s1641_s16 = smov (!%p188_p3, %s1246_s16), 1  ;;  %vm221_vm0 = vcmask 64512   ;;  %v203_v6 = vld [vmem:[%s1636_s1] sm:$0xff]  ;;  %vm356_vm1 = vcmask 1031168   ;;  %vm436_vm2 = vcmask 900096   ;;  %v1253_v16 = vld [vmem:[%s1636_s1 + $0x8] sm:$0xff] }
   0xc   : > { %s1290_s17 = smul.u32 24, %s1641_s16  ;;  %vm215_vm3 = vcmask 1039360   ;;  %vm596_vm4 = vcmask 883712   ;;  %v1260_v28 = vld [vmem:[%s1636_s1 + $0x10] sm:$0xff]  ;;  %vm516_vm5 = vcmask 891904   ;;  %v1264_v35 = vld [vmem:[%s1636_s1 + $0x18] sm:$0xff] }
   0xd   : > { %vm676_vm6 = vcmask 752640   ;;  %v1268_v45 = vld [vmem:[%s1636_s1 + $0x20] sm:$0xff]  ;;  %v1272_v47 = vld [vmem:[%s1636_s1 + $0x28] sm:$0xff]  ;;  %v1396_v50 = vmov 0   ;;  %vm756_vm7 = vcmask 744448   ;;  %v1276_v56 = vld [vmem:[%s1636_s1 + $0x30] sm:$0xff] }
   0xe   : > { %s192_s20 = scalar_lea.vmem %s1635_s0, %s1290_s17  ;;  %v1502_v48 = vld [vmem:[%s1637_s2] sm:$0xff]  ;;  %1363 = vset.pattern.permute.xlu1 %v1396_v50  ;;  %vm836_vm8 = vcmask 736256   ;;  %v1280_v63 = vld [vmem:[%s1636_s1 + $0x38] sm:$0xff]  ;;  %vm930_vm9 = vcmask 261120   ;;  %vm954_vm12 = vcmask 7168   ;;  %s197_s10 = scalar_lea.vmem %s1639_s4, %s1290_s17 }
   0xf   : > { %v198_v0 = vld [vmem:[%s192_s20] sm:$0xff]  ;;  %v1443_v1 = vld [vmem:[%s192_s20 + $0x8] sm:$0xff]  ;;  %v1445_v2 = vld [vmem:[%s192_s20 + $0x10] sm:$0xff] }
  0x10   : > { %v1328_v3 = vpack.i.bf16 %v1443_v1, %v198_v0  ;;  %v1323_v4 = vpack.i.bf16 %v198_v0, %v1445_v2  ;;  %v1333_v5 = vpack.i.bf16 %v1445_v2, %v1443_v1  ;;  %303 = vmatpush.msra.mxu3 %v198_v0 }
  0x11   : > { %1257 = vmatmul.msk.f32.vlgmr.msra.gmra.mxu3 %vm221_vm0, %v203_v6 }
  0x12   : > { %1329 = vrot.lane.b32.xlu1 %v1328_v3, %s1388_s21  ;;  %1324 = vrot.lane.b32.xlu0 %v1323_v4, %s1389_s22 }
  0x13   : > { %1334 = vrot.lane.b32.xlu2 %v1333_v5, %s1390_s23 }
  0x1a   : > { %354 = vrot.lane.b32.xlu1 %v1445_v2, %s1388_s21  ;;  %211 = vrot.lane.b32.xlu0 %v1443_v1, %s1389_s22 }
  0x1b   : > { %430 = vrot.lane.b32.xlu2 %v198_v0, %s1390_s23 }
  0x22   : > { %512 = vrot.lane.b32.xlu1 %v1443_v1, %s1391_s24  ;;  %1339 = vrot.lane.b32.xlu0 %v1323_v4, %s1391_s24 }
  0x23   : > { %1344 = vrot.lane.b32.xlu2 %v1328_v3, %s1392_s25 }
  0x2a   : > { %594 = vrot.lane.b32.xlu1 %v1445_v2, %s1392_s25  ;;  %1349 = vrot.lane.b32.xlu0 %v1328_v3, %s1393_s26 }
  0x2b   : > { %674 = vrot.lane.b32.xlu2 %v1445_v2, %s1393_s26 }
  0x32   : > { %1354 = vrot.lane.b32.xlu0 %v1333_v5, %s1394_s27  ;;  %750 = vrot.lane.b32.xlu1 %v198_v0, %s1394_s27  ;;  %v1284_v0 = vld [vmem:[%s1636_s1 + $0x40] sm:$0xff] }
  0x33   : > { %1359 = vrot.lane.b32.xlu2 %v1323_v4, %s1395_s28 }
  0x3a   : > { %832 = vrot.lane.b32.xlu0 %v1443_v1, %s1395_s28  ;;  %910 = vperm.xlu1 %1363, %v1502_v48  }
  0x6d   : > { %v1335_v7 = vpop.permute.xlu2 %1334 }
  0x6e   : > { %v1337_v9 = vunpack.i.h.bf16 %v1335_v7  ;;  %v1336_v10 = vunpack.i.l.bf16 %v1335_v7 }
  0x70   : > { %v438_v18 = vsel %vm436_vm2, %v1336_v10, %v1337_v9 }
  0x75   : > { %v431_v8 = vpop.permute.xlu2 %430 }
  0x76   : > { %v437_v29 = vsel %vm436_vm2, %v431_v8, %v1336_v10  ;;  %vm1009_vm2 = vcmask 257024  }
  0x7d   : > { %v1345_v19 = vpop.permute.xlu2 %1344 }
  0x7e   : > { %v1347_v23 = vunpack.i.h.bf16 %v1345_v19  ;;  %v1346_v27 = vunpack.i.l.bf16 %v1345_v19 }
  0x80   : > { %v597_v30 = vsel %vm596_vm4, %v1346_v27, %v1347_v23 }
  0x84   : > { %v1330_v11 = vpop.permute.xlu1 %1329  ;;  %v1325_v12 = vpop.permute.xlu0 %1324 }
  0x85   : > { %v1332_v13 = vunpack.i.h.bf16 %v1330_v11  ;;  %v1331_v14 = vunpack.i.l.bf16 %v1330_v11  ;;  %v1326_v15 = vunpack.i.l.bf16 %v1325_v12  ;;  %v1327_v20 = vunpack.i.h.bf16 %v1325_v12  ;;  %v675_v38 = vpop.permute.xlu2 %674 }
  0x87   : > { %280 = vmatpush.msra.mxu2 %v1326_v15  ;;  %v357_v17 = vsel %vm356_vm1, %v1331_v14, %v1332_v13 }
  0x88   : > { %1256 = vmatmul.msk.f32.vlgmr.msra.gmra.mxu2 %vm221_vm0, %v1253_v16 }
  0x89   : > { %380 = vmatpush.msrb.mxu2 %v357_v17 }
  0x8b   : > { %480 = vmatpush.msra.mxu2 %v438_v18 }
  0x8c   : > { %v355_v21 = vpop.permute.xlu1 %354  ;;  %v212_v22 = vpop.permute.xlu0 %211 }
  0x8d   : > { %v216_v24 = vsel %vm215_vm3, %v1327_v20, %v212_v22  ;;  %v217_v25 = vsel %vm215_vm3, %v212_v22, %v1326_v15  ;;  %v358_v26 = vsel %vm356_vm1, %v1332_v13, %v355_v21  ;;  %v1360_v49 = vpop.permute.xlu2 %1359  ;;  %vm1005_vm1 = vcmask 1043456  }
  0x8e   : > { %240 = vmatpush.msra.mxu0 %v216_v24  ;;  %260 = vmatpush.msra.mxu1 %v217_v25  ;;  %v1361_v58 = vunpack.i.l.bf16 %v1360_v49  ;;  %v1362_v59 = vunpack.i.h.bf16 %v1360_v49 }
  0x8f   : > { %400 = vmatpush.msrb.mxu3 %v358_v26  ;;  %1254 = vmatmul.msk.f32.vlgmr.msra.gmra.mxu0 %vm221_vm0, %v1253_v16 }
  0x90   : > { %1255 = vmatmul.msk.f32.vlgmr.msra.gmra.mxu1 %vm221_vm0, %v1253_v16  ;;  %323 = vmatpush.msrb.mxu0 %v1443_v1 }
  0x91   : > { %343 = vmatpush.msrb.mxu1 %v1445_v2  ;;  %500 = vmatpush.msra.mxu3 %v1337_v9 }
  0x92   : > { %1261 = vmatmul.msk.f32.vlgmr.msrb.gmra.mxu2 %vm221_vm0, %v1260_v28  ;;  %420 = vmatpush.msra.mxu0 %v355_v21 }
  0x93   : > { %460 = vmatpush.msra.mxu1 %v437_v29  ;;  %1262 = vmatmul.msk.f32.vlgmr.msrb.gmra.mxu3 %vm221_vm0, %v1260_v28 }
  0x94   : > { %v513_v31 = vpop.permute.xlu1 %512  ;;  %v1340_v32 = vpop.permute.xlu0 %1339  ;;  %620 = vmatpush.msrb.mxu3 %v597_v30 }
  0x95   : > { %v1342_v33 = vunpack.i.h.bf16 %v1340_v32  ;;  %v1341_v34 = vunpack.i.l.bf16 %v1340_v32  ;;  %v305_v4 = vpop.f32.mrf.mxu3 }
  0x97   : > { %1258 = vmatmul.msk.f32.vlgmr.msrb.gmra.mxu0 %vm221_vm0, %v203_v6  ;;  %580 = vmatpush.msrb.mxu2 %v1341_v34  ;;  %v517_v36 = vsel %vm516_vm5, %v1342_v33, %v513_v31  ;;  %v518_v37 = vsel %vm516_vm5, %v513_v31, %v1341_v34 }
  0x98   : > { %1259 = vmatmul.msk.f32.vlgmr.msrb.gmra.mxu1 %vm221_vm0, %v203_v6  ;;  %540 = vmatpush.msrb.mxu0 %v517_v36 }
  0x99   : > { %560 = vmatpush.msrb.mxu1 %v518_v37 }
  0x9a   : > { %1266 = vmatmul.msk.f32.vlgmr.msra.gmra.mxu2 %vm221_vm0, %v1264_v35 }
  0x9b   : > { %1267 = vmatmul.msk.f32.vlgmr.msra.gmra.mxu3 %vm221_vm0, %v1264_v35 }
  0x9c   : > { %v595_v39 = vpop.permute.xlu1 %594  ;;  %v1350_v40 = vpop.permute.xlu0 %1349 }
  0x9d   : > { %v598_v41 = vsel %vm596_vm4, %v1347_v23, %v595_v39  ;;  %v1352_v42 = vunpack.i.h.bf16 %v1350_v40  ;;  %v1351_v43 = vunpack.i.l.bf16 %v1350_v40 }
  0x9f   : > { %1263 = vmatmul.msk.f32.vlgmr.msra.gmra.mxu0 %vm221_vm0, %v1260_v28  ;;  %v678_v44 = vsel %vm676_vm6, %v1352_v42, %v675_v38  ;;  %v677_v46 = vsel %vm676_vm6, %v1351_v43, %v1352_v42  ;;  %v201_v43 = vld [vmem:[%s1638_s3] sm:$0x7] }
  0xa0   : > { %1265 = vmatmul.msk.f32.vlgmr.msra.gmra.mxu1 %vm221_vm0, %v1264_v35  ;;  %640 = vmatpush.msra.mxu0 %v598_v41 }
  0xa1   : > { %700 = vmatpush.msra.mxu2 %v677_v46  ;;  %720 = vmatpush.msra.mxu3 %v678_v44 }
  0xa2   : > { %1271 = vmatmul.msk.f32.vlgmr.msrb.gmra.mxu2 %vm221_vm0, %v1268_v45  ;;  %660 = vmatpush.msra.mxu1 %v595_v39 }
  0xa3   : > { %1273 = vmatmul.msk.f32.vlgmr.msrb.gmra.mxu3 %vm221_vm0, %v1272_v47 }
  0xa4   : > { %v1355_v51 = vpop.permute.xlu0 %1354  ;;  %v751_v52 = vpop.permute.xlu1 %750 }
  0xa5   : > { %v1357_v53 = vunpack.i.h.bf16 %v1355_v51  ;;  %v1356_v54 = vunpack.i.l.bf16 %v1355_v51 }
  0xa7   : > { %1269 = vmatmul.msk.f32.vlgmr.msrb.gmra.mxu0 %vm221_vm0, %v1268_v45  ;;  %v757_v55 = vsel %vm756_vm7, %v751_v52, %v1356_v54  ;;  %820 = vmatpush.msrb.mxu3 %v1357_v53  ;;  %v758_v57 = vsel %vm756_vm7, %v1356_v54, %v1357_v53  ;;  %v1532_v53 = vperm.slane %v201_v43, 0 }
  0xa8   : > { %1270 = vmatmul.msk.f32.vlgmr.msrb.gmra.mxu1 %vm221_vm0, %v1268_v45  ;;  %740 = vmatpush.msrb.mxu0 %v675_v38 }
  0xa9   : > { %780 = vmatpush.msrb.mxu1 %v757_v55  ;;  %800 = vmatpush.msrb.mxu2 %v758_v57  ;;  %v1536_v57 = vperm.slane %v201_v43, 2 }
  0xaa   : > { %1277 = vmatmul.msk.f32.vlgmr.msra.gmra.mxu2 %vm221_vm0, %v1276_v56 }
  0xab   : > { %1278 = vmatmul.msk.f32.vlgmr.msra.gmra.mxu3 %vm221_vm0, %v1276_v56  ;;  %900 = vmatpush.msra.mxu2 %v1361_v58 }
  0xac   : > { %v833_v60 = vpop.permute.xlu0 %832  ;;  %v911_v49 = vpop.permute.xlu1 %910 }
  0xad   : > { %v837_v61 = vsel %vm836_vm8, %v1362_v59, %v833_v60  ;;  %v838_v62 = vsel %vm836_vm8, %v833_v60, %v1361_v58 }
  0xaf   : > { %1274 = vmatmul.msk.f32.vlgmr.msra.gmra.mxu0 %vm221_vm0, %v1272_v47 }
  0xb0   : > { %1275 = vmatmul.msk.f32.vlgmr.msra.gmra.mxu1 %vm221_vm0, %v1272_v47  ;;  %860 = vmatpush.msra.mxu0 %v837_v61 }
  0xb1   : > { %880 = vmatpush.msra.mxu1 %v838_v62 }
  0xb2   : > { %1282 = vmatmul.msk.f32.vlgmr.msrb.gmra.mxu2 %vm221_vm0, %v1280_v63 }
  0xb3   : > { %1283 = vmatmul.msk.f32.vlgmr.msrb.gmra.mxu3 %vm221_vm0, %v1280_v63 }
  0xb7   : > { %1279 = vmatmul.msk.f32.vlgmr.msrb.gmra.mxu0 %vm221_vm0, %v1276_v56  ;;  %v1534_v56 = vperm.slane %v201_v43, 1 }
  0xb8   : > { %1281 = vmatmul.msk.f32.vlgmr.msrb.gmra.mxu1 %vm221_vm0, %v1280_v63 }
  0xba   : > { %1287 = vmatmul.msk.f32.vlgmr.msra.gmra.mxu2 %vm221_vm0, %v1284_v0 }
  0xbf   : > { %1285 = vmatmul.msk.f32.vlgmr.msra.gmra.mxu0 %vm221_vm0, %v1284_v0 }
  0xc0   : > { %1286 = vmatmul.msk.f32.vlgmr.msra.gmra.mxu1 %vm221_vm0, %v1284_v0 }
 0x10b   : > { %v282_v1 = vpop.f32.mrf.mxu2 }
 0x10c   : > { %v242_v2 = vpop.f32.mrf.mxu0 }
 0x10d   : > { %v262_v3 = vpop.f32.mrf.mxu1  ;;  %v306_v20 = vadd.f32 %v305_v4, %v242_v2 }
 0x114   : > { %v325_v5 = vpop.f32.mrf.mxu0 }
 0x115   : > { %v382_v6 = vpop.f32.mrf.mxu2  ;;  %v345_v7 = vpop.f32.mrf.mxu1  ;;  %v326_v17 = vadd.f32 %v325_v5, %v262_v3 }
 0x116   : > { %v402_v8 = vpop.f32.mrf.mxu3  ;;  %v346_v18 = vadd.f32 %v345_v7, %v282_v1  ;;  %v425_v24 = vadd.f32 %v382_v6, %v306_v20 }
 0x117   : > { %v426_v26 = vadd.f32 %v402_v8, %v326_v17 }
 0x11c   : > { %v422_v9 = vpop.f32.mrf.mxu0 }
 0x11d   : > { %v482_v10 = vpop.f32.mrf.mxu2  ;;  %v462_v11 = vpop.f32.mrf.mxu1  ;;  %v427_v23 = vadd.f32 %v422_v9, %v346_v18 }
 0x11e   : > { %v502_v12 = vpop.f32.mrf.mxu3  ;;  %v505_v27 = vadd.f32 %v462_v11, %v425_v24  ;;  %v506_v28 = vadd.f32 %v482_v10, %v426_v26 }
 0x11f   : > { %v507_v29 = vadd.f32 %v502_v12, %v427_v23 }
 0x124   : > { %v542_v13 = vpop.f32.mrf.mxu0 }
 0x125   : > { %v582_v14 = vpop.f32.mrf.mxu2  ;;  %v562_v15 = vpop.f32.mrf.mxu1  ;;  %v585_v30 = vadd.f32 %v542_v13, %v505_v27 }
 0x126   : > { %v622_v16 = vpop.f32.mrf.mxu3  ;;  %v587_v31 = vadd.f32 %v582_v14, %v507_v29  ;;  %v586_v32 = vadd.f32 %v562_v15, %v506_v28  ;;  %v1397_v29 = vmov 8.0  }
 0x127   : > { %v665_v38 = vadd.f32 %v622_v16, %v585_v30 }
 0x12c   : > { %v642_v19 = vpop.f32.mrf.mxu0 }
 0x12d   : > { %v702_v21 = vpop.f32.mrf.mxu2  ;;  %v662_v22 = vpop.f32.mrf.mxu1  ;;  %v666_v36 = vadd.f32 %v642_v19, %v586_v32 }
 0x12e   : > { %v722_v25 = vpop.f32.mrf.mxu3  ;;  %v667_v37 = vadd.f32 %v662_v22, %v587_v31  ;;  %v745_v40 = vadd.f32 %v702_v21, %v665_v38 }
 0x12f   : > { %v746_v42 = vadd.f32 %v722_v25, %v666_v36 }
 0x134   : > { %v742_v33 = vpop.f32.mrf.mxu0 }
 0x135   : > { %v802_v34 = vpop.f32.mrf.mxu2  ;;  %v782_v35 = vpop.f32.mrf.mxu1  ;;  %v747_v39 = vadd.f32 %v742_v33, %v667_v37 }
 0x136   : > { %v822_v41 = vpop.f32.mrf.mxu3  ;;  %v825_v44 = vadd.f32 %v782_v35, %v745_v40  ;;  %v826_v45 = vadd.f32 %v802_v34, %v746_v42 }
 0x137   : > { %v827_v46 = vadd.f32 %v822_v41, %v747_v39 }
 0x13c   : > { %v862_v47 = vpop.f32.mrf.mxu0 }
 0x13d   : > { %v902_v50 = vpop.f32.mrf.mxu2  ;;  %v905_v51 = vadd.f32 %v862_v47, %v825_v44  ;;  %v882_v52 = vpop.f32.mrf.mxu1  ;;  %v1398_v47 = vmov 1  }
 0x13e   : > { %v907_v54 = vadd.f32 %v902_v50, %v827_v46  ;;  %v906_v55 = vadd.f32 %v882_v52, %v826_v45  ;;  %1364 = vset.pattern.permute.xlu0 %v1398_v47 }
 0x13f   : > { %v913_v58 = vadd.f32 %v911_v49, %v905_v51 }
 0x140   : > { %v914_v59 = vadd.f32 %v911_v49, %v906_v55  ;;  %v915_v60 = vadd.f32 %v911_v49, %v907_v54 }
 0x141   : > { %v1539_v61 = vmul.f32 %v1532_v53, %v913_v58 }
 0x142   : > { %v1542_v62 = vmul.f32 %v1534_v56, %v914_v59  ;;  %v1545_v63 = vmul.f32 %v1536_v57, %v915_v60 }
 0x143   : > { %v926_v0 = vmul.f32 %v1539_v61, %v1539_v61 }
 0x144   : > { %v927_v1 = vmul.f32 %v1542_v62, %v1542_v62  ;;  %v928_v2 = vmul.f32 %v1545_v63, %v1545_v63 }
 0x146   : > { %v929_v3 = vadd.f32 %v927_v1, %v926_v0  ;;  %v931_v4 = vsel %vm930_vm9, %v928_v2, 0.0  ;;  %vm1179_vm9 = vcmask 154624  }
 0x148   : > { %v932_v5 = vadd.f32 %v931_v4, %v929_v3 }
 0x14a   : > { %933 = vadd.xlane.f32.xlu2 %v932_v5 }
 0x1bd   : > { %v934_v6 = vpop.xlane.xlu2 %933 }
 0x1be   : > { %v935_v7 = vadd.f32 1e-05, %v934_v6 }
 0x1c0   : > { %1368 = vrsqrt.f32 %v935_v7  ;;  %vm943_vm10 = vcmp.eq.f32.partialorder %v935_v7, inf  ;;  %v946_v15 = vand.u32 2147483648, %v935_v7  ;;  %vm945_vm11 = vcmp.eq.f32.partialorder %v935_v7, 0.0 }
 0x1c1   : > { %1370 = vrcp.f32 %v1397_v29 }
 0x1c6   : > { %v1369_v8 = vpop.eup %1368 }
 0x1c7   : > { %v937_v9 = vmul.f32 %v1369_v8, %v935_v7  ;;  %v1371_v30 = vpop.eup %1370 }
 0x1c8   : > { %v967_v31 = vmul.f32 8.0, %v1371_v30  ;;  %vm971_vm13 = vweird.f32 %v1371_v30 }
 0x1c9   : > { %v938_v10 = vmul.f32 %v1369_v8, %v937_v9 }
 0x1ca   : > { %v968_v32 = vsub.f32 1.0, %v967_v31 }
 0x1cb   : > { %v939_v11 = vmul.f32 0.5, %v938_v10 }
 0x1cc   : > { %v969_v33 = vmul.f32 %v1371_v30, %v968_v32 }
 0x1cd   : > { %v940_v12 = vsub.f32 1.5, %v939_v11 }
 0x1ce   : > { %v970_v34 = vadd.f32 %v1371_v30, %v969_v33 }
 0x1cf   : > { %v941_v13 = vmul.f32 %v1369_v8, %v940_v12 }
 0x1d0   : > { %v972_v35 = vsel %vm971_vm13, %v1371_v30, %v970_v34 }
 0x1d1   : > { %v942_v14 = vmul.f32 %v941_v13, %v935_v7 }
 0x1d3   : > { %v944_v16 = vsel %vm943_vm10, %v935_v7, %v942_v14  ;;  %vm1186_vm10 = vcmask 416768  }
 0x1d4   : > { %v947_v17 = vsel %vm945_vm11, %v946_v15, %v944_v16 }
 0x1d5   : > { %v948_v18 = vmul.f32 %v947_v17, %v1502_v48 }
 0x1d7   : > { %v949_v19 = vmul.f32 %v948_v18, %v948_v18 }
 0x1d9   : > { %951 = vrot.lane.b32.xlu0 %v949_v19, %s1389_s22 }
 0x24b   : > { %v952_v20 = vpop.permute.xlu0 %951 }
 0x24c   : > { %v955_v21 = vsel %vm954_vm12, %v952_v20, 0.0 }
 0x24d   : > { %956 = vadd.xlane.f32.xlu1 %v955_v21 }
 0x2c0   : > { %v957_v22 = vpop.xlane.xlu1 %956 }
 0x2c1   : > { %v958_v23 = vrot.slane %v957_v22, 4 }
 0x2c3   : > { %v959_v24 = vadd.f32 %v958_v23, %v957_v22 }
 0x2c5   : > { %v960_v25 = vrot.slane %v959_v24, 2 }
 0x2c7   : > { %v961_v26 = vadd.f32 %v960_v25, %v959_v24 }
 0x2c9   : > { %v962_v27 = vrot.slane %v961_v26, 1 }
 0x2cb   : > { %v963_v28 = vadd.f32 %v962_v27, %v961_v26 }
 0x2cd   : > { %1291 = vpush %v963_v28 }
 0x2fe   : > { %s1292_s30 = spop %1291 }
 0x2ff   : > { %v965_v36 = vstv %s1292_s30 }
 0x300   : > { %v973_v37 = vmul.f32 %v972_v35, %v965_v36 }
 0x302   : > { %v974_v38 = vadd.f32 1e-05, %v973_v37 }
 0x304   : > { %1372 = vrsqrt.f32 %v974_v38  ;;  %vm981_vm15 = vweird.f32 %v974_v38 }
 0x30a   : > { %v1373_v39 = vpop.eup %1372 }
 0x30b   : > { %v976_v40 = vmul.f32 %v1373_v39, %v974_v38  ;;  %vm982_vm14 = vweird.f32 %v1373_v39 }
 0x30c   : > { %vm983_vm0 = vmor %vm981_vm15, %vm982_vm14 }
 0x30d   : > { %v977_v41 = vmul.f32 %v1373_v39, %v976_v40 }
 0x30f   : > { %v978_v42 = vmul.f32 0.5, %v977_v41 }
 0x311   : > { %v979_v43 = vsub.f32 1.5, %v978_v42 }
 0x313   : > { %v980_v44 = vmul.f32 %v1373_v39, %v979_v43 }
 0x315   : > { %v984_v45 = vsel %vm983_vm0, %v1373_v39, %v980_v44 }
 0x316   : > { %v985_v46 = vmul.f32 %v984_v45, %v1502_v48 }
 0x318   : > { %987 = vrot.lane.b32.xlu0 %v985_v46, %s1389_s22 }
 0x320   : > { %991 = vrot.lane.b32.xlu0 %v1502_v48, %s1388_s21 }
 0x38a   : > { %v988_v49 = vpop.permute.xlu0 %987 }
 0x38b   : > { %v990_v50 = vmul.f32 %v988_v49, %v948_v18  ;;  %v1399_v18 = vmov 4  }
 0x38c   : > { %1365 = vset.pattern.permute.xlu2 %v1399_v18 }
 0x392   : > { %v992_v51 = vpop.permute.xlu0 %991 }
 0x393   : > { %v994_v52 = vadd.f32 %v992_v51, %v990_v50  ;;  %v1400_v50 = vmov 5  }
 0x394   : > { %1366 = vset.pattern.permute.xlu1 %v1400_v50 }
 0x395   : > { %1374 = vtanh.f32 %v994_v52 }
 0x39b   : > { %v1375_v54 = vpop.eup %1374 }
 0x39c   : > { %v996_v55 = vadd.f32 1.0, %v1375_v54 }
 0x39e   : > { %999 = vperm.xlu0 %1364, %v996_v55  }
 0x3a6   : > { %1367 = vset.pattern.permute.xlu0 %v1400_v50 }
 0x410   : > { %v1000_v58 = vpop.permute.xlu0 %999 }
 0x411   : > { %v1560_v59 = vmul.f32 %v1000_v58, %v1539_v61  ;;  %v1563_v60 = vmul.f32 %v1000_v58, %v1542_v62  ;;  %v1566_v0 = vmul.f32 %v1000_v58, %v1545_v63 }
 0x413   : > { %v1006_v1 = vsel %vm1005_vm1, %v1560_v59, 0.0  ;;  %v1007_v2 = vsel %vm1005_vm1, %v1563_v60, 0.0  ;;  %v1085_v3 = vrot.slane %v1560_v59, 4  ;;  %v1086_v5 = vrot.slane %v1563_v60, 4 }
 0x414   : > { %v1008_v4 = vadd.f32 %v1007_v2, %v1006_v1  ;;  %v1010_v61 = vsel %vm1009_vm2, %v1566_v0, 0.0  ;;  %v1087_v7 = vrot.slane %v1566_v0, 4 }
 0x415   : > { %v1091_v6 = vsel %vm1005_vm1, %v1085_v3, 0.0  ;;  %v1092_v63 = vsel %vm1005_vm1, %v1086_v5, 0.0 }
 0x416   : > { %v1011_v62 = vadd.f32 %v1010_v61, %v1008_v4  ;;  %v1093_v8 = vadd.f32 %v1092_v63, %v1091_v6  ;;  %v1094_v9 = vsel %vm1009_vm2, %v1087_v7, 0.0 }
 0x418   : > { %1012 = vadd.xlane.f32.xlu2 %v1011_v62  ;;  %v1095_v10 = vadd.f32 %v1094_v9, %v1093_v8 }
 0x420   : > { %1096 = vadd.xlane.f32.xlu2 %v1095_v10 }
 0x438   : > { %1063 = vperm.xlu2 %1365, %v1502_v48  }
 0x48b   : > { %v1013_v11 = vpop.xlane.xlu2 %1012 }
 0x48c   : > { %v1014_v12 = vrot.slane %v1013_v11, 4 }
 0x48e   : > { %v1015_v13 = vadd.f32 %v1014_v12, %v1013_v11 }
 0x490   : > { %v1016_v14 = vrot.slane %v1015_v13, 2 }
 0x492   : > { %v1017_v15 = vadd.f32 %v1016_v14, %v1015_v13 }
 0x493   : > { %v1097_v35 = vpop.xlane.xlu2 %1096 }
 0x494   : > { %v1018_v16 = vrot.slane %v1017_v15, 1  ;;  %v1098_v36 = vrot.slane %v1097_v35, 4 }
 0x496   : > { %v1019_v17 = vadd.f32 %v1018_v16, %v1017_v15  ;;  %v1099_v37 = vadd.f32 %v1098_v36, %v1097_v35 }
 0x498   : > { %1293 = vpush %v1019_v17  ;;  %v1100_v38 = vrot.slane %v1099_v37, 2 }
 0x49a   : > { %v1101_v42 = vadd.f32 %v1100_v38, %v1099_v37 }
 0x49b   : > { %v1064_v37 = vpop.permute.xlu2 %1063 }
 0x49c   : > { %v1102_v45 = vrot.slane %v1101_v42, 1 }
 0x49e   : > { %v1103_v49 = vadd.f32 %v1102_v45, %v1101_v42 }
 0x4c9   : > { %s1294_s21 = spop %1293 }
 0x4ca   : > { %v1021_v19 = vstv %s1294_s21 }
 0x4cb   : > { %v1022_v20 = vmul.f32 0.0009765625, %v1021_v19 }
 0x4cd   : > { %v1023_v21 = vsub.f32 %v1560_v59, %v1022_v20  ;;  %v1024_v22 = vsub.f32 %v1563_v60, %v1022_v20  ;;  %v1025_v23 = vsub.f32 %v1566_v0, %v1022_v20 }
 0x4cf   : > { %v1585_v24 = vmul.f32 %v1023_v21, %v1532_v53  ;;  %v1588_v25 = vmul.f32 %v1024_v22, %v1534_v56  ;;  %v1591_v26 = vmul.f32 %v1025_v23, %v1536_v57 }
 0x4d1   : > { %v1029_v27 = vmul.f32 %v1585_v24, %v1585_v24  ;;  %v1030_v28 = vmul.f32 %v1588_v25, %v1588_v25  ;;  %v1031_v29 = vmul.f32 %v1591_v26, %v1591_v26 }
 0x4d3   : > { %v1032_v30 = vsel %vm1005_vm1, %v1029_v27, 0.0  ;;  %v1033_v31 = vsel %vm1005_vm1, %v1030_v28, 0.0  ;;  %v1035_v33 = vsel %vm1009_vm2, %v1031_v29, 0.0 }
 0x4d4   : > { %v1034_v32 = vadd.f32 %v1033_v31, %v1032_v30 }
 0x4d6   : > { %v1036_v34 = vadd.f32 %v1035_v33, %v1034_v32 }
 0x4d8   : > { %1037 = vadd.xlane.f32.xlu0 %v1036_v34 }
 0x54b   : > { %v1038_v39 = vpop.xlane.xlu0 %1037 }
 0x54c   : > { %v1039_v40 = vrot.slane %v1038_v39, 4 }
 0x54e   : > { %v1040_v41 = vadd.f32 %v1039_v40, %v1038_v39 }
 0x550   : > { %v1041_v43 = vrot.slane %v1040_v41, 2 }
 0x552   : > { %v1042_v44 = vadd.f32 %v1041_v43, %v1040_v41 }
 0x554   : > { %v1043_v46 = vrot.slane %v1042_v44, 1 }
 0x556   : > { %v1044_v47 = vadd.f32 %v1043_v46, %v1042_v44 }
 0x558   : > { %1295 = vpush %v1044_v47 }
 0x559   : > { %1297 = vpush %v1103_v49 }
 0x589   : > { %s1602_s22 = spop %1295 }
 0x58a   : > { %s1298_s5 = spop %1297  ;;  %v1046_v16 = vstv %s1602_s22 }
 0x58b   : > { %v1105_v51 = vstv %s1298_s5  ;;  %v1047_v17 = vmul.f32 0.0009765625, %v1046_v16 }
 0x58c   : > { %v1106_v52 = vmul.f32 0.0009765625, %v1105_v51 }
 0x58d   : > { %v1048_v18 = vadd.f32 1e-05, %v1047_v17 }
 0x58e   : > { %v1107_v54 = vsub.f32 %v1560_v59, %v1106_v52  ;;  %v1108_v55 = vsub.f32 %v1563_v60, %v1106_v52  ;;  %v1109_v58 = vsub.f32 %v1566_v0, %v1106_v52 }
 0x58f   : > { %1376 = vrsqrt.f32 %v1048_v18  ;;  %vm1055_vm4 = vweird.f32 %v1048_v18 }
 0x590   : > { %v1110_v1 = vmul.f32 %v1107_v54, %v1532_v53  ;;  %v1111_v2 = vmul.f32 %v1108_v55, %v1534_v56  ;;  %v1112_v3 = vmul.f32 %v1109_v58, %v1536_v57 }
 0x592   : > { %v1113_v4 = vmul.f32 %v1110_v1, %v1110_v1  ;;  %v1114_v5 = vmul.f32 %v1111_v2, %v1111_v2  ;;  %v1115_v61 = vmul.f32 %v1112_v3, %v1112_v3 }
 0x594   : > { %v1119_v62 = vrot.slane %v1113_v4, 4  ;;  %v1120_v6 = vrot.slane %v1114_v5, 4  ;;  %v1121_v63 = vrot.slane %v1115_v61, 4 }
 0x595   : > { %v1377_v19 = vpop.eup %1376 }
 0x596   : > { %v1125_v7 = vsel %vm1005_vm1, %v1119_v62, 0.0  ;;  %v1126_v59 = vsel %vm1005_vm1, %v1120_v6, 0.0  ;;  %v1128_v0 = vsel %vm1009_vm2, %v1121_v63, 0.0  ;;  %v1050_v20 = vmul.f32 %v1377_v19, %v1048_v18 }
 0x597   : > { %v1127_v60 = vadd.f32 %v1126_v59, %v1125_v7  ;;  %vm1056_vm3 = vweird.f32 %v1377_v19 }
 0x598   : > { %v1051_v21 = vmul.f32 %v1377_v19, %v1050_v20  ;;  %vm1057_vm5 = vmor %vm1055_vm4, %vm1056_vm3 }
 0x599   : > { %v1129_v8 = vadd.f32 %v1128_v0, %v1127_v60 }
 0x59a   : > { %v1052_v23 = vmul.f32 0.5, %v1051_v21 }
 0x59b   : > { %1130 = vadd.xlane.f32.xlu1 %v1129_v8 }
 0x59c   : > { %v1053_v28 = vsub.f32 1.5, %v1052_v23 }
 0x59e   : > { %v1054_v29 = vmul.f32 %v1377_v19, %v1053_v28 }
 0x5a0   : > { %v1058_v32 = vsel %vm1057_vm5, %v1377_v19, %v1054_v29 }
 0x5a1   : > { %v1061_v34 = vmul.f32 %v1058_v32, %v1591_v26  ;;  %v1060_v36 = vmul.f32 %v1058_v32, %v1588_v25  ;;  %v1059_v26 = vmul.f32 %v1058_v32, %v1585_v24 }
 0x5a3   : > { %v1068_v41 = vmul.f32 %v1064_v37, %v1061_v34  ;;  %v1067_v42 = vmul.f32 %v1064_v37, %v1060_v36  ;;  %v1066_v4 = vmul.f32 %v1064_v37, %v1059_v26 }
 0x5b4   : > { %1070 = vperm.xlu1 %1366, %v1502_v48  }
 0x60e   : > { %v1131_v9 = vpop.xlane.xlu1 %1130 }
 0x60f   : > { %v1132_v10 = vrot.slane %v1131_v9, 4 }
 0x611   : > { %v1133_v11 = vadd.f32 %v1132_v10, %v1131_v9 }
 0x613   : > { %v1134_v12 = vrot.slane %v1133_v11, 2 }
 0x615   : > { %v1135_v13 = vadd.f32 %v1134_v12, %v1133_v11 }
 0x617   : > { %v1136_v14 = vrot.slane %v1135_v13, 1 }
 0x619   : > { %v1137_v15 = vadd.f32 %v1136_v14, %v1135_v13 }
 0x61b   : > { %1299 = vpush %v1137_v15 }
 0x626   : > { %v1071_v39 = vpop.permute.xlu1 %1070 }
 0x627   : > { %v1075_v44 = vadd.f32 %v1071_v39, %v1068_v41  ;;  %v1074_v49 = vadd.f32 %v1071_v39, %v1067_v42  ;;  %v1073_v6 = vadd.f32 %v1071_v39, %v1066_v4 }
 0x629   : > { %v1078_v52 = vmax.f32 %v1075_v44, 0.0  ;;  %v1077_v55 = vmax.f32 %v1074_v49, 0.0  ;;  %v1076_v60 = vmax.f32 %v1073_v6, 0.0 }
 0x62b   : > { %v1081_v63 = vmul.f32 %v1078_v52, %v1536_v57  ;;  %v1079_v8 = vmul.f32 %v1076_v60, %v1532_v53 }
 0x64c   : > { %s1300_s6 = spop %1299 }
 0x64d   : > { %v1139_v22 = vstv %s1300_s6 }
 0x64e   : > { %v1140_v27 = vmul.f32 0.0009765625, %v1139_v22 }
 0x650   : > { %v1141_v48 = vadd.f32 1e-05, %v1140_v27 }
 0x652   : > { %1378 = vrsqrt.f32 %v1141_v48  ;;  %vm1148_vm7 = vweird.f32 %v1141_v48 }
 0x658   : > { %v1379_v30 = vpop.eup %1378 }
 0x659   : > { %v1143_v31 = vmul.f32 %v1379_v30, %v1141_v48  ;;  %vm1149_vm6 = vweird.f32 %v1379_v30 }
 0x65a   : > { %vm1150_vm8 = vmor %vm1148_vm7, %vm1149_vm6 }
 0x65b   : > { %v1144_v33 = vmul.f32 %v1379_v30, %v1143_v31 }
 0x65d   : > { %v1145_v35 = vmul.f32 0.5, %v1144_v33 }
 0x65f   : > { %v1146_v38 = vsub.f32 1.5, %v1145_v35 }
 0x661   : > { %v1147_v40 = vmul.f32 %v1379_v30, %v1146_v38 }
 0x663   : > { %v1151_v43 = vsel %vm1150_vm8, %v1379_v30, %v1147_v40 }
 0x664   : > { %v1152_v45 = vmul.f32 %v1151_v43, %v1110_v1  ;;  %v1153_v46 = vmul.f32 %v1151_v43, %v1111_v2  ;;  %v1154_v47 = vmul.f32 %v1151_v43, %v1112_v3  ;;  %v1080_v2 = vmul.f32 %v1077_v55, %v1534_v56 }
 0x666   : > { %v1157_v50 = vmul.f32 %v1154_v47, %v1064_v37  ;;  %v1156_v51 = vmul.f32 %v1153_v46, %v1064_v37  ;;  %v1155_v25 = vmul.f32 %v1152_v45, %v1064_v37 }
 0x668   : > { %v1160_v54 = vadd.f32 %v1157_v50, %v1071_v39  ;;  %v1159_v58 = vadd.f32 %v1156_v51, %v1071_v39  ;;  %v1158_v62 = vadd.f32 %v1155_v25, %v1071_v39 }
 0x66a   : > { %v1163_v5 = vmax.f32 %v1160_v54, 0.0  ;;  %v1162_v61 = vmax.f32 %v1159_v58, 0.0  ;;  %v1161_v59 = vmax.f32 %v1158_v62, 0.0 }
 0x66c   : > { %v1166_v1 = vmul.f32 %v1163_v5, %v1536_v57  ;;  %v1165_v24 = vmul.f32 %v1162_v61, %v1534_v56  ;;  %v1164_v0 = vmul.f32 %v1161_v59, %v1532_v53 }
 0x66e   : > { %v1169_v3 = vsel %vm1005_vm1, %v1081_v63, %v1166_v1  ;;  %v1168_v7 = vsel %vm1005_vm1, %v1080_v2, %v1165_v24  ;;  %v1167_v57 = vsel %vm1005_vm1, %v1079_v8, %v1164_v0 }
 0x66f   : > { %1177 = vrot.lane.b32.xlu1 %v1169_v3, %s1401_s7  ;;  %1175 = vrot.lane.b32.xlu2 %v1168_v7, %s1401_s7 }
 0x677   : > { %1173 = vrot.lane.b32.xlu2 %v1167_v57, %s1401_s7 }
 0x6c9   : > { %v1176_v9 = vpop.permute.xlu2 %1175 }
 0x6d1   : > { %v1174_v56 = vpop.permute.xlu2 %1173 }
 0x6d2   : > { %v1180_v10 = vsel %vm1179_vm9, %v1174_v56, %v1176_v9  ;;  %v1185_v11 = vsel %vm1179_vm9, 0.0, %v1174_v56 }
 0x6d3   : > { %1188 = vst [vmem:[%s197_s10] sm:$0xff] %v1185_v11 }
 0x6d4   : > { %1189 = vst [vmem:[%s197_s10 + $0x8] sm:$0xff] %v1180_v10 }
 0x6e1   : > { %v1178_v12 = vpop.permute.xlu1 %1177 }
 0x6e2   : > { %v1181_v13 = vsel %vm1179_vm9, %v1176_v9, %v1178_v12 }
 0x6e3   : > { %v1187_v14 = vsel %vm1186_vm10, %v1181_v13, 0.0 }
 0x6e4   : > { %1190 = vst [vmem:[%s197_s10 + $0x10] sm:$0xff] %v1187_v14 }
 0x6e5 PF: > { %s14_s15 = sadd.s32 1, %s1386_s15  }
 0x6e6   : > { %p11_p4 = scmp.ge.s32.totalorder %s14_s15, 4  }
 0x6e8   :  { %13 = sbr.rel (!%p11_p4) target bundleno = 1 (0x1), region = 74 }

// kernel: decoder_block_forward.4
= control target key start
LH: loop header
LB: loop body
LE: loop exit
PB: predicated region body
PF: predicated region fallthrough
CT: control target
= control target key end

     0   :  { %s2384_s21 = smov 0   ;;  %s2813_s0 = inlined_call_operand.vmem [shape: f32[2,8,384], index: 0, kind: input, shape index: {}]   ;;  %s2814_s1 = inlined_call_operand.vmem [shape: f32[2,8,384], index: 1, kind: input, shape index: {}]   ;;  %s2815_s2 = inlined_call_operand.vmem [shape: f32[9,8,8], index: 2, kind: input, shape index: {}]   ;;  %s2816_s3 = inlined_call_operand.vmem [shape: f32[9,8,8], index: 3, kind: input, shape index: {}]   ;;  %s2817_s4 = inlined_call_operand.vmem [shape: f32[8,9], index: 4, kind: input, shape index: {}]   ;;  %s2818_s5 = inlined_call_operand.vmem [shape: f32[1,288], index: 5, kind: input, shape index: {}]   ;;  %s2819_s6 = inlined_call_operand.vmem [shape: f32[2,8,384], index: 6, kind: output, shape index: {}]  }
   0x1 LB: > { %s2103_s22 = sadd.s32 4294967295, %s2331_s21   ;;  %p2107_p0 = scmp.ge.s32.totalorder %s2331_s21, 1  ;;  %s2331_s21 = sphi %s2384_s21, %s16_s21  }
   0x2   : > { %p222_p1 = scmp.lt.s32.totalorder %s2331_s21, 3 }
   0x4   : > { %p223_p2 = pnand %p2107_p0, %p222_p1 }
   0x5   : > { %p257_p3 = scmp.lt.s32.totalorder (!%p223_p2), %s2103_s22, 1  ;;  %s2333_s8 = smov (!%p223_p2), 127  }
   0x6   : > { %226 = sbr.rel (%p223_p2) target bundleno = 2449 (0x991), region = 44  ;;  %s2334_s9 = smov (!%p223_p2), 126  }
   0x7   : > { %s2335_s10 = smov (!%p223_p2), 110   ;;  %s2337_s12 = smov (!%p223_p2), 108  }
   0x8   : > { %s2338_s13 = smov (!%p223_p2), 92   ;;  %s2339_s14 = smov (!%p223_p2), 109  }
   0x9   : > { %s2340_s15 = smov (!%p223_p2), 91   ;;  %s2342_s16 = smov (!%p223_p2), 90  }
   0xa   : > { %s2344_s20 = smov (!%p223_p2), 124  }
   0xb   : > { %s2821_s22 = smov (!%p257_p3, %s2103_s22), 1  ;;  %v2420_v18 = vld [vmem:[%s2817_s4] sm:$0xff]  ;;  %vm306_vm2 = vcmask 7168   ;;  %v2336_v34 = vmov 8.0   ;;  %v2341_v54 = vmov 1   ;;  %vm376_vm7 = vcmask 64512  }
   0xc   : > { %s2392_s23 = smul.u32 24, %s2821_s22  ;;  %344 = vrot.lane.b32.xlu2 %v2420_v18, %s2334_s9  ;;  %v358_v62 = vld [vmem:[%s2815_s2] sm:$0xff]  ;;  %vm370_vm8 = vcmask 1039360   ;;  %vm511_vm9 = vcmask 1031168   ;;  %vm751_vm10 = vcmask 883712   ;;  %vm591_vm11 = vcmask 900096  }
   0xd   : > { %2235 = vset.pattern.permute.xlu2 %v2341_v54  ;;  %vm831_vm12 = vcmask 752640   ;;  %vm671_vm13 = vcmask 891904   ;;  %vm991_vm14 = vcmask 736256   ;;  %vm911_vm15 = vcmask 744448  }
   0xe   : > { %s266_s26 = scalar_lea.vmem %s2814_s1, %s2392_s23  ;;  %s2402_s29 = scalar_lea.vmem %s2813_s0, %s2392_s23 }
   0xf   : > { %v2404_v0 = vld [vmem:[%s266_s26] sm:$0xff]  ;;  %v2406_v1 = vld [vmem:[%s266_s26 + $0x8] sm:$0xff]  ;;  %v2408_v2 = vld [vmem:[%s266_s26 + $0x10] sm:$0xff]  ;;  %s271_s25 = scalar_lea.vmem %s2819_s6, %s2392_s23 }
  0x10   : > { %v280_v3 = vmul.f32 %v2404_v0, %v2404_v0  ;;  %v281_v4 = vmul.f32 %v2406_v1, %v2406_v1  ;;  %v282_v5 = vmul.f32 %v2408_v2, %v2408_v2  ;;  %v272_v6 = vld [vmem:[%s2402_s29] sm:$0xff]  ;;  %v2430_v26 = vld [vmem:[%s2402_s29 + $0x10] sm:$0xff]  ;;  %v273_v41 = vld [vmem:[%s2402_s29 + $0x8] sm:$0xff] }
  0x11   : > { %458 = vmatpush.msra.mxu3 %v272_v6  ;;  %v2442_v44 = vpack.i.bf16 %v273_v41, %v272_v6  ;;  %v2111_v6 = vld [vmem:[%s2815_s2 + $0x8] sm:$0xff] }
  0x12   : > { %v283_v7 = vadd.f32 %v281_v4, %v280_v3  ;;  %2115 = vmatmul.msk.f32.vlgmr.msra.gmra.mxu3 %vm376_vm7, %v358_v62 }
  0x14   : > { %v284_v8 = vadd.f32 %v283_v7, %v282_v5  ;;  %2221 = vrot.lane.b32.xlu2 %v2442_v44, %s2333_s8 }
  0x16   : > { %285 = vadd.xlane.f32.xlu0 %v284_v8 }
  0x1c   : > { %368 = vrot.lane.b32.xlu2 %v2430_v26, %s2333_s8 }
  0x24   : > { %2226 = vrot.lane.b32.xlu2 %v2442_v44, %s2334_s9 }
  0x66   : > { %v2466_v56 = vpop.permute.xlu2 %344 }
  0x6e   : > { %v2222_v61 = vpop.permute.xlu2 %2221 }
  0x6f   : > { %v2224_v3 = vunpack.i.h.bf16 %v2222_v61  ;;  %v2223_v4 = vunpack.i.l.bf16 %v2222_v61 }
  0x71   : > { %v371_v7 = vsel %vm370_vm8, %v2223_v4, %v2224_v3 }
  0x72   : > { %395 = vmatpush.msra.mxu0 %v371_v7 }
  0x73   : > { %2112 = vmatmul.msk.f32.vlgmr.msra.gmra.mxu0 %vm376_vm7, %v2111_v6 }
  0x74   : > { %478 = vmatpush.msrb.mxu0 %v273_v41 }
  0x76   : > { %v369_v8 = vpop.permute.xlu2 %368 }
  0x77   : > { %435 = vmatpush.msra.mxu2 %v369_v8 }
  0x78   : > { %2114 = vmatmul.msk.f32.vlgmr.msra.gmra.mxu2 %vm376_vm7, %v2111_v6 }
  0x7b   : > { %2116 = vmatmul.msk.f32.vlgmr.msrb.gmra.mxu0 %vm376_vm7, %v358_v62 }
  0x89   : > { %v286_v9 = vpop.xlane.xlu0 %285 }
  0x8a   : > { %v287_v10 = vadd.f32 1e-05, %v286_v9 }
  0x8c   : > { %2306 = vrsqrt.f32 %v287_v10  ;;  %vm295_vm0 = vcmp.eq.f32.partialorder %v287_v10, inf  ;;  %v298_v19 = vand.u32 2147483648, %v287_v10  ;;  %vm297_vm1 = vcmp.eq.f32.partialorder %v287_v10, 0.0 }
  0x8d   : > { %2308 = vrcp.f32 %v2336_v34 }
  0x92   : > { %v2307_v11 = vpop.eup %2306 }
  0x93   : > { %v289_v12 = vmul.f32 %v2307_v11, %v287_v10  ;;  %v2309_v35 = vpop.eup %2308 }
  0x94   : > { %v319_v36 = vmul.f32 8.0, %v2309_v35  ;;  %vm323_vm3 = vweird.f32 %v2309_v35 }
  0x95   : > { %v290_v13 = vmul.f32 %v2307_v11, %v289_v12  ;;  %v2227_v12 = vpop.permute.xlu2 %2226 }
  0x96   : > { %v320_v37 = vsub.f32 1.0, %v319_v36 }
  0x97   : > { %v291_v14 = vmul.f32 0.5, %v290_v13 }
  0x98   : > { %v321_v38 = vmul.f32 %v2309_v35, %v320_v37 }
  0x99   : > { %v292_v15 = vsub.f32 1.5, %v291_v14  ;;  %v2229_v14 = vunpack.i.h.bf16 %v2227_v12 }
  0x9a   : > { %v322_v39 = vadd.f32 %v2309_v35, %v321_v38 }
  0x9b   : > { %v293_v16 = vmul.f32 %v2307_v11, %v292_v15  ;;  %v2228_v15 = vunpack.i.l.bf16 %v2227_v12 }
  0x9c   : > { %v2438_v40 = vsel %vm323_vm3, %v2309_v35, %v322_v39  ;;  %v2126_v35 = vld [vmem:[%s2815_s2 + $0x20] sm:$0xff] }
  0x9d   : > { %v294_v17 = vmul.f32 %v293_v16, %v287_v10 }
  0x9f   : > { %v296_v20 = vsel %vm295_vm0, %v287_v10, %v294_v17  ;;  %v372_v10 = vsel %vm370_vm8, %v2224_v3, %v369_v8  ;;  %v2149_v8 = vld [vmem:[%s2816_s3 + $0x8] sm:$0xff]  ;;  %vm1786_vm0 = vcmask 261120  }
  0xa0   : > { %v299_v21 = vsel %vm297_vm1, %v298_v19, %v296_v20  ;;  %415 = vmatpush.msra.mxu1 %v372_v10  ;;  %v2118_v20 = vld [vmem:[%s2815_s2 + $0x10] sm:$0xff] }
  0xa1   : > { %v2423_v22 = vmul.f32 %v299_v21, %v2420_v18  ;;  %2113 = vmatmul.msk.f32.vlgmr.msra.gmra.mxu1 %vm376_vm7, %v2111_v6  ;;  %v2153_v6 = vld [vmem:[%s2816_s3 + $0x10] sm:$0xff] }
  0xa2   : > { %498 = vmatpush.msrb.mxu1 %v2430_v26 }
  0xa3   : > { %v301_v23 = vmul.f32 %v2423_v22, %v2423_v22 }
  0xa5   : > { %303 = vrot.lane.b32.xlu0 %v301_v23, %s2333_s8 }
  0xa9   : > { %2117 = vmatmul.msk.f32.vlgmr.msrb.gmra.mxu1 %vm376_vm7, %v358_v62  ;;  %v2142_v62 = vld [vmem:[%s2815_s2 + $0x40] sm:$0xff] }
  0xad   : > { %509 = vrot.lane.b32.xlu0 %v2430_v26, %s2334_s9 }
  0xb5   : > { %589 = vrot.lane.b32.xlu0 %v2430_v26, %s2335_s10 }
  0xbd   : > { %2242 = vrot.lane.b32.xlu0 %v2442_v44, %s2337_s12 }
  0xc5   : > { %829 = vrot.lane.b32.xlu0 %v2430_v26, %s2338_s13 }
  0xcd   : > { %2257 = vrot.lane.b32.xlu0 %v2442_v44, %s2342_s16 }
 0x117   : > { %v304_v24 = vpop.permute.xlu0 %303 }
 0x118   : > { %v307_v25 = vsel %vm306_vm2, %v304_v24, 0.0 }
 0x119   : > { %308 = vadd.xlane.f32.xlu1 %v307_v25 }
 0x11f   : > { %v510_v63 = vpop.permute.xlu0 %509 }
 0x120   : > { %575 = vmatpush.msra.mxu0 %v510_v63  ;;  %v513_v21 = vsel %vm511_vm9, %v2229_v14, %v510_v63 }
 0x121   : > { %555 = vmatpush.msrb.mxu3 %v513_v21  ;;  %2121 = vmatmul.msk.f32.vlgmr.msra.gmra.mxu0 %vm376_vm7, %v2118_v20 }
 0x122   : > { %2120 = vmatmul.msk.f32.vlgmr.msrb.gmra.mxu3 %vm376_vm7, %v2118_v20 }
 0x127   : > { %v590_v9 = vpop.permute.xlu0 %589 }
 0x128   : > { %655 = vmatpush.msra.mxu3 %v590_v9 }
 0x12f   : > { %v2492_v13 = vpop.permute.xlu0 %2242 }
 0x130   : > { %v2245_v16 = vunpack.i.h.bf16 %v2492_v13  ;;  %v2244_v17 = vunpack.i.l.bf16 %v2492_v13 }
 0x132   : > { %v752_v24 = vsel %vm751_vm10, %v2244_v17, %v2245_v16 }
 0x133   : > { %775 = vmatpush.msrb.mxu3 %v752_v24 }
 0x18c   : > { %v309_v27 = vpop.xlane.xlu1 %308 }
 0x18d   : > { %v310_v28 = vrot.slane %v309_v27, 4 }
 0x18f   : > { %v311_v29 = vadd.f32 %v310_v28, %v309_v27  ;;  %v830_v28 = vpop.permute.xlu0 %829 }
 0x191   : > { %v312_v30 = vrot.slane %v311_v29, 2 }
 0x193   : > { %v313_v31 = vadd.f32 %v312_v30, %v311_v29  ;;  %v2122_v29 = vld [vmem:[%s2815_s2 + $0x18] sm:$0xff] }
 0x194   : > { %2125 = vmatmul.msk.f32.vlgmr.msra.gmra.mxu3 %vm376_vm7, %v2122_v29 }
 0x195   : > { %v314_v32 = vrot.slane %v313_v31, 1 }
 0x197   : > { %v315_v33 = vadd.f32 %v314_v32, %v313_v31  ;;  %v2130_v31 = vld [vmem:[%s2815_s2 + $0x28] sm:$0xff] }
 0x199   : > { %2184 = vpush %v315_v33  ;;  %v2531_v33 = vld [vmem:[%s2815_s2 + $0x30] sm:$0xff] }
 0x19c   : > { %2131 = vmatmul.msk.f32.vlgmr.msrb.gmra.mxu3 %vm376_vm7, %v2130_v31 }
 0x1ca   : > { %s2185_s11 = spop %2184 }
 0x1cb   : > { %v317_v42 = vstv %s2185_s11 }
 0x1cc   : > { %v325_v43 = vmul.f32 %v2438_v40, %v317_v42  ;;  %v2138_v42 = vld [vmem:[%s2815_s2 + $0x38] sm:$0xff] }
 0x1ce   : > { %v326_v45 = vadd.f32 1e-05, %v325_v43 }
 0x1d0   : > { %2310 = vrsqrt.f32 %v326_v45  ;;  %vm333_vm5 = vweird.f32 %v326_v45 }
 0x1d6   : > { %v2311_v46 = vpop.eup %2310 }
 0x1d7   : > { %v328_v47 = vmul.f32 %v2311_v46, %v326_v45  ;;  %vm334_vm4 = vweird.f32 %v2311_v46 }
 0x1d8   : > { %vm335_vm6 = vmor %vm333_vm5, %vm334_vm4 }
 0x1d9   : > { %v329_v48 = vmul.f32 %v2311_v46, %v328_v47 }
 0x1db   : > { %v330_v49 = vmul.f32 0.5, %v329_v48  ;;  %v1063_v48 = vld [vmem:[%s2816_s3] sm:$0xff] }
 0x1dd   : > { %v331_v50 = vsub.f32 1.5, %v330_v49 }
 0x1df   : > { %v332_v51 = vmul.f32 %v2311_v46, %v331_v50 }
 0x1e1   : > { %v336_v52 = vsel %vm335_vm6, %v2311_v46, %v332_v51  ;;  %v2258_v46 = vpop.permute.xlu0 %2257  ;;  %vm1850_vm6 = vcmask 1043456  }
 0x1e2   : > { %v337_v53 = vmul.f32 %v336_v52, %v2420_v18  ;;  %v2260_v50 = vunpack.i.h.bf16 %v2258_v46  ;;  %v2259_v51 = vunpack.i.l.bf16 %v2258_v46 }
 0x1e4   : > { %339 = vrot.lane.b32.xlu1 %v337_v53, %s2333_s8  ;;  %v992_v53 = vsel %vm991_vm14, %v2259_v51, %v2260_v50 }
 0x1ec   : > { %2231 = vrot.lane.b32.xlu1 %v2442_v44, %s2335_s10 }
 0x1f4   : > { %669 = vrot.lane.b32.xlu1 %v2430_v26, %s2339_s14 }
 0x1fc   : > { %2247 = vrot.lane.b32.xlu1 %v2442_v44, %s2338_s13 }
 0x204   : > { %909 = vrot.lane.b32.xlu1 %v2430_v26, %s2340_s15 }
 0x256   : > { %v340_v55 = vpop.permute.xlu1 %339 }
 0x257   : > { %v342_v57 = vmul.f32 %v340_v55, %v2423_v22  ;;  %v512_v22 = vsel %vm511_vm9, %v2228_v15, %v2229_v14 }
 0x258   : > { %535 = vmatpush.msrb.mxu2 %v512_v22 }
 0x259   : > { %v347_v58 = vadd.f32 %v2466_v56, %v342_v57  ;;  %2119 = vmatmul.msk.f32.vlgmr.msrb.gmra.mxu2 %vm376_vm7, %v2118_v20 }
 0x25b   : > { %2312 = vtanh.f32 %v347_v58 }
 0x25e   : > { %v2474_v5 = vpop.permute.xlu1 %2231 }
 0x25f   : > { %v2234_v19 = vunpack.i.h.bf16 %v2474_v5 }
 0x261   : > { %v2313_v59 = vpop.eup %2312  ;;  %v593_v23 = vsel %vm591_vm11, %v2234_v19, %v590_v9 }
 0x262   : > { %v349_v60 = vadd.f32 1.0, %v2313_v59  ;;  %635 = vmatpush.msra.mxu2 %v593_v23 }
 0x263   : > { %2124 = vmatmul.msk.f32.vlgmr.msra.gmra.mxu2 %vm376_vm7, %v2122_v29 }
 0x264   : > { %352 = vperm.xlu2 %2235, %v349_v60  }
 0x266   : > { %v2486_v11 = vpop.permute.xlu1 %669 }
 0x267   : > { %735 = vmatpush.msrb.mxu2 %v2486_v11 }
 0x26b   : > { %2129 = vmatmul.msk.f32.vlgmr.msrb.gmra.mxu2 %vm376_vm7, %v2126_v35 }
 0x26c   : > { %2237 = vrot.lane.b32.xlu2 %v2442_v44, %s2339_s14 }
 0x26e   : > { %v2248_v25 = vpop.permute.xlu1 %2247 }
 0x26f   : > { %v2250_v27 = vunpack.i.h.bf16 %v2248_v25 }
 0x271   : > { %v833_v30 = vsel %vm831_vm12, %v2250_v27, %v830_v28 }
 0x272   : > { %875 = vmatpush.msra.mxu3 %v833_v30 }
 0x273   : > { %2136 = vmatmul.msk.f32.vlgmr.msra.gmra.mxu3 %vm376_vm7, %v2531_v33 }
 0x274   : > { %749 = vrot.lane.b32.xlu2 %v2430_v26, %s2337_s12 }
 0x276   : > { %v2525_v32 = vpop.permute.xlu1 %909 }
 0x277   : > { %975 = vmatpush.msrb.mxu3 %v2525_v32 }
 0x27b   : > { %2141 = vmatmul.msk.f32.vlgmr.msrb.gmra.mxu3 %vm376_vm7, %v2138_v42 }
 0x27c   : > { %2252 = vrot.lane.b32.xlu2 %v2442_v44, %s2340_s15 }
 0x284   : > { %989 = vrot.lane.b32.xlu2 %v2430_v26, %s2342_s16  ;;  %v2233_v26 = vunpack.i.l.bf16 %v2474_v5 }
 0x286   : > { %v592_v34 = vsel %vm591_vm11, %v2233_v26, %v2234_v19 }
 0x287   : > { %615 = vmatpush.msra.mxu1 %v592_v34 }
 0x288   : > { %2123 = vmatmul.msk.f32.vlgmr.msra.gmra.mxu1 %vm376_vm7, %v2122_v29  ;;  %v417_v29 = vpop.f32.mrf.mxu1 }
 0x2be   : > { %v353_v36 = vpop.permute.xlu2 %352 }
 0x2bf   : > { %v355_v37 = vmul.f32 %v353_v36, %v2404_v0  ;;  %v356_v38 = vmul.f32 %v353_v36, %v2406_v1  ;;  %v2545_v39 = vmul.f32 %v353_v36, %v2408_v2  ;;  %v2249_v1 = vunpack.i.l.bf16 %v2248_v25 }
 0x2c1   : > { %1139 = vrot.lane.b32.xlu0 %v2545_v39, %s2333_s8  ;;  %1082 = vmatpush.msra.mxu3 %v355_v37  ;;  %v2266_v41 = vpack.i.bf16 %v356_v38, %v355_v37  ;;  %v832_v47 = vsel %vm831_vm12, %v2249_v1, %v2250_v27  ;;  %v2157_v27 = vld [vmem:[%s2816_s3 + $0x18] sm:$0xff]  ;;  %v2343_v37 = vmov 0  }
 0x2c2   : > { %855 = vmatpush.msra.mxu2 %v832_v47  ;;  %2146 = vmatmul.msk.f32.vlgmr.msra.gmra.mxu3 %vm376_vm7, %v1063_v48 }
 0x2c3   : > { %2267 = vrot.lane.b32.xlu2 %v2266_v41, %s2334_s9  ;;  %2262 = vrot.lane.b32.xlu1 %v2266_v41, %s2333_s8 }
 0x2c4   : > { %2135 = vmatmul.msk.f32.vlgmr.msra.gmra.mxu2 %vm376_vm7, %v2531_v33  ;;  %2301 = vset.pattern.permute.xlu0 %v2343_v37 }
 0x2c6   : > { %v2238_v0 = vpop.permute.xlu2 %2237 }
 0x2c7   : > { %v2240_v2 = vunpack.i.h.bf16 %v2238_v0  ;;  %v2239_v43 = vunpack.i.l.bf16 %v2238_v0  ;;  %v500_v0 = vpop.f32.mrf.mxu1 }
 0x2c9   : > { %2272 = vrot.lane.b32.xlu0 %v2266_v41, %s2335_s10  ;;  %v672_v44 = vsel %vm671_vm13, %v2239_v43, %v2240_v2  ;;  %v673_v45 = vsel %vm671_vm13, %v2240_v2, %v2486_v11 }
 0x2ca   : > { %695 = vmatpush.msrb.mxu0 %v672_v44  ;;  %715 = vmatpush.msrb.mxu1 %v673_v45 }
 0x2cb   : > { %1297 = vrot.lane.b32.xlu2 %v2545_v39, %s2335_s10  ;;  %1218 = vrot.lane.b32.xlu1 %v2545_v39, %s2334_s9 }
 0x2cc   : > { %2127 = vmatmul.msk.f32.vlgmr.msrb.gmra.mxu0 %vm376_vm7, %v2126_v35  ;;  %2128 = vmatmul.msk.f32.vlgmr.msrb.gmra.mxu1 %vm376_vm7, %v2126_v35 }
 0x2ce   : > { %v750_v49 = vpop.permute.xlu2 %749 }
 0x2cf   : > { %v753_v52 = vsel %vm751_vm10, %v2245_v16, %v750_v49  ;;  %815 = vmatpush.msra.mxu1 %v750_v49  ;;  %v397_v16 = vpop.f32.mrf.mxu0 }
 0x2d0   : > { %795 = vmatpush.msra.mxu0 %v753_v52 }
 0x2d1   : > { %1376 = vrot.lane.b32.xlu0 %v2545_v39, %s2339_s14 }
 0x2d2   : > { %895 = vmatpush.msrb.mxu0 %v830_v28 }
 0x2d3   : > { %2282 = vrot.lane.b32.xlu2 %v2266_v41, %s2337_s12  ;;  %2277 = vrot.lane.b32.xlu1 %v2266_v41, %s2339_s14 }
 0x2d4   : > { %2132 = vmatmul.msk.f32.vlgmr.msra.gmra.mxu0 %vm376_vm7, %v2130_v31  ;;  %2133 = vmatmul.msk.f32.vlgmr.msra.gmra.mxu1 %vm376_vm7, %v2130_v31 }
 0x2d5   : > { %1015 = vmatpush.msra.mxu0 %v992_v53 }
 0x2d6   : > { %v2253_v54 = vpop.permute.xlu2 %2252 }
 0x2d7   : > { %v2255_v55 = vunpack.i.h.bf16 %v2253_v54  ;;  %v2254_v57 = vunpack.i.l.bf16 %v2253_v54  ;;  %v2165_v54 = vld [vmem:[%s2816_s3 + $0x28] sm:$0xff] }
 0x2d9   : > { %2287 = vrot.lane.b32.xlu0 %v2266_v41, %s2338_s13  ;;  %v912_v58 = vsel %vm911_vm15, %v2254_v57, %v2255_v55  ;;  %v913_v59 = vsel %vm911_vm15, %v2255_v55, %v2525_v32  ;;  %v460_v32 = vpop.f32.mrf.mxu3  ;;  %v2169_v55 = vld [vmem:[%s2816_s3 + $0x30] sm:$0xff] }
 0x2da   : > { %935 = vmatpush.msrb.mxu1 %v912_v58  ;;  %955 = vmatpush.msrb.mxu2 %v913_v59  ;;  %v2638_v34 = vadd.f32 %v460_v32, %v397_v16 }
 0x2db   : > { %1534 = vrot.lane.b32.xlu2 %v2545_v39, %s2338_s13  ;;  %1455 = vrot.lane.b32.xlu1 %v2545_v39, %s2337_s12 }
 0x2dc   : > { %2137 = vmatmul.msk.f32.vlgmr.msrb.gmra.mxu0 %vm376_vm7, %v2531_v33  ;;  %2139 = vmatmul.msk.f32.vlgmr.msrb.gmra.mxu1 %vm376_vm7, %v2138_v42  ;;  %v480_v33 = vpop.f32.mrf.mxu0 }
 0x2dd   : > { %1102 = vmatpush.msrb.mxu0 %v356_v38  ;;  %2140 = vmatmul.msk.f32.vlgmr.msrb.gmra.mxu2 %vm376_vm7, %v2138_v42  ;;  %v2640_v35 = vadd.f32 %v480_v33, %v417_v29  ;;  %v437_v42 = vpop.f32.mrf.mxu2 }
 0x2de   : > { %v990_v60 = vpop.permute.xlu2 %989  ;;  %v2648_v43 = vadd.f32 %v500_v0, %v437_v42 }
 0x2df   : > { %v993_v61 = vsel %vm991_vm14, %v2260_v50, %v990_v60  ;;  %1055 = vmatpush.msra.mxu2 %v990_v60 }
 0x2e0   : > { %1035 = vmatpush.msra.mxu1 %v993_v61 }
 0x2e1   : > { %1613 = vrot.lane.b32.xlu0 %v2545_v39, %s2340_s15 }
 0x2e2   : > { %1122 = vmatpush.msrb.mxu1 %v2545_v39 }
 0x2e3   : > { %2297 = vrot.lane.b32.xlu2 %v2266_v41, %s2342_s16  ;;  %2292 = vrot.lane.b32.xlu1 %v2266_v41, %s2340_s15  ;;  %v2161_v41 = vld [vmem:[%s2816_s3 + $0x20] sm:$0xff] }
 0x2e4   : > { %2143 = vmatmul.msk.f32.vlgmr.msra.gmra.mxu0 %vm376_vm7, %v2142_v62  ;;  %2144 = vmatmul.msk.f32.vlgmr.msra.gmra.mxu1 %vm376_vm7, %v2142_v62 }
 0x2e5   : > { %2145 = vmatmul.msk.f32.vlgmr.msra.gmra.mxu2 %vm376_vm7, %v2142_v62 }
 0x2e9   : > { %1766 = vperm.xlu0 %2301, %v2420_v18  }
 0x2eb   : > { %1692 = vrot.lane.b32.xlu1 %v2545_v39, %s2342_s16  ;;  %s2348_s16 = smov 19  }
 0x2ec   : > { %2147 = vmatmul.msk.f32.vlgmr.msrb.gmra.mxu0 %vm376_vm7, %v1063_v48  ;;  %2148 = vmatmul.msk.f32.vlgmr.msrb.gmra.mxu1 %vm376_vm7, %v1063_v48 }
 0x31d   : > { %v2268_v63 = vpop.permute.xlu2 %2267 }
 0x31e   : > { %v2270_v3 = vunpack.i.h.bf16 %v2268_v63  ;;  %v2269_v4 = vunpack.i.l.bf16 %v2268_v63 }
 0x320   : > { %v1220_v5 = vsel %vm511_vm9, %v2269_v4, %v2270_v3 }
 0x321   : > { %1243 = vmatpush.msra.mxu1 %v1220_v5 }
 0x322   : > { %2154 = vmatmul.msk.f32.vlgmr.msra.gmra.mxu1 %vm376_vm7, %v2153_v6 }
 0x325   : > { %v1298_v7 = vpop.permute.xlu2 %1297 }
 0x32d   : > { %v2619_v11 = vpop.permute.xlu2 %2282 }
 0x32e   : > { %v2285_v22 = vunpack.i.h.bf16 %v2619_v11  ;;  %v2284_v23 = vunpack.i.l.bf16 %v2619_v11 }
 0x330   : > { %v1457_v31 = vsel %vm751_vm10, %v2284_v23, %v2285_v22 }
 0x333   : > { %v1140_v9 = vpop.permute.xlu0 %1139 }
 0x334   : > { %1204 = vmatpush.msra.mxu0 %v1140_v9 }
 0x335   : > { %v2263_v10 = vpop.permute.xlu1 %2262  ;;  %2152 = vmatmul.msk.f32.vlgmr.msra.gmra.mxu0 %vm376_vm7, %v2149_v8  ;;  %v1535_v30 = vpop.permute.xlu2 %1534 }
 0x336   : > { %v2265_v12 = vunpack.i.h.bf16 %v2263_v10  ;;  %v2264_v13 = vunpack.i.l.bf16 %v2263_v10  ;;  %v537_v10 = vpop.f32.mrf.mxu2 }
 0x337   : > { %v580_v32 = vadd.f32 %v537_v10, %v2638_v34 }
 0x338   : > { %v1141_v14 = vsel %vm370_vm8, %v2264_v13, %v2265_v12  ;;  %v1142_v15 = vsel %vm370_vm8, %v2265_v12, %v1140_v9  ;;  %v557_v9 = vpop.f32.mrf.mxu3 }
 0x339   : > { %1164 = vmatpush.msrb.mxu2 %v1141_v14  ;;  %1184 = vmatpush.msrb.mxu3 %v1142_v15 }
 0x33a   : > { %2150 = vmatmul.msk.f32.vlgmr.msrb.gmra.mxu2 %vm376_vm7, %v2149_v8  ;;  %2151 = vmatmul.msk.f32.vlgmr.msrb.gmra.mxu3 %vm376_vm7, %v2149_v8  ;;  %v577_v8 = vpop.f32.mrf.mxu0 }
 0x33b   : > { %v2273_v17 = vpop.permute.xlu0 %2272 }
 0x33c   : > { %v2275_v19 = vunpack.i.h.bf16 %v2273_v17  ;;  %v2274_v20 = vunpack.i.l.bf16 %v2273_v17 }
 0x33d   : > { %v1219_v21 = vpop.permute.xlu1 %1218  ;;  %v2298_v44 = vpop.permute.xlu2 %2297 }
 0x33e   : > { %v1221_v24 = vsel %vm511_vm9, %v2270_v3, %v1219_v21  ;;  %1283 = vmatpush.msra.mxu3 %v1219_v21  ;;  %v1299_v25 = vsel %vm591_vm11, %v2274_v20, %v2275_v19  ;;  %v1300_v28 = vsel %vm591_vm11, %v2275_v19, %v1298_v7  ;;  %v2300_v48 = vunpack.i.h.bf16 %v2298_v44  ;;  %v2173_v3 = vld [vmem:[%s2816_s3 + $0x38] sm:$0xff]  ;;  %v637_v14 = vpop.f32.mrf.mxu2 }
 0x33f   : > { %1263 = vmatpush.msra.mxu2 %v1221_v24  ;;  %1322 = vmatpush.msrb.mxu0 %v1299_v25  ;;  %v2299_v50 = vunpack.i.l.bf16 %v2298_v44 }
 0x340   : > { %1342 = vmatpush.msrb.mxu1 %v1300_v28  ;;  %2158 = vmatmul.msk.f32.vlgmr.msrb.gmra.mxu0 %vm376_vm7, %v2157_v27  ;;  %v657_v13 = vpop.f32.mrf.mxu3 }
 0x341   : > { %1362 = vmatpush.msrb.mxu2 %v1298_v7  ;;  %2159 = vmatmul.msk.f32.vlgmr.msrb.gmra.mxu1 %vm376_vm7, %v2157_v27  ;;  %v1694_v57 = vsel %vm991_vm14, %v2299_v50, %v2300_v48  ;;  %v617_v7 = vpop.f32.mrf.mxu1 }
 0x342   : > { %2155 = vmatmul.msk.f32.vlgmr.msra.gmra.mxu2 %vm376_vm7, %v2153_v6  ;;  %2156 = vmatmul.msk.f32.vlgmr.msra.gmra.mxu3 %vm376_vm7, %v2153_v6  ;;  %v2177_v6 = vld [vmem:[%s2816_s3 + $0x40] sm:$0xff]  ;;  %v660_v37 = vadd.f32 %v617_v7, %v580_v32 }
 0x343   : > { %1480 = vmatpush.msra.mxu2 %v1457_v31  ;;  %v1377_v26 = vpop.permute.xlu0 %1376  ;;  %v581_v31 = vadd.f32 %v557_v9, %v2640_v35 }
 0x344   : > { %1441 = vmatpush.msra.mxu1 %v1377_v26 }
 0x345   : > { %v2278_v36 = vpop.permute.xlu1 %2277 }
 0x346   : > { %v2280_v38 = vunpack.i.h.bf16 %v2278_v36  ;;  %v2279_v39 = vunpack.i.l.bf16 %v2278_v36  ;;  %v737_v19 = vpop.f32.mrf.mxu2 }
 0x348   : > { %v1378_v1 = vsel %vm671_vm13, %v2279_v39, %v2280_v38  ;;  %v1379_v2 = vsel %vm671_vm13, %v2280_v38, %v1377_v26  ;;  %v777_v17 = vpop.f32.mrf.mxu3  ;;  %v661_v38 = vadd.f32 %v637_v14, %v581_v31 }
 0x349   : > { %1401 = vmatpush.msrb.mxu3 %v1378_v1  ;;  %1421 = vmatpush.msra.mxu0 %v1379_v2  ;;  %v717_v11 = vpop.f32.mrf.mxu1  ;;  %v697_v12 = vpop.f32.mrf.mxu0 }
 0x34a   : > { %2160 = vmatmul.msk.f32.vlgmr.msrb.gmra.mxu2 %vm376_vm7, %v2157_v27  ;;  %2162 = vmatmul.msk.f32.vlgmr.msrb.gmra.mxu3 %vm376_vm7, %v2161_v41  ;;  %v740_v42 = vadd.f32 %v697_v12, %v660_v37  ;;  %v741_v0 = vadd.f32 %v717_v11, %v661_v38 }
 0x34b   : > { %v2288_v45 = vpop.permute.xlu0 %2287  ;;  %2163 = vmatmul.msk.f32.vlgmr.msra.gmra.mxu0 %vm376_vm7, %v2161_v41  ;;  %2164 = vmatmul.msk.f32.vlgmr.msra.gmra.mxu1 %vm376_vm7, %v2161_v41  ;;  %v582_v41 = vadd.f32 %v577_v8, %v2648_v43 }
 0x34c   : > { %v2290_v46 = vunpack.i.h.bf16 %v2288_v45  ;;  %v2289_v47 = vunpack.i.l.bf16 %v2288_v45  ;;  %v820_v45 = vadd.f32 %v777_v17, %v740_v42 }
 0x34d   : > { %v1456_v49 = vpop.permute.xlu1 %1455  ;;  %v662_v1 = vadd.f32 %v657_v13, %v582_v41 }
 0x34e   : > { %v1458_v51 = vsel %vm751_vm10, %v2285_v22, %v1456_v49  ;;  %1520 = vmatpush.msrb.mxu0 %v1456_v49  ;;  %v1536_v52 = vsel %vm831_vm12, %v2289_v47, %v2290_v46  ;;  %v1537_v53 = vsel %vm831_vm12, %v2290_v46, %v1535_v30  ;;  %v857_v23 = vpop.f32.mrf.mxu2 }
 0x34f   : > { %1500 = vmatpush.msra.mxu3 %v1458_v51  ;;  %1559 = vmatpush.msrb.mxu1 %v1536_v52  ;;  %v742_v35 = vadd.f32 %v737_v19, %v662_v1  ;;  %v900_v34 = vadd.f32 %v857_v23, %v820_v45 }
 0x350   : > { %1579 = vmatpush.msrb.mxu2 %v1537_v53  ;;  %v877_v22 = vpop.f32.mrf.mxu3 }
 0x351   : > { %1599 = vmatpush.msrb.mxu3 %v1535_v30  ;;  %v817_v15 = vpop.f32.mrf.mxu1  ;;  %v797_v16 = vpop.f32.mrf.mxu0 }
 0x352   : > { %2166 = vmatmul.msk.f32.vlgmr.msra.gmra.mxu2 %vm376_vm7, %v2165_v54  ;;  %2167 = vmatmul.msk.f32.vlgmr.msra.gmra.mxu3 %vm376_vm7, %v2165_v54  ;;  %v821_v46 = vadd.f32 %v797_v16, %v741_v0  ;;  %v822_v50 = vadd.f32 %v817_v15, %v742_v35 }
 0x353   : > { %1717 = vmatpush.msra.mxu3 %v1694_v57  ;;  %v1614_v58 = vpop.permute.xlu0 %1613  ;;  %2168 = vmatmul.msk.f32.vlgmr.msrb.gmra.mxu0 %vm376_vm7, %v2165_v54 }
 0x354   : > { %1678 = vmatpush.msra.mxu2 %v1614_v58  ;;  %2170 = vmatmul.msk.f32.vlgmr.msrb.gmra.mxu1 %vm376_vm7, %v2169_v55  ;;  %v901_v49 = vadd.f32 %v877_v22, %v821_v46 }
 0x355   : > { %v2293_v59 = vpop.permute.xlu1 %2292 }
 0x356   : > { %v2295_v60 = vunpack.i.h.bf16 %v2293_v59  ;;  %v2294_v61 = vunpack.i.l.bf16 %v2293_v59 }
 0x358   : > { %v1615_v62 = vsel %vm911_vm15, %v2294_v61, %v2295_v60  ;;  %v1616_v63 = vsel %vm911_vm15, %v2295_v60, %v1614_v58  ;;  %v977_v27 = vpop.f32.mrf.mxu3  ;;  %vm2031_vm15 = vcmask 416768  }
 0x359   : > { %1638 = vmatpush.msra.mxu0 %v1615_v62  ;;  %1658 = vmatpush.msra.mxu1 %v1616_v63  ;;  %v937_v20 = vpop.f32.mrf.mxu1  ;;  %v897_v21 = vpop.f32.mrf.mxu0 }
 0x35a   : > { %2171 = vmatmul.msk.f32.vlgmr.msrb.gmra.mxu2 %vm376_vm7, %v2169_v55  ;;  %2172 = vmatmul.msk.f32.vlgmr.msrb.gmra.mxu3 %vm376_vm7, %v2169_v55  ;;  %v980_v53 = vadd.f32 %v937_v20, %v900_v34  ;;  %v902_v55 = vadd.f32 %v897_v21, %v822_v50 }
 0x35b   : > { %2174 = vmatmul.msk.f32.vlgmr.msra.gmra.mxu0 %vm376_vm7, %v2173_v3 }
 0x35c   : > { %2175 = vmatmul.msk.f32.vlgmr.msra.gmra.mxu1 %vm376_vm7, %v2173_v3  ;;  %v982_v60 = vadd.f32 %v977_v27, %v902_v55 }
 0x35d   : > { %v1693_v4 = vpop.permute.xlu1 %1692 }
 0x35e   : > { %v1695_v5 = vsel %vm991_vm14, %v2300_v48, %v1693_v4  ;;  %1757 = vmatpush.msrb.mxu1 %v1693_v4  ;;  %vm2024_vm14 = vcmask 154624  }
 0x35f   : > { %1737 = vmatpush.msrb.mxu0 %v1695_v5 }
 0x360   : > { %v957_v28 = vpop.f32.mrf.mxu2  ;;  %v1084_v26 = vpop.f32.mrf.mxu3 }
 0x361   : > { %v1037_v24 = vpop.f32.mrf.mxu1  ;;  %v1017_v25 = vpop.f32.mrf.mxu0  ;;  %v981_v54 = vadd.f32 %v957_v28, %v901_v49 }
 0x362   : > { %2176 = vmatmul.msk.f32.vlgmr.msra.gmra.mxu2 %vm376_vm7, %v2173_v3  ;;  %2178 = vmatmul.msk.f32.vlgmr.msra.gmra.mxu3 %vm376_vm7, %v2177_v6  ;;  %v1060_v58 = vadd.f32 %v1017_v25, %v980_v53 }
 0x363   : > { %2179 = vmatmul.msk.f32.vlgmr.msrb.gmra.mxu0 %vm376_vm7, %v2177_v6  ;;  %v1061_v59 = vadd.f32 %v1037_v24, %v981_v54 }
 0x364   : > { %2180 = vmatmul.msk.f32.vlgmr.msrb.gmra.mxu1 %vm376_vm7, %v2177_v6  ;;  %v1127_v63 = vadd.f32 %v1084_v26, %v1060_v58  ;;  %v278_v26 = vld [vmem:[%s2818_s5] sm:$0x7]  ;;  %vm1854_vm7 = vcmask 257024  }
 0x365   : > { %v2691_v42 = vperm.slane %v278_v26, 1  ;;  %v2698_v34 = vperm.slane %v278_v26, 2 }
 0x368   : > { %v1057_v36 = vpop.f32.mrf.mxu2 }
 0x369   : > { %v1124_v29 = vpop.f32.mrf.mxu1  ;;  %v1104_v30 = vpop.f32.mrf.mxu0  ;;  %v1062_v4 = vadd.f32 %v1057_v36, %v982_v60 }
 0x36a   : > { %v1128_v3 = vadd.f32 %v1104_v30, %v1061_v59  ;;  %v1767_v36 = vpop.permute.xlu0 %1766 }
 0x36b   : > { %v1129_v10 = vadd.f32 %v1124_v29, %v1062_v4 }
 0x39f   : > { %v1245_v33 = vpop.f32.mrf.mxu1 }
 0x3b2   : > { %v1206_v39 = vpop.f32.mrf.mxu0 }
 0x3b3   : > { %v1211_v14 = vadd.f32 %v1206_v39, %v1129_v10 }
 0x3bd   : > { %v1166_v2 = vpop.f32.mrf.mxu2  ;;  %v1186_v44 = vpop.f32.mrf.mxu3 }
 0x3be   : > { %v1324_v47 = vpop.f32.mrf.mxu0  ;;  %v1344_v48 = vpop.f32.mrf.mxu1  ;;  %v1209_v5 = vadd.f32 %v1166_v2, %v1127_v63  ;;  %v1210_v6 = vadd.f32 %v1186_v44, %v1128_v3 }
 0x3c0   : > { %v1288_v11 = vadd.f32 %v1245_v33, %v1209_v5 }
 0x3c2   : > { %v1367_v16 = vadd.f32 %v1324_v47, %v1288_v11  ;;  %v2693_v47 = vperm.slane %v278_v26, 0 }
 0x3c5   : > { %v1265_v51 = vpop.f32.mrf.mxu2  ;;  %v1285_v52 = vpop.f32.mrf.mxu3 }
 0x3c6   : > { %v1289_v9 = vadd.f32 %v1265_v51, %v1210_v6  ;;  %v1290_v17 = vadd.f32 %v1285_v52, %v1211_v14 }
 0x3c8   : > { %v1423_v57 = vpop.f32.mrf.mxu0  ;;  %v1443_v43 = vpop.f32.mrf.mxu1  ;;  %v1368_v15 = vadd.f32 %v1344_v48, %v1289_v9 }
 0x3ca   : > { %v1447_v20 = vadd.f32 %v1423_v57, %v1368_v15 }
 0x3cd   : > { %v1364_v61 = vpop.f32.mrf.mxu2  ;;  %v1403_v62 = vpop.f32.mrf.mxu3 }
 0x3ce   : > { %v1369_v21 = vadd.f32 %v1364_v61, %v1290_v17  ;;  %v1446_v22 = vadd.f32 %v1403_v62, %v1367_v16 }
 0x3d0   : > { %v1522_v7 = vpop.f32.mrf.mxu0  ;;  %v1448_v30 = vadd.f32 %v1443_v43, %v1369_v21 }
 0x3d1   : > { %v1561_v8 = vpop.f32.mrf.mxu1 }
 0x3d2   : > { %v1527_v37 = vadd.f32 %v1522_v7, %v1448_v30 }
 0x3d5   : > { %v1482_v12 = vpop.f32.mrf.mxu2  ;;  %v1502_v13 = vpop.f32.mrf.mxu3 }
 0x3d6   : > { %v1525_v24 = vadd.f32 %v1482_v12, %v1446_v22  ;;  %v1526_v25 = vadd.f32 %v1502_v13, %v1447_v20 }
 0x3d8   : > { %v1640_v19 = vpop.f32.mrf.mxu0  ;;  %v1604_v32 = vadd.f32 %v1561_v8, %v1525_v24 }
 0x3d9   : > { %v1660_v23 = vpop.f32.mrf.mxu1 }
 0x3da   : > { %v1683_v39 = vadd.f32 %v1640_v19, %v1604_v32 }
 0x3dd   : > { %v1581_v27 = vpop.f32.mrf.mxu2  ;;  %v1601_v28 = vpop.f32.mrf.mxu3 }
 0x3de   : > { %v1605_v31 = vadd.f32 %v1581_v27, %v1526_v25  ;;  %v1606_v41 = vadd.f32 %v1601_v28, %v1527_v37 }
 0x3e0   : > { %v1684_v29 = vadd.f32 %v1660_v23, %v1605_v31  ;;  %v1739_v33 = vpop.f32.mrf.mxu0 }
 0x3e1   : > { %v1759_v1 = vpop.f32.mrf.mxu1 }
 0x3e2   : > { %v1763_v38 = vadd.f32 %v1739_v33, %v1684_v29  ;;  %v2718_v29 = vld [vmem:[%s2817_s4] sm:$0xff] }
 0x3e4   : > { %v1770_v0 = vadd.f32 %v1767_v36, %v1763_v38 }
 0x3e5   : > { %v1680_v2 = vpop.f32.mrf.mxu2  ;;  %v1719_v44 = vpop.f32.mrf.mxu3 }
 0x3e6   : > { %v1685_v45 = vadd.f32 %v1680_v2, %v1606_v41  ;;  %v1762_v46 = vadd.f32 %v1719_v44, %v1683_v39  ;;  %v2696_v48 = vmul.f32 %v2691_v42, %v1770_v0 }
 0x3e8   : > { %v1769_v35 = vadd.f32 %v1767_v36, %v1762_v46  ;;  %v1764_v49 = vadd.f32 %v1759_v1, %v1685_v45  ;;  %v1783_v54 = vmul.f32 %v2696_v48, %v2696_v48 }
 0x3ea   : > { %v2701_v50 = vmul.f32 %v2693_v47, %v1769_v35  ;;  %v1771_v51 = vadd.f32 %v1767_v36, %v1764_v49 }
 0x3ec   : > { %v2704_v52 = vmul.f32 %v2698_v34, %v1771_v51  ;;  %v1782_v53 = vmul.f32 %v2701_v50, %v2701_v50 }
 0x3ee   : > { %v1784_v55 = vmul.f32 %v2704_v52, %v2704_v52  ;;  %v1785_v57 = vadd.f32 %v1783_v54, %v1782_v53 }
 0x3f0   : > { %v1787_v43 = vsel %vm1786_vm0, %v1784_v55, 0.0  ;;  %v2346_v55 = vmov 7  }
 0x3f1   : > { %v1788_v58 = vadd.f32 %v1787_v43, %v1785_v57  ;;  %2303 = vset.pattern.permute.xlu2 %v2346_v55 }
 0x3f3   : > { %1789 = vadd.xlane.f32.xlu2 %v1788_v58 }
 0x466   : > { %v1790_v59 = vpop.xlane.xlu2 %1789 }
 0x467   : > { %v1791_v60 = vadd.f32 1e-05, %v1790_v59 }
 0x469   : > { %2314 = vrsqrt.f32 %v1791_v60  ;;  %vm1799_vm1 = vcmp.eq.f32.partialorder %v1791_v60, inf  ;;  %v1802_v7 = vand.u32 2147483648, %v1791_v60  ;;  %vm1801_vm3 = vcmp.eq.f32.partialorder %v1791_v60, 0.0 }
 0x46f   : > { %v2315_v61 = vpop.eup %2314 }
 0x470   : > { %v1793_v62 = vmul.f32 %v2315_v61, %v1791_v60 }
 0x472   : > { %v1794_v63 = vmul.f32 %v2315_v61, %v1793_v62 }
 0x474   : > { %v1795_v3 = vmul.f32 0.5, %v1794_v63 }
 0x476   : > { %v1796_v4 = vsub.f32 1.5, %v1795_v3 }
 0x478   : > { %v1797_v5 = vmul.f32 %v2315_v61, %v1796_v4 }
 0x47a   : > { %v1798_v6 = vmul.f32 %v1797_v5, %v1791_v60 }
 0x47c   : > { %v1800_v8 = vsel %vm1799_vm1, %v1791_v60, %v1798_v6 }
 0x47d   : > { %v1803_v9 = vsel %vm1801_vm3, %v1802_v7, %v1800_v8 }
 0x47e   : > { %v1804_v10 = vmul.f32 %v1803_v9, %v2420_v18 }
 0x480   : > { %v1805_v11 = vmul.f32 %v1804_v10, %v1804_v10 }
 0x482   : > { %1807 = vrot.lane.b32.xlu1 %v1805_v11, %s2344_s20 }
 0x4f4   : > { %v1808_v12 = vpop.permute.xlu1 %1807 }
 0x4f5   : > { %v1810_v13 = vsel %vm306_vm2, %v1808_v12, 0.0 }
 0x4f6   : > { %1811 = vadd.xlane.f32.xlu1 %v1810_v13 }
 0x569   : > { %v1812_v14 = vpop.xlane.xlu1 %1811 }
 0x56a   : > { %v1813_v15 = vrot.slane %v1812_v14, 4 }
 0x56c   : > { %v1814_v16 = vadd.f32 %v1813_v15, %v1812_v14 }
 0x56e   : > { %v1815_v17 = vrot.slane %v1814_v16, 2 }
 0x570   : > { %v1816_v19 = vadd.f32 %v1815_v17, %v1814_v16 }
 0x572   : > { %v1817_v20 = vrot.slane %v1816_v19, 1 }
 0x574   : > { %v1818_v21 = vadd.f32 %v1817_v20, %v1816_v19 }
 0x576   : > { %2186 = vpush %v1818_v21 }
 0x5a7   : > { %s2187_s9 = spop %2186 }
 0x5a8   : > { %v1820_v22 = vstv %s2187_s9 }
 0x5a9   : > { %v1821_v23 = vmul.f32 %v1820_v22, %v2438_v40  ;;  %v2345_v40 = vmov 4  }
 0x5aa   : > { %2302 = vset.pattern.permute.xlu0 %v2345_v40 }
 0x5ab   : > { %v1822_v18 = vadd.f32 1e-05, %v1821_v23 }
 0x5ad   : > { %2316 = vrsqrt.f32 %v1822_v18  ;;  %vm1829_vm4 = vweird.f32 %v1822_v18 }
 0x5b3   : > { %v2317_v24 = vpop.eup %2316 }
 0x5b4   : > { %v1824_v25 = vmul.f32 %v2317_v24, %v1822_v18  ;;  %vm1830_vm2 = vweird.f32 %v2317_v24 }
 0x5b5   : > { %vm1831_vm5 = vmor %vm1829_vm4, %vm1830_vm2 }
 0x5b6   : > { %v1825_v27 = vmul.f32 %v2317_v24, %v1824_v25 }
 0x5b8   : > { %v1826_v28 = vmul.f32 0.5, %v1825_v27 }
 0x5ba   : > { %v1827_v30 = vsub.f32 1.5, %v1826_v28 }
 0x5bc   : > { %v1828_v31 = vmul.f32 %v2317_v24, %v1827_v30 }
 0x5be   : > { %v1832_v32 = vsel %vm1831_vm5, %v2317_v24, %v1828_v31 }
 0x5bf   : > { %v1833_v33 = vmul.f32 %v2718_v29, %v1832_v32 }
 0x5c1   : > { %1835 = vrot.lane.b32.xlu0 %v1833_v33, %s2333_s8 }
 0x633   : > { %v1836_v26 = vpop.permute.xlu0 %1835 }
 0x634   : > { %v1838_v36 = vmul.f32 %v1836_v26, %v1804_v10  ;;  %v2347_v26 = vmov 8  }
 0x635   : > { %2304 = vset.pattern.permute.xlu1 %v2347_v26 }
 0x636   : > { %v1839_v37 = vadd.f32 %v1838_v36, %v2466_v56 }
 0x638   : > { %2318 = vtanh.f32 %v1839_v37 }
 0x63e   : > { %v2319_v38 = vpop.eup %2318 }
 0x63f   : > { %v1841_v39 = vadd.f32 1.0, %v2319_v38 }
 0x641   : > { %1844 = vperm.xlu0 %2302, %v1841_v39  }
 0x649   : > { %2305 = vset.pattern.permute.xlu0 %v2347_v26 }
 0x6b3   : > { %v1845_v41 = vpop.permute.xlu0 %1844 }
 0x6b4   : > { %v2724_v0 = vmul.f32 %v1845_v41, %v2701_v50  ;;  %v2727_v1 = vmul.f32 %v1845_v41, %v2696_v48  ;;  %v2730_v2 = vmul.f32 %v1845_v41, %v2704_v52 }
 0x6b6   : > { %v1851_v44 = vsel %vm1850_vm6, %v2724_v0, 0.0  ;;  %v1852_v56 = vsel %vm1850_vm6, %v2727_v1, 0.0  ;;  %v1855_v46 = vsel %vm1854_vm7, %v2730_v2, 0.0  ;;  %v1930_v8 = vrot.slane %v2724_v0, 4 }
 0x6b7   : > { %v1853_v45 = vadd.f32 %v1852_v56, %v1851_v44  ;;  %v1931_v9 = vrot.slane %v2727_v1, 4  ;;  %v1932_v15 = vrot.slane %v2730_v2, 4 }
 0x6b8   : > { %v1936_v13 = vsel %vm1850_vm6, %v1930_v8, 0.0 }
 0x6b9   : > { %v1856_v35 = vadd.f32 %v1855_v46, %v1853_v45  ;;  %v1937_v14 = vsel %vm1850_vm6, %v1931_v9, 0.0  ;;  %v1939_v17 = vsel %vm1854_vm7, %v1932_v15, 0.0 }
 0x6ba   : > { %v1938_v16 = vadd.f32 %v1937_v14, %v1936_v13 }
 0x6bb   : > { %1857 = vadd.xlane.f32.xlu0 %v1856_v35 }
 0x6bc   : > { %v1940_v19 = vadd.f32 %v1939_v17, %v1938_v16 }
 0x72e   : > { %v1858_v49 = vpop.xlane.xlu0 %1857 }
 0x72f   : > { %v1859_v50 = vrot.slane %v1858_v49, 4 }
 0x731   : > { %v1860_v48 = vadd.f32 %v1859_v50, %v1858_v49 }
 0x733   : > { %v1861_v51 = vrot.slane %v1860_v48, 2 }
 0x735   : > { %v1862_v53 = vadd.f32 %v1861_v51, %v1860_v48 }
 0x737   : > { %v1863_v52 = vrot.slane %v1862_v53, 1 }
 0x739   : > { %v1864_v54 = vadd.f32 %v1863_v52, %v1862_v53 }
 0x73b   : > { %2188 = vpush %v1864_v54 }
 0x76c   : > { %s2189_s8 = spop %2188 }
 0x76d   : > { %v1866_v57 = vstv %s2189_s8 }
 0x76e   : > { %v1867_v43 = vmul.f32 0.0009765625, %v1866_v57 }
 0x770   : > { %v1868_v58 = vsub.f32 %v2724_v0, %v1867_v43  ;;  %v1869_v59 = vsub.f32 %v2727_v1, %v1867_v43  ;;  %v1870_v60 = vsub.f32 %v2730_v2, %v1867_v43 }
 0x772   : > { %v2742_v61 = vmul.f32 %v1868_v58, %v2693_v47  ;;  %v2745_v62 = vmul.f32 %v1869_v59, %v2691_v42  ;;  %v2748_v63 = vmul.f32 %v1870_v60, %v2698_v34 }
 0x774   : > { %v1874_v3 = vmul.f32 %v2742_v61, %v2742_v61  ;;  %v1875_v4 = vmul.f32 %v2745_v62, %v2745_v62  ;;  %v1876_v5 = vmul.f32 %v2748_v63, %v2748_v63 }
 0x776   : > { %v1877_v6 = vsel %vm1850_vm6, %v1874_v3, 0.0  ;;  %v1878_v7 = vsel %vm1850_vm6, %v1875_v4, 0.0  ;;  %v1880_v11 = vsel %vm1854_vm7, %v1876_v5, 0.0 }
 0x777   : > { %v1879_v10 = vadd.f32 %v1878_v7, %v1877_v6 }
 0x779   : > { %v1881_v12 = vadd.f32 %v1880_v11, %v1879_v10 }
 0x77b   : > { %1882 = vadd.xlane.f32.xlu2 %v1881_v12 }
 0x783   : > { %1941 = vadd.xlane.f32.xlu2 %v1940_v19 }
 0x79b   : > { %1908 = vperm.xlu2 %2303, %v2718_v29  }
 0x7ee   : > { %v1883_v20 = vpop.xlane.xlu2 %1882 }
 0x7ef   : > { %v1884_v21 = vrot.slane %v1883_v20, 4 }
 0x7f1   : > { %v1885_v22 = vadd.f32 %v1884_v21, %v1883_v20 }
 0x7f3   : > { %v1886_v23 = vrot.slane %v1885_v22, 2 }
 0x7f5   : > { %v1887_v18 = vadd.f32 %v1886_v23, %v1885_v22 }
 0x7f6   : > { %v1942_v24 = vpop.xlane.xlu2 %1941 }
 0x7f7   : > { %v1943_v25 = vrot.slane %v1942_v24, 4  ;;  %v1888_v27 = vrot.slane %v1887_v18, 1 }
 0x7f9   : > { %v1944_v28 = vadd.f32 %v1943_v25, %v1942_v24  ;;  %v1889_v30 = vadd.f32 %v1888_v27, %v1887_v18 }
 0x7fb   : > { %v1945_v31 = vrot.slane %v1944_v28, 2  ;;  %2190 = vpush %v1889_v30 }
 0x7fd   : > { %v1946_v32 = vadd.f32 %v1945_v31, %v1944_v28 }
 0x7fe   : > { %v1909_v23 = vpop.permute.xlu2 %1908 }
 0x7ff   : > { %v1947_v33 = vrot.slane %v1946_v32, 1 }
 0x801   : > { %v1948_v40 = vadd.f32 %v1947_v33, %v1946_v32 }
 0x803   : > { %2192 = vpush %v1948_v40 }
 0x82c   : > { %s2766_s13 = spop %2190 }
 0x82d   : > { %v1891_v3 = vstv %s2766_s13 }
 0x82e   : > { %v1892_v4 = vmul.f32 0.0009765625, %v1891_v3 }
 0x830   : > { %v1893_v5 = vadd.f32 1e-05, %v1892_v4 }
 0x832   : > { %2320 = vrsqrt.f32 %v1893_v5  ;;  %vm1900_vm9 = vweird.f32 %v1893_v5 }
 0x834   : > { %s2193_s14 = spop %2192 }
 0x835   : > { %v1950_v36 = vstv %s2193_s14 }
 0x836   : > { %v1951_v37 = vmul.f32 0.0009765625, %v1950_v36 }
 0x838   : > { %v1952_v38 = vsub.f32 %v2724_v0, %v1951_v37  ;;  %v1953_v39 = vsub.f32 %v2727_v1, %v1951_v37  ;;  %v1954_v41 = vsub.f32 %v2730_v2, %v1951_v37  ;;  %v2321_v6 = vpop.eup %2320 }
 0x839   : > { %v1895_v7 = vmul.f32 %v2321_v6, %v1893_v5  ;;  %vm1901_vm8 = vweird.f32 %v2321_v6 }
 0x83a   : > { %v2772_v44 = vmul.f32 %v1952_v38, %v2693_v47  ;;  %v2775_v56 = vmul.f32 %v1953_v39, %v2691_v42  ;;  %v2778_v45 = vmul.f32 %v1954_v41, %v2698_v34  ;;  %vm1902_vm10 = vmor %vm1900_vm9, %vm1901_vm8 }
 0x83b   : > { %v1896_v8 = vmul.f32 %v2321_v6, %v1895_v7 }
 0x83c   : > { %v1958_v46 = vmul.f32 %v2772_v44, %v2772_v44  ;;  %v1959_v35 = vmul.f32 %v2775_v56, %v2775_v56  ;;  %v1960_v0 = vmul.f32 %v2778_v45, %v2778_v45 }
 0x83d   : > { %v1897_v10 = vmul.f32 0.5, %v1896_v8 }
 0x83e   : > { %v1964_v1 = vrot.slane %v1958_v46, 4  ;;  %v1965_v2 = vrot.slane %v1959_v35, 4  ;;  %v1966_v49 = vrot.slane %v1960_v0, 4 }
 0x83f   : > { %v1898_v12 = vsub.f32 1.5, %v1897_v10 }
 0x840   : > { %v1970_v50 = vsel %vm1850_vm6, %v1964_v1, 0.0  ;;  %v1971_v48 = vsel %vm1850_vm6, %v1965_v2, 0.0  ;;  %v1973_v53 = vsel %vm1854_vm7, %v1966_v49, 0.0 }
 0x841   : > { %v1972_v51 = vadd.f32 %v1971_v48, %v1970_v50  ;;  %v1899_v13 = vmul.f32 %v2321_v6, %v1898_v12 }
 0x843   : > { %v1974_v52 = vadd.f32 %v1973_v53, %v1972_v51  ;;  %v1903_v16 = vsel %vm1902_vm10, %v2321_v6, %v1899_v13 }
 0x844   : > { %v1905_v19 = vmul.f32 %v1903_v16, %v2745_v62  ;;  %v1906_v20 = vmul.f32 %v1903_v16, %v2748_v63  ;;  %v1904_v22 = vmul.f32 %v1903_v16, %v2742_v61 }
 0x845   : > { %1975 = vadd.xlane.f32.xlu1 %v1974_v52 }
 0x846   : > { %v1913_v27 = vmul.f32 %v1909_v23, %v1906_v20  ;;  %v1912_v28 = vmul.f32 %v1909_v23, %v1905_v19  ;;  %v1911_v30 = vmul.f32 %v1909_v23, %v1904_v22 }
 0x85e   : > { %1915 = vperm.xlu1 %2304, %v2718_v29  }
 0x8b8   : > { %v1976_v54 = vpop.xlane.xlu1 %1975 }
 0x8b9   : > { %v1977_v55 = vrot.slane %v1976_v54, 4 }
 0x8bb   : > { %v1978_v57 = vadd.f32 %v1977_v55, %v1976_v54 }
 0x8bd   : > { %v1979_v43 = vrot.slane %v1978_v57, 2 }
 0x8bf   : > { %v1980_v58 = vadd.f32 %v1979_v43, %v1978_v57 }
 0x8c1   : > { %v1981_v59 = vrot.slane %v1980_v58, 1 }
 0x8c3   : > { %v1982_v60 = vadd.f32 %v1981_v59, %v1980_v58 }
 0x8c5   : > { %2194 = vpush %v1982_v60 }
 0x8d0   : > { %v1916_v24 = vpop.permute.xlu1 %1915 }
 0x8d1   : > { %v1920_v32 = vadd.f32 %v1916_v24, %v1913_v27  ;;  %v1919_v33 = vadd.f32 %v1916_v24, %v1912_v28  ;;  %v1918_v61 = vadd.f32 %v1916_v24, %v1911_v30 }
 0x8d3   : > { %v1923_v38 = vmax.f32 %v1920_v32, 0.0  ;;  %v1922_v39 = vmax.f32 %v1919_v33, 0.0  ;;  %v1921_v35 = vmax.f32 %v1918_v61, 0.0 }
 0x8d5   : > { %v1926_v50 = vmul.f32 %v1923_v38, %v2698_v34  ;;  %v1924_v48 = vmul.f32 %v1921_v35, %v2693_v47 }
 0x8f6   : > { %s2195_s15 = spop %2194 }
 0x8f7   : > { %v1984_v9 = vstv %s2195_s15 }
 0x8f8   : > { %v1985_v11 = vmul.f32 0.0009765625, %v1984_v9 }
 0x8fa   : > { %v1986_v29 = vadd.f32 1e-05, %v1985_v11 }
 0x8fc   : > { %2322 = vrsqrt.f32 %v1986_v29  ;;  %vm1993_vm12 = vweird.f32 %v1986_v29 }
 0x902   : > { %v2323_v14 = vpop.eup %2322 }
 0x903   : > { %v1988_v15 = vmul.f32 %v2323_v14, %v1986_v29  ;;  %vm1994_vm11 = vweird.f32 %v2323_v14 }
 0x904   : > { %vm1995_vm13 = vmor %vm1993_vm12, %vm1994_vm11 }
 0x905   : > { %v1989_v17 = vmul.f32 %v2323_v14, %v1988_v15 }
 0x907   : > { %v1990_v21 = vmul.f32 0.5, %v1989_v17 }
 0x909   : > { %v1991_v18 = vsub.f32 1.5, %v1990_v21 }
 0x90b   : > { %v1992_v25 = vmul.f32 %v2323_v14, %v1991_v18 }
 0x90d   : > { %v1996_v31 = vsel %vm1995_vm13, %v2323_v14, %v1992_v25 }
 0x90e   : > { %v1997_v62 = vmul.f32 %v1996_v31, %v2772_v44  ;;  %v1998_v63 = vmul.f32 %v1996_v31, %v2775_v56  ;;  %v1999_v40 = vmul.f32 %v1996_v31, %v2778_v45  ;;  %v1925_v44 = vmul.f32 %v1922_v39, %v2691_v42 }
 0x910   : > { %v2002_v26 = vmul.f32 %v1999_v40, %v1909_v23  ;;  %v2001_v36 = vmul.f32 %v1998_v63, %v1909_v23  ;;  %v2000_v37 = vmul.f32 %v1997_v62, %v1909_v23 }
 0x912   : > { %v2005_v41 = vadd.f32 %v2002_v26, %v1916_v24  ;;  %v2004_v46 = vadd.f32 %v2001_v36, %v1916_v24  ;;  %v2003_v0 = vadd.f32 %v2000_v37, %v1916_v24 }
 0x914   : > { %v2008_v1 = vmax.f32 %v2005_v41, 0.0  ;;  %v2007_v2 = vmax.f32 %v2004_v46, 0.0  ;;  %v2006_v49 = vmax.f32 %v2003_v0, 0.0 }
 0x916   : > { %v2011_v56 = vmul.f32 %v2008_v1, %v2698_v34  ;;  %v2010_v45 = vmul.f32 %v2007_v2, %v2691_v42  ;;  %v2009_v51 = vmul.f32 %v2006_v49, %v2693_v47 }
 0x918   : > { %v2014_v53 = vsel %vm1850_vm6, %v1926_v50, %v2011_v56  ;;  %v2013_v52 = vsel %vm1850_vm6, %v1925_v44, %v2010_v45  ;;  %v2012_v54 = vsel %vm1850_vm6, %v1924_v48, %v2009_v51 }
 0x919   : > { %2022 = vrot.lane.b32.xlu2 %v2014_v53, %s2348_s16  ;;  %2020 = vrot.lane.b32.xlu0 %v2013_v52, %s2348_s16 }
 0x91a   : > { %2018 = vrot.lane.b32.xlu1 %v2012_v54, %s2348_s16 }
 0x973   : > { %v2023_v55 = vpop.permute.xlu2 %2022 }
 0x98b   : > { %v2021_v42 = vpop.permute.xlu0 %2020 }
 0x98c   : > { %v2026_v34 = vsel %vm2024_vm14, %v2021_v42, %v2023_v55  ;;  %v2019_v47 = vpop.permute.xlu1 %2018 }
 0x98d   : > { %v2032_v57 = vsel %vm2031_vm15, %v2026_v34, 0.0  ;;  %v2025_v43 = vsel %vm2024_vm14, %v2019_v47, %v2021_v42  ;;  %v2030_v58 = vsel %vm2024_vm14, 0.0, %v2019_v47 }
 0x98e   : > { %2035 = vst [vmem:[%s271_s25 + $0x10] sm:$0xff] %v2032_v57 }
 0x98f   : > { %2033 = vst [vmem:[%s271_s25] sm:$0xff] %v2030_v58 }
 0x990   : > { %2034 = vst [vmem:[%s271_s25 + $0x8] sm:$0xff] %v2025_v43 }
 0x991 PF: > { %s16_s21 = sadd.s32 1, %s2331_s21  }
 0x992   : > { %p13_p4 = scmp.ge.s32.totalorder %s16_s21, 4  }
 0x994   :  { %15 = sbr.rel (!%p13_p4) target bundleno = 1 (0x1), region = 93 }

</bundles_post_ra>
